<compile_context>
chip_gen: v6e
topology: v6e:2x2x1
jax: 0.10.0
libtpu: 0.0.40
codegen_flags: <defaults>
</compile_context>

<pallas_src>
import functools

import jax
import jax.numpy as jnp
from jax.experimental import pallas as pl
from jax.experimental.pallas import tpu as pltpu

W0 = 30.0


def _film_siren_kernel(x_ref, f_ref, p_ref, o_ref, *, w0):
    # x_ref: (bb, tn, D) tile; f_ref / p_ref: (bb, 1, D) conditioning rows.
    # f32 compute regardless of I/O dtype (v5e has no bf16 VPU/EUP path);
    # w0 is folded into the tiny (bb, 1, D) conditioning rows so the
    # per-element work is one mul + one add + sin (matters on v7x, where this
    # kernel is VALU/EUP-bound).  The fold reassociates the sin argument by a
    # few ULPs of |arg| ~ O(100) — covered by the self-test tolerance.
    x = x_ref[...].astype(jnp.float32)
    fw = w0 * f_ref[...].astype(jnp.float32)   # broadcasts over the tn axis
    pw = w0 * p_ref[...].astype(jnp.float32)
    o_ref[...] = jnp.sin(x * fw + pw).astype(o_ref.dtype)


def _sublane_multiple(itemsize):
    # Sub-32-bit dtypes pack along sublanes: one bf16 vreg is [16,128],
    # int8/fp8 is [32,128]; rounding tn to these multiples avoids padded /
    # masked sublane layouts.
    return {4: 8, 2: 16, 1: 32}.get(int(itemsize), 8)


def _largest_divisor_leq(n, cap):
    cap = max(1, min(n, int(cap)))
    for c in range(cap, 0, -1):
        if n % c == 0:
            return c
    return 1


def _pick_tiling(B, N, D, itemsize, target_bytes=2 << 20):
    """Pick (bb, tn): batch rows and N-rows blocked into one grid step.

    Aims for ~2 MiB per x tile (so double-buffered x + out ~ 8 MiB of VMEM,
    inside every generation's default scoped VMEM, incl. v5e's 16 MiB),
    rounds tn to the dtype-appropriate sublane multiple, blocks multiple
    batch rows when a whole batch slab is small, and keeps the grid at >= 2
    steps when possible so both v7x TensorCores get work.
    """
    sub = _sublane_multiple(itemsize)
    row_bytes = max(1, D * itemsize)
    slab_bytes = N * row_bytes                      # one full batch row

    tn = (target_bytes // row_bytes // sub) * sub   # ~target bytes of rows
    tn = int(min(N, max(sub, tn)))

    bb = 1
    if tn >= N and slab_bytes < target_bytes:
        tn = N
        bb = _largest_divisor_leq(B, target_bytes // max(1, slab_bytes))

    def steps(bb_, tn_):
        return (B // bb_) * (-(-N // tn_))

    # v7x has 2 TensorCores; avoid a single-step grid when we can split.
    if steps(bb, tn) < 2:
        if bb > 1:
            bb = _largest_divisor_leq(B, bb // 2)
        elif tn == N and N >= 2 * sub:
            tn = max(sub, ((-(-N // 2)) // sub) * sub)
    return bb, tn


def film_siren(tensor, frequency, phase_shift, *, w0=W0, tn=None, bb=None):
    """tensor: [B, N, D]; frequency, phase_shift: [B, 1, D]."""
    B, N, D = tensor.shape
    assert frequency.shape == (B, 1, D) and phase_shift.shape == (B, 1, D)

    itemsize = tensor.dtype.itemsize
    sub = _sublane_multiple(itemsize)

    # Lane-density guard: a last dim that is not a multiple of 128 produces
    # masked partial stores (the single biggest measured lever on store-bound
    # elementwise kernels) — pad D and slice the result back.
    Dp = -(-D // 128) * 128
    pad = Dp - D
    if pad:
        cfg = ((0, 0), (0, 0), (0, pad))
        tensor = jnp.pad(tensor, cfg)
        frequency = jnp.pad(frequency, cfg)
        phase_shift = jnp.pad(phase_shift, cfg)

    if tn is None and bb is None:
        bb, tn = _pick_tiling(B, N, Dp, itemsize)
    else:
        tn = N if tn is None else int(min(tn, N))
        bb = 1 if bb is None else int(bb)
    assert tn == N or tn % sub == 0, (
        f"tile rows must be a multiple of {sub} for this dtype, or full N")
    assert B % bb == 0, "bb must divide B"

    grid = (B // bb, pl.cdiv(N, tn))

    # D kept whole (and 128-aligned) in the block -> lane-dense loads/stores.
    x_spec = pl.BlockSpec((bb, tn, Dp), lambda b, i: (b, i, 0))
    cond_spec = pl.BlockSpec((bb, 1, Dp), lambda b, i: (b, 0, 0))
    out_spec = pl.BlockSpec((bb, tn, Dp), lambda b, i: (b, i, 0))

    out = pl.pallas_call(
        functools.partial(_film_siren_kernel, w0=float(w0)),
        out_shape=jax.ShapeDtypeStruct((B, N, Dp), tensor.dtype),
        grid=grid,
        in_specs=[x_spec, cond_spec, cond_spec],
        out_specs=out_spec,
        compiler_params=pltpu.CompilerParams(
            dimension_semantics=("parallel", "parallel")),
    )(tensor, frequency, phase_shift)

    if pad:
        out = out[..., :D]
    return out


def film_siren_ref(tensor, frequency, phase_shift, w0=W0):
    return jnp.sin(w0 * (tensor * frequency + phase_shift))


if __name__ == "__main__":
    key = jax.random.PRNGKey(0)
    kx, kf, kp = jax.random.split(key, 3)

    B, N, D = 2, 256, 128
    # Realistic SIREN-style ranges: coordinates in [-1, 1], FiLM conditioning
    # ~ N(0, 1), so the sin argument stays at O(100) and the comparison below
    # is meaningful despite TPU-vs-XLA sin approximation differences.
    x = jax.random.uniform(kx, (B, N, D), dtype=jnp.float32,
                           minval=-1.0, maxval=1.0)
    freq = jax.random.normal(kf, (B, 1, D), dtype=jnp.float32)
    phase = jax.random.normal(kp, (B, 1, D), dtype=jnp.float32)

    ref = film_siren_ref(x, freq, phase)

    # 1) Auto-tiled f32 path (bb/tn auto-picked; grid has >= 2 steps).
    out = jax.block_until_ready(film_siren(x, freq, phase))
    assert out.shape == ref.shape and out.dtype == ref.dtype
    # w0=30 amplifies the sin argument; the TPU transcendental lowering and
    # the w0-folding reassociation differ from XLA's sin by a few ULPs of a
    # large (~O(100)) argument, hence the tolerance.
    assert jnp.allclose(out, ref, atol=2e-3, rtol=2e-3), "mismatch vs reference"

    # 2) Explicit smaller tile -> multi-step grid along N.
    out_tiled = jax.block_until_ready(film_siren(x, freq, phase, tn=64))
    assert jnp.allclose(out_tiled, ref, atol=2e-3, rtol=2e-3), \
        "tiled mismatch vs reference"

    # 3) bf16 I/O path: halves HBM traffic; compute stays f32 in-kernel.
    xb, fb, pb = (a.astype(jnp.bfloat16) for a in (x, freq, phase))
    out_bf16 = jax.block_until_ready(film_siren(xb, fb, pb))
    assert out_bf16.dtype == jnp.bfloat16
    ref_bf16 = film_siren_ref(xb.astype(jnp.float32), fb.astype(jnp.float32),
                              pb.astype(jnp.float32))
    assert jnp.allclose(out_bf16.astype(jnp.float32), ref_bf16,
                        atol=5e-2, rtol=5e-2), "bf16 mismatch vs reference"

    # 4) D not a multiple of 128 exercises the lane-density padding path.
    D2, N2 = 96, 64
    x2 = jax.random.uniform(kx, (B, N2, D2), dtype=jnp.float32,
                            minval=-1.0, maxval=1.0)
    f2 = jax.random.normal(kf, (B, 1, D2), dtype=jnp.float32)
    p2 = jax.random.normal(kp, (B, 1, D2), dtype=jnp.float32)
    out2 = jax.block_until_ready(film_siren(x2, f2, p2))
    assert jnp.allclose(out2, film_siren_ref(x2, f2, p2),
                        atol=2e-3, rtol=2e-3), "padded-D mismatch vs reference"

    print("KERNEL_OK")
</pallas_src>

<mosaic_0001>
module attributes {stable_mosaic.version = 11 : i64} {
  func.func @_film_siren_kernel(%arg0: i32, %arg1: i32, %arg2: memref<1x256x128xf32, #tpu.memory_space<vmem>>, %arg3: memref<1x1x128xf32, #tpu.memory_space<vmem>>, %arg4: memref<1x1x128xf32, #tpu.memory_space<vmem>>, %arg5: memref<1x256x128xf32, #tpu.memory_space<vmem>>) attributes {dimension_semantics = [#tpu.dimension_semantics<parallel>, #tpu.dimension_semantics<parallel>], iteration_bounds = array<i64: 2, 1>, scalar_prefetch = 0 : i64, scratch_operands = 0 : i64, tpu.core_type = #tpu.core_type<tc>, window_params = [{transform_indices = @transform_0, window_bounds = array<i64: 1, 256, 128>}, {transform_indices = @transform_1, window_bounds = array<i64: 1, 1, 128>}, {transform_indices = @transform_2, window_bounds = array<i64: 1, 1, 128>}, {transform_indices = @transform_3, window_bounds = array<i64: 1, 256, 128>}]} {
    %c0 = arith.constant 0 : index
    %c0_0 = arith.constant 0 : index
    %c0_1 = arith.constant 0 : index
    %0 = vector.load %arg2[%c0, %c0_0, %c0_1] : memref<1x256x128xf32, #tpu.memory_space<vmem>>, vector<1x256x128xf32>
    %c0_2 = arith.constant 0 : index
    %c0_3 = arith.constant 0 : index
    %c0_4 = arith.constant 0 : index
    %1 = vector.load %arg3[%c0_2, %c0_3, %c0_4] : memref<1x1x128xf32, #tpu.memory_space<vmem>>, vector<1x1x128xf32>
    %cst = arith.constant 3.000000e+01 : f32
    %2 = vector.broadcast %cst : f32 to vector<1x1x128xf32>
    %3 = arith.mulf %2, %1 : vector<1x1x128xf32>
    %c0_5 = arith.constant 0 : index
    %c0_6 = arith.constant 0 : index
    %c0_7 = arith.constant 0 : index
    %4 = vector.load %arg4[%c0_5, %c0_6, %c0_7] : memref<1x1x128xf32, #tpu.memory_space<vmem>>, vector<1x1x128xf32>
    %cst_8 = arith.constant 3.000000e+01 : f32
    %5 = vector.broadcast %cst_8 : f32 to vector<1x1x128xf32>
    %6 = arith.mulf %5, %4 : vector<1x1x128xf32>
    %7 = vector.broadcast %3 : vector<1x1x128xf32> to vector<1x256x128xf32>
    %8 = arith.mulf %0, %7 : vector<1x256x128xf32>
    %9 = vector.broadcast %6 : vector<1x1x128xf32> to vector<1x256x128xf32>
    %10 = arith.addf %8, %9 : vector<1x256x128xf32>
    %11 = math.sin %10 : vector<1x256x128xf32>
    %c0_9 = arith.constant 0 : index
    %c0_10 = arith.constant 0 : index
    %c0_11 = arith.constant 0 : index
    %12 = vector.load %arg5[%c0_9, %c0_10, %c0_11] : memref<1x256x128xf32, #tpu.memory_space<vmem>>, vector<1x256x128xf32>
    tpu.vector_store %arg5[%c0_9, %c0_10, %c0_11], %11 {strides = array<i32>} : memref<1x256x128xf32, #tpu.memory_space<vmem>>, vector<1x256x128xf32>,
    return
  }
  func.func @transform_0(%arg0: i32, %arg1: i32) -> (i32, i32, i32) {
    %c0_i32 = arith.constant 0 : i32
    %c0_i32_0 = arith.constant 0 : i32
    return %arg0, %arg1, %c0_i32 : i32, i32, i32
  }
  func.func @transform_1(%arg0: i32, %arg1: i32) -> (i32, i32, i32) {
    %c0_i32 = arith.constant 0 : i32
    %c0_i32_0 = arith.constant 0 : i32
    %c0_i32_1 = arith.constant 0 : i32
    return %arg0, %c0_i32, %c0_i32_0 : i32, i32, i32
  }
  func.func @transform_2(%arg0: i32, %arg1: i32) -> (i32, i32, i32) {
    %c0_i32 = arith.constant 0 : i32
    %c0_i32_0 = arith.constant 0 : i32
    %c0_i32_1 = arith.constant 0 : i32
    return %arg0, %c0_i32, %c0_i32_0 : i32, i32, i32
  }
  func.func @transform_3(%arg0: i32, %arg1: i32) -> (i32, i32, i32) {
    %c0_i32 = arith.constant 0 : i32
    %c0_i32_0 = arith.constant 0 : i32
    return %arg0, %arg1, %c0_i32 : i32, i32, i32
  }
}

</mosaic_0001>

<bundles_post_ra>
// kernel: tpu_custom_call.1
= control target key start
LH: loop header
LB: loop body
LE: loop exit
PB: predicated region body
PF: predicated region fallthrough
CT: control target
= control target key end

     0   :  { %8 = vsyncpa [#allocation3], 0  ;;  %s7290_s0 = inlined_call_operand.hbm [shape: f32[2,256,128], index: 0, kind: input, shape index: {}]   ;;  %s7291_s1 = inlined_call_operand.hbm [shape: f32[2,1,128], index: 1, kind: input, shape index: {}]   ;;  %s7292_s2 = inlined_call_operand.vmem [shape: f32[2,1,128], index: 2, kind: input, shape index: {}]   ;;  %s7293_s3 = inlined_call_operand.hbm [shape: f32[2,256,128], index: 3, kind: output, shape index: {}]  }
   0x1   :  { %10 = vsyncpa [#allocation3 + $0x1], 0 }
   0x2   :  { %11 = vsyncpa [#allocation6], 0 }
   0x3   :  { %13 = vsyncpa [#allocation6 + $0x1], 0 }
   0x4   :  { %14 = vsyncpa [#allocation4], 0 }
   0x5   :  { %16 = vsyncpa [#allocation4 + $0x1], 0  ;;  %s4515_s12 = smov 0   ;;  %s4517_s13 = smov 0  }
   0x6   :  { %s4519_s14 = smov 0   ;;  %s4521_s15 = smov 0  }
   0x7   :  { %s4523_s16 = smov 0   ;;  %s4525_s17 = smov 0  }
   0x8 LB: > { %s3861_s18 = sadd.s32 4294967295, %s4480_s17   ;;  %s3862_s19 = sadd.s32 4294967294, %s4480_s17   ;;  %s4480_s17 = sphi %s4525_s17, %s22_s17   ;;  %s4476_s16 = sphi %s4523_s16, %s7420_s16   ;;  %s4472_s15 = sphi %s4521_s15, %s7419_s15   ;;  %s4468_s14 = sphi %s4519_s14, %s7418_s14   ;;  %s4464_s13 = sphi %s4517_s13, %s7417_s13   ;;  %s4460_s12 = sphi %s4515_s12, %s7416_s12  }
   0x9   : > { %s34_s20 = sadd.s32 1, %s4476_s16  ;;  %s43_s21 = sadd.s32 1, %s4468_s14 }
   0xa   : > { %p36_p0 = scmp.ge.s32.totalorder %s34_s20, 2  ;;  %p50_p1 = scmp.ne.s32.totalorder %s4468_s14, %s4464_s13 }
   0xb   : > { %p51_p2 = scmp.eq.s32.totalorder %s4480_s17, 0  ;;  %p56_p3 = scmp.ne.s32.totalorder %s4464_s13, %s4460_s12 }
   0xc   : > { %s7422_s20 = smov (%p36_p0, %s34_s20), 0  ;;  %p57_p5 = scmp.eq.s32.totalorder %s3861_s18, 0 }
   0xd   : > { %p4556_p4 = por %p51_p2, %p50_p1  ;;  %s38_s23 = ssub.s32 %s4476_s16, %s7422_s20 }
   0xe   : > { %p134_p6 = scmp.eq.s32.totalorder %s3861_s18, 1  ;;  %p41_p7 = scmp.eq.s32.totalorder %s38_s23, 0 }
   0xf   : > { %p4562_p8 = por %p57_p5, %p56_p3  ;;  %p140_p10 = scmp.eq.s32.totalorder %s3862_s19, 1 }
  0x10   : > { %p4566_p9 = por %p134_p6, %p50_p1  ;;  %p3864_p12 = scmp.ge.s32.totalorder %s4480_s17, 2 }
  0x11   : > { %s4571_s26 = scalar_select %p41_p7, %s4468_s14, %s43_s21  }
  0x12   : > { %p4573_p11 = por %p140_p10, %p56_p3  ;;  %p4152_p13 = scmp.lt.s32.totalorder %s4480_s17, 2 }
  0x13   : > { %s4580_s28 = sand.u32 1, %s4468_s14   ;;  %s4005_s30 = sshll.u32 %s4476_s16, 12 }
  0x14   : > { %s3865_s29 = sshll.u32 %s4580_s28, 8  ;;  %s172_s6 = scalar_lea.hbm %s7290_s0, %s4005_s30 }
  0x15   : > { %s164_s7 = scalar_lea.vmem [#allocation2], %s3865_s29  ;;  %p4589_p0 = pnand %p4152_p13, %p4556_p4 }
  0x16   : > { %s173_s8 = sshll.u32 %s164_s7, 4  ;;  %p3869_p1 = scmp.ge.s32.totalorder %s4480_s17, 1  ;;  %s174_s8 = int_to_ptr.vmem [resolvable:$true] %s173_s8 }
  0x17   : > { %s161_s10 = scalar_lea.sflag [#allocation3], %s4580_s28  ;;  %p4342_p2 = pneg %p4589_p0 }
  0x18   : > { %s4353_s11 = scalar_lea.vmem %s174_s8, 4096  ;;  %s4482_s18 = smov [#allocation2]  }
  0x19   : > { %p4354_p3 = scmp.ne.s32.totalorder %s174_s8, %s4353_s11  ;;  %s4358_s19 = sshll.u32 %s4482_s18, 4  ;;  %s4359_s19 = int_to_ptr.vmem [resolvable:$false] %s4358_s19 }
  0x1a   : > { %s4360_s21 = scalar_lea.vmem %s4359_s19, 8192  ;;  %p4361_p4 = scmp.lt.s32.totalorder %s174_s8, %s4359_s19 }
  0x1b   : > { %p4356_p5 = pnand %p4354_p3, %p4342_p2  ;;  %p4362_p7 = scmp.lt.s32.totalorder %s4360_s21, %s4353_s11 }
  0x1d   : > { %p4357_p6 = pneg %p4356_p5  ;;  %p4363_p10 = por %p4362_p7, %p4361_p4 }
  0x1f   : > { %p4364_p13 = pnand %p4363_p10, %p4357_p6 }
  0x21   : > { %4367 = shalt.err (!%p4364_p13)
}
  0x22   : > { %s4483_s22 = smov 128   ;;  %s4484_s23 = smov 8  }
  0x23   : > { %4144 = dma.hbm_to_vmem [thread:$0]  (!%p4589_p0), %s172_s6, 4096, %s174_s8, %s161_s10, %s4483_s22, %s4483_s22, %s4484_s23  }
  0x24   : > { %p204_p3 = scmp.lt.s32.totalorder %s4480_s17, 3  ;;  %s3868_s29 = sshll.u32 %s4476_s16, 4 }
  0x25   : > { %s191_s7 = scalar_lea.hbm %s7291_s1, %s3868_s29  ;;  %s186_s11 = scalar_lea.vmem [#allocation5], %s4580_s28 }
  0x26   : > { %p4606_p5 = pnand %p3869_p1, %p204_p3  ;;  %s193_s18 = sshll.u32 %s186_s11, 4  ;;  %s194_s18 = int_to_ptr.vmem [resolvable:$true] %s193_s18 }
  0x27   : > { %s184_s19 = scalar_lea.sflag [#allocation6], %s4580_s28  ;;  %s4381_s21 = scalar_lea.vmem %s194_s18, 16 }
  0x28   : > { %p4382_p6 = scmp.ne.s32.totalorder %s194_s18, %s4381_s21  ;;  %s4485_s6 = smov [#allocation5]  }
  0x29   : > { %s4386_s8 = sshll.u32 %s4485_s6, 4  ;;  %s4387_s8 = int_to_ptr.vmem [resolvable:$false] %s4386_s8 }
  0x2a   : > { %p4384_p4 = pnand %p4382_p6, %p4342_p2  ;;  %s4388_s10 = scalar_lea.vmem %s4387_s8, 32 }
  0x2b   : > { %p4389_p1 = scmp.lt.s32.totalorder %s194_s18, %s4387_s8  ;;  %p4390_p10 = scmp.lt.s32.totalorder %s4388_s10, %s4381_s21 }
  0x2c   : > { %p4385_p7 = pneg %p4384_p4 }
  0x2d   : > { %p4391_p13 = por %p4390_p10, %p4389_p1 }
  0x2f   : > { %p4392_p3 = pnand %p4391_p13, %p4385_p7 }
  0x31   : > { %4395 = shalt.err (!%p4392_p3)
}
  0x32   : > { %4147 = dma.hbm_to_vmem [thread:$0]  (!%p4589_p0), %s191_s7, 16, %s194_s18, %s184_s19  }
  0x33   : > { %208 = sbr.rel (%p4606_p5) target bundleno = 927 (0x39f), region = 32 }
  0x38   : > { %s4623_s28 = sand.u32 1, %s4464_s13  }
  0x39   : > { %s3870_s22 = sshll.u32 %s4623_s28, 8  ;;  %s211_s23 = scalar_lea.sflag [#allocation3], %s4623_s28 }
  0x3a   : > { %s4629_s29 = scalar_lea.vmem [#allocation2], %s3870_s22 }
  0x3b   : > { %4447 = dma.done.wait (%p4562_p8), %s211_s23, 4096  }
  0x3c   : > { %4449 = vsyncadd (%p4562_p8), %s211_s23, 4294963200  ;;  %s220_s9 = scalar_lea.sflag [#allocation6], %s4623_s28  ;;  %s222_s30 = scalar_lea.vmem [#allocation5], %s4623_s28 }
  0x3d   : > { %4451 = dma.done.wait (%p4562_p8), %s220_s9, 16  }
  0x3e   : > { %4453 = vsyncadd (%p4562_p8), %s220_s9, 4294967280  ;;  %p253_p0 = scmp.lt.s32.totalorder %s4472_s15, 1  ;;  %v294_v0 = vlaneseq  ;;  %v257_v3 = vld [vmem:[%s4629_s29] sm:$0xff]  ;;  %v258_v4 = vld [vmem:[%s4629_s29 + $0x8] sm:$0xff]  ;;  %s5096_s11 = scalar_lea.vmem [#allocation7], %s3870_s22 }
  0x3f   : > { %v289_v5 = vld [vmem:[%s222_s30] sm:$0x1]  ;;  %v259_v6 = vld [vmem:[%s4629_s29 + $0x10] sm:$0xff]  ;;  %v262_v8 = vld [vmem:[%s4629_s29 + $0x28] sm:$0xff]  ;;  %s4006_s18 = sshll.u32 %s4472_s15, 12  ;;  %s3745_s19 = sshll.u32 %s5096_s11, 4  ;;  %s7241_s19 = int_to_ptr.vmem [resolvable:$true] %s3745_s19 }
  0x40   : > { %s254_s4 = scalar_select %p253_p0, %s4472_s15, 1  ;;  %v295_v1 = vshrl.u32 %v294_v0, 7  ;;  %v261_v7 = vld [vmem:[%s4629_s29 + $0x20] sm:$0xff]  ;;  %v263_v9 = vld [vmem:[%s4629_s29 + $0x30] sm:$0xff]  ;;  %v290_v10 = vmul.f32 30.0, %v289_v5  ;;  %v264_v12 = vld [vmem:[%s4629_s29 + $0x38] sm:$0xff] }
  0x41   : > { %v265_v13 = vld [vmem:[%s4629_s29 + $0x40] sm:$0xff]  ;;  %v266_v14 = vld [vmem:[%s4629_s29 + $0x48] sm:$0xff]  ;;  %v267_v16 = vld [vmem:[%s4629_s29 + $0x50] sm:$0xff]  ;;  %s7239_s8 = scalar_lea.hbm %s7293_s3, %s4006_s18  ;;  %s3730_s15 = scalar_lea.sflag [#allocation4], %s4623_s28 }
  0x42   : > { %s255_s24 = scalar_lea.vmem %s7292_s2, %s254_s4  ;;  %v296_v2 = vsub.s32 0, %v295_v1  ;;  %v268_v17 = vld [vmem:[%s4629_s29 + $0x58] sm:$0xff]  ;;  %v269_v18 = vld [vmem:[%s4629_s29 + $0x60] sm:$0xff]  ;;  %v270_v20 = vld [vmem:[%s4629_s29 + $0x68] sm:$0xff]  ;;  %s4396_s10 = scalar_lea.vmem %s7241_s19, 4096 }
  0x43   : > { %v291_v11 = vld [vmem:[%s255_s24] sm:$0x1]  ;;  %v271_v21 = vld [vmem:[%s4629_s29 + $0x70] sm:$0xff]  ;;  %v272_v22 = vld [vmem:[%s4629_s29 + $0x78] sm:$0xff]  ;;  %p4397_p8 = scmp.ne.s32.totalorder %s7241_s19, %s4396_s10  ;;  %s4492_s22 = smov [#allocation7]  }
  0x44   : > { %v292_v15 = vmul.f32 30.0, %v291_v11  ;;  %v4658_v19 = vrot.slane %v290_v10, %v296_v2  ;;  %v273_v23 = vld [vmem:[%s4629_s29 + $0x80] sm:$0xff]  ;;  %v274_v24 = vld [vmem:[%s4629_s29 + $0x88] sm:$0xff]  ;;  %v275_v25 = vld [vmem:[%s4629_s29 + $0x90] sm:$0xff]  ;;  %s4400_s23 = sshll.u32 %s4492_s22, 4  ;;  %s4401_s23 = int_to_ptr.vmem [resolvable:$false] %s4400_s23 }
  0x45   : > { %v276_v29 = vld [vmem:[%s4629_s29 + $0x98] sm:$0xff]  ;;  %v277_v30 = vld [vmem:[%s4629_s29 + $0xa0] sm:$0xff]  ;;  %v278_v31 = vld [vmem:[%s4629_s29 + $0xa8] sm:$0xff]  ;;  %p4398_p2 = pnand %p4397_p8, %p4566_p9  ;;  %p4403_p6 = scmp.lt.s32.totalorder %s7241_s19, %s4401_s23 }
  0x46   : > { %v299_v26 = vmul.f32 %v4658_v19, %v257_v3  ;;  %v300_v27 = vmul.f32 %v4658_v19, %v258_v4  ;;  %v4668_v28 = vrot.slane %v292_v15, %v296_v2  ;;  %v301_v32 = vmul.f32 %v4658_v19, %v259_v6  ;;  %v279_v36 = vld [vmem:[%s4629_s29 + $0xb0] sm:$0xff]  ;;  %v280_v37 = vld [vmem:[%s4629_s29 + $0xb8] sm:$0xff]  ;;  %v281_v38 = vld [vmem:[%s4629_s29 + $0xc0] sm:$0xff] }
  0x47   : > { %v303_v33 = vmul.f32 %v4658_v19, %v261_v7  ;;  %v304_v34 = vmul.f32 %v4658_v19, %v262_v8  ;;  %v305_v35 = vmul.f32 %v4658_v19, %v263_v9  ;;  %v306_v39 = vmul.f32 %v4658_v19, %v264_v12  ;;  %v282_v43 = vld [vmem:[%s4629_s29 + $0xc8] sm:$0xff]  ;;  %v283_v44 = vld [vmem:[%s4629_s29 + $0xd0] sm:$0xff]  ;;  %v284_v45 = vld [vmem:[%s4629_s29 + $0xd8] sm:$0xff]  ;;  %p4399_p5 = pneg %p4398_p2 }
  0x48   : > { %v307_v40 = vmul.f32 %v4658_v19, %v265_v13  ;;  %v308_v41 = vmul.f32 %v4658_v19, %v266_v14  ;;  %v309_v42 = vmul.f32 %v4658_v19, %v267_v16  ;;  %v310_v46 = vmul.f32 %v4658_v19, %v268_v17  ;;  %v285_v50 = vld [vmem:[%s4629_s29 + $0xe0] sm:$0xff]  ;;  %v286_v51 = vld [vmem:[%s4629_s29 + $0xe8] sm:$0xff]  ;;  %v287_v52 = vld [vmem:[%s4629_s29 + $0xf0] sm:$0xff] }
  0x49   : > { %v311_v47 = vmul.f32 %v4658_v19, %v269_v18  ;;  %v312_v48 = vmul.f32 %v4658_v19, %v270_v20  ;;  %v313_v49 = vmul.f32 %v4658_v19, %v271_v21  ;;  %v314_v53 = vmul.f32 %v4658_v19, %v272_v22  ;;  %v288_v57 = vld [vmem:[%s4629_s29 + $0xf8] sm:$0xff] }
  0x4a   : > { %v315_v54 = vmul.f32 %v4658_v19, %v273_v23  ;;  %v316_v55 = vmul.f32 %v4658_v19, %v274_v24  ;;  %v317_v56 = vmul.f32 %v4658_v19, %v275_v25  ;;  %v318_v58 = vmul.f32 %v4658_v19, %v276_v29 }
  0x4b   : > { %v319_v59 = vmul.f32 %v4658_v19, %v277_v30  ;;  %v320_v60 = vmul.f32 %v4658_v19, %v278_v31  ;;  %v321_v61 = vmul.f32 %v4658_v19, %v279_v36  ;;  %v322_v62 = vmul.f32 %v4658_v19, %v280_v37 }
  0x4c   : > { %v323_v63 = vmul.f32 %v4658_v19, %v281_v38  ;;  %v324_v0 = vmul.f32 %v4658_v19, %v282_v43  ;;  %v325_v1 = vmul.f32 %v4658_v19, %v283_v44  ;;  %v326_v2 = vmul.f32 %v4658_v19, %v284_v45 }
  0x4d   : > { %v327_v3 = vmul.f32 %v4658_v19, %v285_v50  ;;  %v328_v4 = vmul.f32 %v4658_v19, %v286_v51  ;;  %v329_v5 = vmul.f32 %v4658_v19, %v287_v52  ;;  %v330_v6 = vmul.f32 %v4658_v19, %v288_v57  ;;  %v260_v52 = vld [vmem:[%s4629_s29 + $0x18] sm:$0xff]  ;;  %s4402_s29 = scalar_lea.vmem %s4401_s23, 8192 }
  0x4e   : > { %v4713_v7 = vadd.f32 %v4668_v28, %v299_v26  ;;  %v4716_v8 = vadd.f32 %v4668_v28, %v300_v27  ;;  %v4719_v9 = vadd.f32 %v4668_v28, %v301_v32  ;;  %v4722_v10 = vadd.f32 %v4668_v28, %v303_v33  ;;  %p4404_p4 = scmp.lt.s32.totalorder %s4402_s29, %s4396_s10 }
  0x4f   : > { %v4725_v11 = vadd.f32 %v4668_v28, %v304_v34  ;;  %v4728_v12 = vadd.f32 %v4668_v28, %v305_v35  ;;  %v4731_v13 = vadd.f32 %v4668_v28, %v306_v39  ;;  %v4734_v14 = vadd.f32 %v4668_v28, %v307_v40 }
  0x50   : > { %v4737_v15 = vadd.f32 %v4668_v28, %v308_v41  ;;  %v4740_v16 = vadd.f32 %v4668_v28, %v309_v42  ;;  %v4743_v17 = vadd.f32 %v4668_v28, %v310_v46  ;;  %v4746_v18 = vadd.f32 %v4668_v28, %v311_v47  ;;  %p4405_p7 = por %p4404_p4, %p4403_p6 }
  0x51   : > { %v4749_v20 = vadd.f32 %v4668_v28, %v312_v48  ;;  %v4752_v21 = vadd.f32 %v4668_v28, %v313_v49  ;;  %v4755_v22 = vadd.f32 %v4668_v28, %v314_v53  ;;  %v4758_v23 = vadd.f32 %v4668_v28, %v315_v54 }
  0x52   : > { %v4761_v24 = vadd.f32 %v4668_v28, %v316_v55  ;;  %v4764_v25 = vadd.f32 %v4668_v28, %v317_v56  ;;  %v4767_v26 = vadd.f32 %v4668_v28, %v318_v58  ;;  %v4770_v27 = vadd.f32 %v4668_v28, %v319_v59  ;;  %p4406_p1 = pnand %p4405_p7, %p4399_p5 }
  0x53   : > { %v4773_v29 = vadd.f32 %v4668_v28, %v320_v60  ;;  %v4776_v30 = vadd.f32 %v4668_v28, %v321_v61  ;;  %v4779_v31 = vadd.f32 %v4668_v28, %v322_v62  ;;  %v4782_v32 = vadd.f32 %v4668_v28, %v323_v63 }
  0x54   : > { %v4785_v33 = vadd.f32 %v4668_v28, %v324_v0  ;;  %v4788_v34 = vadd.f32 %v4668_v28, %v325_v1  ;;  %v4791_v35 = vadd.f32 %v4668_v28, %v326_v2  ;;  %v4794_v36 = vadd.f32 %v4668_v28, %v327_v3 }
  0x55   : > { %7325 = vst [vmem:[#allocation11_spill] sm:$0xff] %v4776_v30  ;;  %7326 = vst [vmem:[#allocation12_spill] sm:$0xff] %v4779_v31  ;;  %v4797_v37 = vadd.f32 %v4668_v28, %v328_v4  ;;  %v4800_v38 = vadd.f32 %v4668_v28, %v329_v5  ;;  %v4803_v39 = vadd.f32 %v4668_v28, %v330_v6  ;;  %v7296_v40 = vand.u32 2147483647, %v4713_v7 }
  0x56   : > { %7327 = vst [vmem:[#allocation13_spill] sm:$0xff] %v4782_v32  ;;  %7328 = vst [vmem:[#allocation14_spill] sm:$0xff] %v4785_v33  ;;  %v372_v41 = vand.u32 2139095040, %v4713_v7  ;;  %v7295_v42 = vand.u32 2147483647, %v4716_v8  ;;  %v476_v43 = vand.u32 2139095040, %v4716_v8  ;;  %v4817_v59 = vmul.f32 %v4658_v19, %v260_v52 }
  0x57   : > { %7329 = vst [vmem:[#allocation15_spill] sm:$0xff] %v4788_v34  ;;  %7330 = vst [vmem:[#allocation16_spill] sm:$0xff] %v4791_v35  ;;  %v376_v45 = vand.u32 8388607, %v7296_v40  ;;  %v580_v48 = vand.u32 2139095040, %v4719_v9  ;;  %vm371_vm12 = vcmp.lt.s32.totalorder %v4713_v7, 0 }
  0x58   : > { %7331 = vst [vmem:[#allocation17_spill] sm:$0xff] %v4794_v36  ;;  %7332 = vst [vmem:[#allocation18_spill] sm:$0xff] %v4797_v37  ;;  %v373_v44 = vshrl.u32 %v372_v41, 23  ;;  %v477_v46 = vshrl.u32 %v476_v43, 23  ;;  %v480_v47 = vand.u32 8388607, %v7295_v42 }
  0x59   : > { %7333 = vst [vmem:[#allocation19_spill] sm:$0xff] %v4800_v38  ;;  %7334 = vst [vmem:[#allocation20_spill] sm:$0xff] %v4803_v39  ;;  %v581_v51 = vshrl.u32 %v580_v48, 23  ;;  %v377_v53 = vor.u32 8388608, %v376_v45  ;;  %v7294_v57 = vand.u32 2147483647, %v4719_v9 }
  0x5a   : > { %v3872_v49 = vadd.s32 4294967169, %v373_v44  ;;  %v3876_v50 = vadd.s32 4294967169, %v477_v46  ;;  %v481_v55 = vor.u32 8388608, %v480_v47  ;;  %v7310_v6 = vmov 683565275  }
  0x5b   : > { %v3880_v58 = vadd.s32 4294967169, %v581_v51  ;;  %v4819_v63 = vshll.u32 %v377_v53, 8  ;;  %v4825_v3 = vand.u32 8388607, %v7294_v57  ;;  %v7297_v41 = vmov 2475754826  }
  0x5c   : > { %v379_v54 = vadd.s32 1, %v3872_v49  ;;  %v483_v56 = vadd.s32 1, %v3876_v50  ;;  %v4821_v2 = vshll.u32 %v481_v55, 8  ;;  %v7299_v44 = vmov 2131351028  }
  0x5d   : > { %v4827_v4 = vadd.s32 1, %v3880_v58  ;;  %v7302_v46 = vmov 2102212464   ;;  %v7304_v48 = vmov 920167782  }
  0x5e   : > { %vm380_vm0 = vcmp.gt.s32.totalorder %v379_v54, 0  ;;  %vm484_vm1 = vcmp.gt.s32.totalorder %v483_v56, 0  ;;  %v7335_v37 = vmov 2475754826  }
  0x5f   : > { %v381_v60 = vsel %vm380_vm0, %v379_v54, 0  ;;  %v485_v0 = vsel %vm484_vm1, %v483_v56, 0  ;;  %v7307_v56 = vmov 1326507024   ;;  %vm588_vm6 = vcmp.gt.s32.totalorder %v4827_v4, 0 }
  0x60   : > { %v382_v61 = vshrl.u32 %v381_v60, 5  ;;  %v383_v62 = vand.u32 31, %v381_v60  ;;  %v487_v1 = vand.u32 31, %v485_v0  ;;  %v4834_v50 = vshrl.u32 %v485_v0, 5 }
  0x62   : > { %v384_v5 = vsub.s32 32, %v383_v62  ;;  %v386_v19 = vshll.u32 %v7310_v6, %v383_v62  ;;  %v389_v43 = vshll.u32 %v7297_v41, %v383_v62  ;;  %v392_v45 = vshll.u32 %v7299_v44, %v383_v62 }
  0x63   : > { %v395_v47 = vshll.u32 %v7302_v46, %v383_v62  ;;  %v398_v49 = vshll.u32 %v7304_v48, %v383_v62  ;;  %vm401_vm2 = vcmp.lt.s32.totalorder %v382_v61, 1  ;;  %vm402_vm3 = vcmp.lt.s32.totalorder %v382_v61, 2 }
  0x64   : > { %v385_v51 = vshrl.u32 %v7310_v6, %v384_v5  ;;  %v387_v52 = vshrl.u32 %v7297_v41, %v384_v5  ;;  %v390_v53 = vshrl.u32 %v7299_v44, %v384_v5  ;;  %v393_v54 = vshrl.u32 %v7302_v46, %v384_v5 }
  0x65   : > { %v396_v55 = vshrl.u32 %v7304_v48, %v384_v5  ;;  %v399_v58 = vshrl.u32 %v7307_v56, %v384_v5  ;;  %vm404_vm4 = vcmp.lt.s32.totalorder %v382_v61, 4  ;;  %v488_v0 = vsub.s32 32, %v487_v1 }
  0x66   : > { %v388_v60 = vor.u32 %v387_v52, %v386_v19  ;;  %v391_v62 = vor.u32 %v390_v53, %v389_v43  ;;  %v394_v57 = vor.u32 %v393_v54, %v392_v45  ;;  %vm403_vm5 = vcmp.lt.s32.totalorder %v382_v61, 3 }
  0x67   : > { %v397_v42 = vor.u32 %v396_v55, %v395_v47  ;;  %v400_v40 = vor.u32 %v399_v58, %v398_v49  ;;  %v490_v41 = vshll.u32 %v7310_v6, %v487_v1  ;;  %v493_v19 = vshll.u32 %v7335_v37, %v487_v1 }
  0x68   : > { %v405_v44 = vsel %vm401_vm2, %v385_v51, %v388_v60  ;;  %v406_v39 = vsel %vm404_vm4, %v394_v57, 2102212464  ;;  %v409_v46 = vsel %vm401_vm2, %v388_v60, %v391_v62  ;;  %v413_v48 = vsel %vm401_vm2, %v391_v62, %v394_v57 }
  0x69   : > { %v407_v38 = vsel %vm403_vm5, %v391_v62, %v406_v39  ;;  %v410_v5 = vsel %vm404_vm4, %v397_v42, 920167782  ;;  %v414_v56 = vsel %vm404_vm4, %v400_v40, 1326507024  ;;  %v489_v47 = vshrl.u32 %v7310_v6, %v488_v0 }
  0x6a   : > { %v411_v43 = vsel %vm403_vm5, %v394_v57, %v410_v5  ;;  %v415_v45 = vsel %vm403_vm5, %v397_v42, %v414_v56  ;;  %v491_v49 = vshrl.u32 %v7335_v37, %v488_v0  ;;  %v408_v51 = vsel %vm402_vm3, %v405_v44, %v407_v38 }
  0x6b   : > { %v412_v52 = vsel %vm402_vm3, %v409_v46, %v411_v43  ;;  %v416_v53 = vsel %vm402_vm3, %v413_v48, %v415_v45  ;;  %v7336_v54 = vmov 2131351028   ;;  %v7337_v38 = vmov 2102212464  }
  0x6c   : > { %v494_v39 = vshrl.u32 %v7336_v54, %v488_v0  ;;  %v4855_v40 = vmul.u32.u64.low %v4819_v63, %v416_v53  ;;  %v4856_v55 = vmul.u32.u64.high %v4819_v63, %v416_v53, %v4855_v40  ;;  %v492_v42 = vor.u32 %v491_v49, %v490_v41 }
  0x6d   : > { %v4859_v58 = vmul.u32.u64.low %v4819_v63, %v412_v52  ;;  %v4860_v57 = vmul.u32.u64.high %v4819_v63, %v412_v52, %v4859_v58  ;;  %v496_v60 = vshll.u32 %v7336_v54, %v487_v1  ;;  %v497_v44 = vshrl.u32 %v7337_v38, %v488_v0 }
  0x6e   : > { %v495_v56 = vor.u32 %v494_v39, %v493_v19  ;;  %v499_v61 = vshll.u32 %v7337_v38, %v487_v1  ;;  %v7338_v46 = vmov 920167782   ;;  %v7339_v5 = vmov 1326507024  }
  0x6f   : > { %v500_v48 = vshrl.u32 %v7338_v46, %v488_v0  ;;  %v502_v62 = vshll.u32 %v7338_v46, %v487_v1  ;;  %v503_v43 = vshrl.u32 %v7339_v5, %v488_v0  ;;  %v424_v45 = vmul.u32 %v4819_v63, %v408_v51 }
  0x70   : > { %v498_v53 = vor.u32 %v497_v44, %v496_v60  ;;  %vm505_vm7 = vcmp.lt.s32.totalorder %v4834_v50, 1  ;;  %vm506_vm8 = vcmp.lt.s32.totalorder %v4834_v50, 2  ;;  %vm426_vm9 = vc.u32 %v4856_v55, %v4859_v58 }
  0x71   : > { %v427_v41 = vadd.s32 1, %v4860_v57  ;;  %v501_v19 = vor.u32 %v500_v48, %v499_v61  ;;  %vm507_vm10 = vcmp.lt.s32.totalorder %v4834_v50, 3  ;;  %v504_v49 = vor.u32 %v503_v43, %v502_v62 }
  0x72   : > { %vm508_vm11 = vcmp.lt.s32.totalorder %v4834_v50, 4  ;;  %v509_v1 = vsel %vm505_vm7, %v489_v47, %v492_v42  ;;  %v513_v0 = vsel %vm505_vm7, %v492_v42, %v495_v56  ;;  %v517_v39 = vsel %vm505_vm7, %v495_v56, %v498_v53 }
  0x73   : > { %v428_v63 = vsel %vm426_vm9, %v427_v41, %v4860_v57  ;;  %v510_v51 = vsel %vm508_vm11, %v498_v53, 2102212464  ;;  %v514_v52 = vsel %vm508_vm11, %v501_v19, 920167782  ;;  %v518_v6 = vsel %vm508_vm11, %v504_v49, 1326507024 }
  0x74   : > { %v429_v40 = vadd.s32 %v428_v63, %v424_v45  ;;  %v511_v60 = vsel %vm507_vm10, %v495_v56, %v510_v51  ;;  %v515_v44 = vsel %vm507_vm10, %v498_v53, %v514_v52  ;;  %v519_v48 = vsel %vm507_vm10, %v501_v19, %v518_v6 }
  0x75   : > { %v512_v36 = vsel %vm506_vm8, %v509_v1, %v511_v60  ;;  %v516_v61 = vsel %vm506_vm8, %v513_v0, %v515_v44  ;;  %v589_v47 = vsel %vm588_vm6, %v4827_v4, 0  ;;  %v520_v57 = vsel %vm506_vm8, %v517_v39, %v519_v48 }
  0x76   : > { %v430_v42 = vadd.s32 536870912, %v429_v40  ;;  %v4888_v62 = vmul.u32.u64.low %v4821_v2, %v516_v61  ;;  %v4889_v56 = vmul.u32.u64.high %v4821_v2, %v516_v61, %v4888_v62  ;;  %v4894_v43 = vadd.f32 %v4668_v28, %v4817_v59 }
  0x77   : > { %v4897_v45 = vmul.u32.u64.low %v4821_v2, %v520_v57  ;;  %v4898_v6 = vmul.u32.u64.high %v4821_v2, %v520_v57, %v4897_v45  ;;  %v585_v53 = vor.u32 8388608, %v4825_v3  ;;  %v591_v41 = vand.u32 31, %v589_v47 }
  0x78   : > { %v431_v4 = vshrl.u32 %v430_v42, 30  ;;  %v528_v50 = vmul.u32 %v4821_v2, %v512_v36  ;;  %v531_v49 = vadd.s32 1, %v4889_v56  ;;  %v684_v0 = vand.u32 2139095040, %v4894_v43 }
  0x79   : > { %v592_v1 = vsub.s32 32, %v591_v41  ;;  %vm530_vm13 = vc.u32 %v4898_v6, %v4888_v62  ;;  %v4906_v28 = vshll.u32 %v585_v53, 8  ;;  %v7340_v3 = vand.u32 2147483647, %v4713_v7 }
  0x7a   : > { %v432_v19 = vshll.u32 %v431_v4, 30  ;;  %v455_v2 = vsub.s32 4, %v431_v4  ;;  %v532_v51 = vsel %vm530_vm13, %v531_v49, %v4889_v56  ;;  %v590_v52 = vshrl.u32 %v589_v47, 5 }
  0x7b   : > { %vm4912_vm14 = vcmp.le.f32.partialorder %v7340_v3, 0.7853982  ;;  %v533_v39 = vadd.s32 %v532_v51, %v528_v50  ;;  %v7343_v60 = vmov 683565275   ;;  %v595_v61 = vshrl.u32 %v7335_v37, %v592_v1 }
  0x7c   : > { %v4916_v36 = vsub.s32 %v429_v40, %v432_v19  ;;  %v594_v44 = vshll.u32 %v7343_v60, %v591_v41  ;;  %v597_v48 = vshll.u32 %v7335_v37, %v591_v41  ;;  %v598_v57 = vshrl.u32 %v7336_v54, %v592_v1 }
  0x7d   : > { %v600_v45 = vshll.u32 %v7336_v54, %v591_v41  ;;  %v601_v40 = vshrl.u32 %v7337_v38, %v592_v1  ;;  %v425_v53 = vadd.s32 %v4859_v58, %v4856_v55  ;;  %v534_v56 = vadd.s32 536870912, %v533_v39 }
  0x7e   : > { %v435_v42 = vsub.s32 0, %v4916_v36  ;;  %v603_v47 = vshll.u32 %v7337_v38, %v591_v41  ;;  %v685_v50 = vshrl.u32 %v684_v0, 23  ;;  %v456_v49 = vsel %vm371_vm12, %v455_v2, %v431_v4 }
  0x7f   : > { %v604_v3 = vshrl.u32 %v7338_v46, %v592_v1  ;;  %vm612_vm15 = vcmp.lt.s32.totalorder %v590_v52, 4  ;;  %v4933_v51 = vshrl.u32 %v534_v56, 30  ;;  %v593_v59 = vshrl.u32 %v7343_v60, %v592_v1 }
  0x80   : > { %v3873_v19 = vmin.u32 %v435_v42, %v4916_v36  ;;  %v606_v35 = vshll.u32 %v7338_v46, %v591_v41  ;;  %v607_v55 = vshrl.u32 %v7339_v5, %v592_v1  ;;  %v596_v34 = vor.u32 %v595_v61, %v594_v44 }
  0x81   : > { %v599_v33 = vor.u32 %v598_v57, %v597_v48  ;;  %v602_v0 = vor.u32 %v601_v40, %v600_v45  ;;  %v536_v42 = vshll.u32 %v4933_v51, 30  ;;  %v605_v32 = vor.u32 %v604_v3, %v603_v47 }
  0x82   : > { %v437_v58 = vclz %v3873_v19  ;;  %vm609_vm0 = vcmp.lt.s32.totalorder %v590_v52, 1  ;;  %vm611_vm1 = vcmp.lt.s32.totalorder %v590_v52, 3  ;;  %v608_v2 = vor.u32 %v607_v55, %v606_v35 }
  0x83   : > { %v614_v56 = vsel %vm612_vm15, %v602_v0, 2102212464  ;;  %v3884_v31 = vadd.s32 4294967169, %v685_v50  ;;  %v458_v30 = vsel %vm4912_vm14, 0, %v456_v49  ;;  %v4942_v41 = vsub.s32 %v533_v39, %v536_v42 }
  0x84   : > { %v3874_v4 = vadd.s32 4294967294, %v437_v58  ;;  %vm610_vm2 = vcmp.lt.s32.totalorder %v590_v52, 2  ;;  %v618_v1 = vsel %vm612_vm15, %v605_v32, 920167782  ;;  %v613_v44 = vsel %vm609_vm0, %v593_v59, %v596_v34 }
  0x85   : > { %v617_v61 = vsel %vm609_vm0, %v596_v34, %v599_v33  ;;  %v619_v48 = vsel %vm611_vm1, %v602_v0, %v618_v1  ;;  %v539_v35 = vsub.s32 0, %v4942_v41  ;;  %v615_v45 = vsel %vm611_vm1, %v599_v33, %v614_v56 }
  0x86   : > { %vm3875_vm3 = vcmp.lt.s32.totalorder %v3874_v4, 0  ;;  %v621_v40 = vsel %vm609_vm0, %v599_v33, %v602_v0  ;;  %v622_v19 = vsel %vm612_vm15, %v608_v2, 1326507024  ;;  %v620_v59 = vsel %vm610_vm2, %v617_v61, %v619_v48 }
  0x87   : > { %v440_v57 = vsel %vm3875_vm3, 0, %v3874_v4  ;;  %v3877_v49 = vmin.u32 %v539_v35, %v4942_v41  ;;  %v623_v34 = vsel %vm611_vm1, %v605_v32, %v622_v19  ;;  %v7344_v3 = vand.u32 2147483647, %v4894_v43 }
  0x88   : > { %v441_v47 = vsub.s32 32, %v440_v57  ;;  %v442_v39 = vshll.u32 %v4916_v36, %v440_v57  ;;  %v445_v50 = vsub.s32 4294967266, %v440_v57  ;;  %v624_v33 = vsel %vm610_vm2, %v621_v40, %v623_v34 }
  0x89   : > { %v4958_v55 = vand.u32 8388607, %v7344_v3  ;;  %v691_v0 = vadd.s32 1, %v3884_v31  ;;  %v462_v4 = vadd.s32 3, %v458_v30  ;;  %v541_v36 = vclz %v3877_v49 }
  0x8a   : > { %v443_v58 = vshrl.u32 %v425_v53, %v441_v47  ;;  %v446_v42 = vadd.s32 127, %v445_v50  ;;  %v616_v56 = vsel %vm610_vm2, %v613_v44, %v615_v45  ;;  %v529_v44 = vadd.s32 %v4888_v62, %v4898_v6 }
  0x8b   : > { %v4963_v57 = vmul.u32.u64.low %v4906_v28, %v624_v33  ;;  %v4964_v61 = vmul.u32.u64.high %v4906_v28, %v624_v33, %v4963_v57  ;;  %v3878_v32 = vadd.s32 4294967294, %v541_v36  ;;  %vm692_vm4 = vcmp.gt.s32.totalorder %v691_v0, 0 }
  0x8c   : > { %v444_v2 = vor.u32 %v443_v58, %v442_v39  ;;  %v447_v1 = vshll.u32 %v446_v42, 23  ;;  %v4967_v48 = vmul.u32.u64.low %v4906_v28, %v620_v59  ;;  %v4968_v35 = vmul.u32.u64.high %v4906_v28, %v620_v59, %v4967_v48 }
  0x8d   : > { %v689_v30 = vor.u32 8388608, %v4958_v55  ;;  %v693_v31 = vsel %vm692_vm4, %v691_v0, 0  ;;  %v4972_v52 = vand.u32 3, %v462_v4  ;;  %vm3879_vm5 = vcmp.lt.s32.totalorder %v3878_v32, 0 }
  0x8e   : > { %v448_v53 = vor.u32 4788187, %v447_v1  ;;  %v451_v40 = vcvt.s32.f32 %v444_v2  ;;  %v695_v45 = vand.u32 31, %v693_v31  ;;  %v544_v39 = vsel %vm3879_vm5, 0, %v3878_v32 }
  0x8f   : > { %v632_v50 = vmul.u32 %v4906_v28, %v616_v56  ;;  %vm634_vm6 = vc.u32 %v4964_v61, %v4967_v48  ;;  %vm475_vm7 = vcmp.lt.s32.totalorder %v4716_v8, 0  ;;  %v545_v19 = vsub.s32 32, %v544_v39 }
  0x90   : > { %v449_v47 = vand.u32 2147483647, %v448_v53  ;;  %v546_v49 = vshll.u32 %v4942_v41, %v544_v39  ;;  %v549_v59 = vsub.s32 4294967266, %v544_v39  ;;  %v635_v34 = vadd.s32 1, %v4968_v35 }
  0x91   : > { %v559_v62 = vsub.s32 4, %v4933_v51  ;;  %v4983_v6 = vshrl.u32 %v693_v31, 5  ;;  %v696_v55 = vsub.s32 32, %v695_v45  ;;  %v547_v58 = vshrl.u32 %v529_v44, %v545_v19 }
  0x92   : > { %v452_v3 = vmul.f32 %v451_v40, %v449_v47  ;;  %v550_v42 = vadd.s32 127, %v549_v59  ;;  %v636_v28 = vsel %vm634_vm6, %v635_v34, %v4968_v35  ;;  %v698_v33 = vshll.u32 %v7343_v60, %v695_v45 }
  0x93   : > { %v637_v4 = vadd.s32 %v636_v28, %v632_v50  ;;  %v699_v36 = vshrl.u32 %v7335_v37, %v696_v55  ;;  %v701_v41 = vshll.u32 %v7335_v37, %v695_v45  ;;  %v7345_v56 = vand.u32 2147483647, %v4716_v8 }
  0x94   : > { %v453_v0 = vxor.u32 2147483648, %v452_v3  ;;  %v548_v1 = vor.u32 %v547_v58, %v546_v49  ;;  %v551_v57 = vshll.u32 %v550_v42, 23  ;;  %v702_v32 = vshrl.u32 %v7336_v54, %v696_v55 }
  0x95   : > { %vm4991_vm8 = vcmp.le.f32.partialorder %v7345_v56, 0.7853982  ;;  %v704_v35 = vshll.u32 %v7336_v54, %v695_v45  ;;  %v638_v40 = vadd.s32 536870912, %v637_v4  ;;  %v705_v31 = vshrl.u32 %v7337_v38, %v696_v55 }
  0x96   : > { %v454_v53 = vsel %vm371_vm12, %v453_v0, %v452_v3  ;;  %v707_v44 = vshll.u32 %v7337_v38, %v695_v45  ;;  %v552_v39 = vor.u32 4788187, %v551_v57  ;;  %v555_v50 = vcvt.s32.f32 %v548_v1 }
  0x97   : > { %v457_v47 = vsel %vm4912_vm14, %v4713_v7, %v454_v53  ;;  %v700_v19 = vor.u32 %v699_v36, %v698_v33  ;;  %v639_v49 = vshrl.u32 %v638_v40, 30  ;;  %v703_v59 = vor.u32 %v702_v32, %v701_v41 }
  0x98   : > { %4212 = vcosq.f32 %v457_v47  ;;  %v708_v34 = vshrl.u32 %v7338_v46, %v696_v55  ;;  %v553_v58 = vand.u32 2147483647, %v552_v39  ;;  %v710_v3 = vshll.u32 %v7338_v46, %v695_v45 }
  0x99   : > { %4214 = vsinq.f32 %v457_v47  ;;  %v711_v42 = vshrl.u32 %v7339_v5, %v696_v55  ;;  %v560_v28 = vsel %vm475_vm7, %v559_v62, %v4933_v51  ;;  %v640_v63 = vshll.u32 %v639_v49, 30 }
  0x9a   : > { %v709_v0 = vor.u32 %v708_v34, %v707_v44  ;;  %vm713_vm9 = vcmp.lt.s32.totalorder %v4983_v6, 1  ;;  %v556_v33 = vmul.f32 %v555_v50, %v553_v58  ;;  %v697_v36 = vshrl.u32 %v7343_v60, %v696_v55 }
  0x9b   : > { %v706_v41 = vor.u32 %v705_v31, %v704_v35  ;;  %v5012_v56 = vshll.u32 %v689_v30, 8  ;;  %vm579_vm10 = vcmp.lt.s32.totalorder %v4719_v9, 0  ;;  %v5015_v1 = vsub.s32 %v637_v4, %v640_v63 }
  0x9c   : > { %v712_v45 = vor.u32 %v711_v42, %v710_v3  ;;  %vm715_vm11 = vcmp.lt.s32.totalorder %v4983_v6, 3  ;;  %vm716_vm12 = vcmp.lt.s32.totalorder %v4983_v6, 4  ;;  %v557_v51 = vxor.u32 2147483648, %v556_v33 }
  0x9d   : > { %vm714_vm13 = vcmp.lt.s32.totalorder %v4983_v6, 2  ;;  %v718_v62 = vsel %vm716_vm12, %v706_v41, 2102212464  ;;  %v721_v55 = vsel %vm713_vm9, %v700_v19, %v703_v59  ;;  %v562_v30 = vsel %vm4991_vm8, 0, %v560_v28 }
  0x9e   : > { %v643_v4 = vsub.s32 0, %v5015_v1  ;;  %v663_v57 = vsub.s32 4, %v639_v49  ;;  %v722_v32 = vsel %vm716_vm12, %v709_v0, 920167782  ;;  %v558_v35 = vsel %vm475_vm7, %v557_v51, %v556_v33 }
  0x9f   : > { %v717_v53 = vsel %vm713_vm9, %v697_v36, %v700_v19  ;;  %v719_v40 = vsel %vm715_vm11, %v703_v59, %v718_v62  ;;  %v723_v31 = vsel %vm715_vm11, %v706_v41, %v722_v32  ;;  %vm461_vm14 = vweird.f32 %v4713_v7 }
  0xa0   : > { %v561_v44 = vsel %vm4991_vm8, %v4716_v8, %v558_v35  ;;  %v3881_v47 = vmin.u32 %v643_v4, %v5015_v1  ;;  %v724_v39 = vsel %vm714_vm13, %v721_v55, %v723_v31  ;;  %v725_v50 = vsel %vm713_vm9, %v703_v59, %v706_v41 }
  0xa1   : > { %4216 = vcosq.f32 %v561_v44  ;;  %v726_v19 = vsel %vm716_vm12, %v712_v45, 1326507024  ;;  %v5049_v34 = vmul.u32.u64.low %v5012_v56, %v724_v39  ;;  %v5050_v58 = vmul.u32.u64.high %v5012_v56, %v724_v39, %v5049_v34 }
  0xa2   : > { %vm464_vm15 = vcmp.lt.s32.totalorder %v4972_v52, 2  ;;  %4218 = vsinq.f32 %v561_v44  ;;  %v7348_v2 = vand.u32 2147483647, %v4719_v9  ;;  %v645_v42 = vclz %v3881_v47 }
  0xa3   : > { %vm465_vm1 = vcmp.eq.s32.totalorder %v4972_v52, 0  ;;  %vm468_vm2 = vcmp.eq.s32.totalorder %v4972_v52, 2  ;;  %v566_v59 = vadd.s32 3, %v562_v30  ;;  %v727_v28 = vsel %vm715_vm11, %v709_v0, %v726_v19 }
  0xa4   : > { %vm5056_vm0 = vcmp.le.f32.partialorder %v7348_v2, 0.7853982  ;;  %v3882_v63 = vadd.s32 4294967294, %v645_v42  ;;  %v720_v33 = vsel %vm714_vm13, %v717_v53, %v719_v40  ;;  %v728_v36 = vsel %vm714_vm13, %v725_v50, %v727_v28 }
  0xa5   : > { %v788_v41 = vand.u32 2139095040, %v4722_v10  ;;  %v4213_v45 = vpop.eup %4212  ;;  %v633_v51 = vadd.s32 %v4967_v48, %v4964_v61  ;;  %v664_v62 = vsel %vm579_vm10, %v663_v57, %v639_v49  ;;  %v739_v32 = vadd.s32 1, %v5050_v58 }
  0xa6   : > { %v5074_v55 = vmul.u32.u64.low %v5012_v56, %v728_v36  ;;  %v5075_v30 = vmul.u32.u64.high %v5012_v56, %v728_v36, %v5074_v55  ;;  %v4215_v0 = vpop.eup %4214  ;;  %v469_v4 = vxor.u32 2147483648, %v4213_v45  ;;  %vm3883_vm3 = vcmp.lt.s32.totalorder %v3882_v63, 0 }
  0xa7   : > { %v789_v6 = vshrl.u32 %v788_v41, 23  ;;  %v466_v35 = vxor.u32 2147483648, %v4215_v0  ;;  %v567_v53 = vand.u32 3, %v566_v59  ;;  %v648_v40 = vsel %vm3883_vm3, 0, %v3882_v63 }
  0xa8   : > { %v736_v31 = vmul.u32 %v5012_v56, %v720_v33  ;;  %v470_v61 = vsel %vm468_vm2, %v469_v4, %v4215_v0  ;;  %v649_v48 = vsub.s32 32, %v648_v40  ;;  %v650_v49 = vshll.u32 %v5015_v1, %v648_v40 }
  0xa9   : > { %v653_v57 = vsub.s32 4294967266, %v648_v40  ;;  %v467_v44 = vsel %vm465_vm1, %v4213_v45, %v466_v35  ;;  %v666_v47 = vsel %vm5056_vm0, 0, %v664_v62  ;;  %vm738_vm4 = vc.u32 %v5075_v30, %v5049_v34 }
  0xaa   : > { %v3888_v39 = vadd.s32 4294967169, %v789_v6  ;;  %v471_v56 = vsel %vm464_vm15, %v467_v44, %v470_v61  ;;  %v651_v50 = vshrl.u32 %v633_v51, %v649_v48  ;;  %v740_v2 = vsel %vm738_vm4, %v739_v32, %v5050_v58 }
  0xab   : > { %v654_v19 = vadd.s32 127, %v653_v57  ;;  %v472_v1 = vsel %vm461_vm14, nan, %v471_v56  ;;  %v741_v42 = vadd.s32 %v740_v2, %v736_v31  ;;  %v785_v59 = vand.u32 2147483647, %v4722_v10 }
  0xac   : > { %v795_v28 = vadd.s32 1, %v3888_v39  ;;  %v652_v63 = vor.u32 %v651_v50, %v650_v49  ;;  %3697 = vst [vmem:[%s5096_s11] sm:$0xff] %v472_v1  ;;  %vm569_vm5 = vcmp.eq.s32.totalorder %v567_v53, 0  ;;  %v670_v52 = vadd.s32 3, %v666_v47 }
  0xad   : > { %v655_v33 = vshll.u32 %v654_v19, 23  ;;  %v742_v36 = vadd.s32 536870912, %v741_v42  ;;  %vm572_vm7 = vcmp.eq.s32.totalorder %v567_v53, 2  ;;  %v792_v0 = vand.u32 8388607, %v785_v59 }
  0xae   : > { %vm796_vm6 = vcmp.gt.s32.totalorder %v795_v28, 0  ;;  %v4217_v41 = vpop.eup %4216  ;;  %v659_v7 = vcvt.s32.f32 %v652_v63  ;;  %vm565_vm8 = vweird.f32 %v4716_v8  ;;  %vm568_vm9 = vcmp.lt.s32.totalorder %v567_v53, 2 }
  0xaf   : > { %v656_v58 = vor.u32 4788187, %v655_v33  ;;  %v797_v45 = vsel %vm796_vm6, %v795_v28, 0  ;;  %v4219_v51 = vpop.eup %4218  ;;  %v573_v62 = vxor.u32 2147483648, %v4217_v41  ;;  %v5099_v55 = vshrl.u32 %v742_v36, 30 }
  0xb0   : > { %v799_v4 = vand.u32 31, %v797_v45  ;;  %v570_v32 = vxor.u32 2147483648, %v4219_v51  ;;  %v5104_v40 = vand.u32 3, %v670_v52  ;;  %v737_v57 = vadd.s32 %v5049_v34, %v5075_v30 }
  0xb1   : > { %v657_v6 = vand.u32 2147483647, %v656_v58  ;;  %v574_v35 = vsel %vm572_vm7, %v573_v62, %v4219_v51  ;;  %v744_v31 = vshll.u32 %v5099_v55, 30  ;;  %v889_v44 = vand.u32 2147483647, %v4725_v11 }
  0xb2   : > { %v800_v61 = vsub.s32 32, %v799_v4  ;;  %v571_v48 = vsel %vm569_vm5, %v4217_v41, %v570_v32  ;;  %v793_v56 = vor.u32 8388608, %v792_v0  ;;  %v802_v50 = vshll.u32 %v7343_v60, %v799_v4 }
  0xb3   : > { %v660_v49 = vmul.f32 %v659_v7, %v657_v6  ;;  %v575_v47 = vsel %vm568_vm9, %v571_v48, %v574_v35  ;;  %v5111_v39 = vsub.s32 %v741_v42, %v744_v31  ;;  %v805_v1 = vshll.u32 %v7335_v37, %v799_v4 }
  0xb4   : > { %v576_v19 = vsel %vm565_vm8, nan, %v575_v47  ;;  %v803_v53 = vshrl.u32 %v7335_v37, %v800_v61  ;;  %v798_v63 = vshrl.u32 %v797_v45, 5  ;;  %v806_v34 = vshrl.u32 %v7336_v54, %v800_v61 }
  0xb5   : > { %v661_v2 = vxor.u32 2147483648, %v660_v49  ;;  %v747_v28 = vsub.s32 0, %v5111_v39  ;;  %v892_v30 = vand.u32 2139095040, %v4725_v11  ;;  %3698 = vst [vmem:[%s5096_s11 + $0x8] sm:$0xff] %v576_v19  ;;  %v808_v33 = vshll.u32 %v7336_v54, %v799_v4 }
  0xb6   : > { %v809_v8 = vshrl.u32 %v7337_v38, %v800_v61  ;;  %v811_v52 = vshll.u32 %v7337_v38, %v799_v4  ;;  %v804_v58 = vor.u32 %v803_v53, %v802_v50  ;;  %v5131_v7 = vshll.u32 %v793_v56, 8 }
  0xb7   : > { %v662_v42 = vsel %vm579_vm10, %v661_v2, %v660_v49  ;;  %v3885_v41 = vmin.u32 %v747_v28, %v5111_v39  ;;  %v807_v45 = vor.u32 %v806_v34, %v805_v1  ;;  %v812_v51 = vshrl.u32 %v7338_v46, %v800_v61 }
  0xb8   : > { %v665_v36 = vsel %vm5056_vm0, %v4719_v9, %v662_v42  ;;  %v814_v62 = vshll.u32 %v7338_v46, %v799_v4  ;;  %v801_v32 = vshrl.u32 %v7343_v60, %v800_v61  ;;  %v893_v6 = vshrl.u32 %v892_v30, 23 }
  0xb9   : > { %4220 = vcosq.f32 %v665_v36  ;;  %v749_v0 = vclz %v3885_v41  ;;  %v810_v35 = vor.u32 %v809_v8, %v808_v33  ;;  %v813_v31 = vor.u32 %v812_v51, %v811_v52 }
  0xba   : > { %4222 = vsinq.f32 %v665_v36  ;;  %v815_v3 = vshrl.u32 %v7339_v5, %v800_v61  ;;  %vm817_vm10 = vcmp.lt.s32.totalorder %v798_v63, 1  ;;  %v767_v49 = vsub.s32 4, %v5099_v55 }
  0xbb   : > { %v3886_v48 = vadd.s32 4294967294, %v749_v0  ;;  %vm819_vm11 = vcmp.lt.s32.totalorder %v798_v63, 3  ;;  %vm820_vm12 = vcmp.lt.s32.totalorder %v798_v63, 4  ;;  %vm818_vm13 = vcmp.lt.s32.totalorder %v798_v63, 2 }
  0xbc   : > { %v816_v47 = vor.u32 %v815_v3, %v814_v62  ;;  %v822_v56 = vsel %vm820_vm12, %v810_v35, 2102212464  ;;  %v825_v50 = vsel %vm817_vm10, %v804_v58, %v807_v45  ;;  %v821_v4 = vsel %vm817_vm10, %v801_v32, %v804_v58 }
  0xbd   : > { %vm3887_vm14 = vcmp.lt.s32.totalorder %v3886_v48, 0  ;;  %v823_v19 = vsel %vm819_vm11, %v807_v45, %v822_v56  ;;  %v826_v2 = vsel %vm820_vm12, %v813_v31, 920167782  ;;  %v829_v28 = vsel %vm817_vm10, %v807_v45, %v810_v35 }
  0xbe   : > { %v752_v53 = vsel %vm3887_vm14, 0, %v3886_v48  ;;  %v827_v1 = vsel %vm819_vm11, %v810_v35, %v826_v2  ;;  %v830_v61 = vsel %vm820_vm12, %v816_v47, 1326507024  ;;  %vm669_vm15 = vweird.f32 %v4719_v9 }
  0xbf   : > { %v753_v34 = vsub.s32 32, %v752_v53  ;;  %v754_v30 = vshll.u32 %v5111_v39, %v752_v53  ;;  %v757_v42 = vsub.s32 4294967266, %v752_v53  ;;  %v828_v33 = vsel %vm818_vm13, %v825_v50, %v827_v1 }
  0xc0   : > { %v824_v8 = vsel %vm818_vm13, %v821_v4, %v823_v19  ;;  %v831_v52 = vsel %vm819_vm11, %v813_v31, %v830_v61  ;;  %v5146_v36 = vmul.u32.u64.low %v5131_v7, %v828_v33  ;;  %v5147_v41 = vmul.u32.u64.high %v5131_v7, %v828_v33, %v5146_v36 }
  0xc1   : > { %v755_v58 = vshrl.u32 %v737_v57, %v753_v34  ;;  %v758_v45 = vadd.s32 127, %v757_v42  ;;  %v832_v51 = vsel %vm818_vm13, %v829_v28, %v831_v52  ;;  %v3892_v62 = vadd.s32 4294967169, %v893_v6 }
  0xc2   : > { %v7351_v39 = vand.u32 2147483647, %v4894_v43  ;;  %vm683_vm1 = vcmp.lt.s32.totalorder %v4894_v43, 0  ;;  %v5159_v32 = vmul.u32.u64.low %v5131_v7, %v832_v51  ;;  %v5160_v35 = vmul.u32.u64.high %v5131_v7, %v832_v51, %v5159_v32 }
  0xc3   : > { %v756_v31 = vor.u32 %v755_v58, %v754_v30  ;;  %v759_v3 = vshll.u32 %v758_v45, 23  ;;  %v768_v57 = vsel %vm683_vm1, %v767_v49, %v5099_v55  ;;  %v899_v63 = vadd.s32 1, %v3892_v62 }
  0xc4   : > { %vm5153_vm0 = vcmp.le.f32.partialorder %v7351_v39, 0.7853982  ;;  %vm673_vm2 = vcmp.eq.s32.totalorder %v5104_v40, 0  ;;  %v840_v6 = vmul.u32 %v5131_v7, %v824_v8  ;;  %v843_v48 = vadd.s32 1, %v5147_v41 }
  0xc5   : > { %v896_v47 = vand.u32 8388607, %v889_v44  ;;  %vm676_vm3 = vcmp.eq.s32.totalorder %v5104_v40, 2  ;;  %v760_v50 = vor.u32 4788187, %v759_v3  ;;  %v763_v4 = vcvt.s32.f32 %v756_v31 }
  0xc6   : > { %v4221_v56 = vpop.eup %4220  ;;  %vm900_vm4 = vcmp.gt.s32.totalorder %v899_v63, 0  ;;  %v770_v55 = vsel %vm5153_vm0, 0, %v768_v57  ;;  %vm842_vm5 = vc.u32 %v5160_v35, %v5146_v36  ;;  %vm672_vm6 = vcmp.lt.s32.totalorder %v5104_v40, 2 }
  0xc7   : > { %v4223_v19 = vpop.eup %4222  ;;  %v677_v2 = vxor.u32 2147483648, %v4221_v56  ;;  %v901_v7 = vsel %vm900_vm4, %v899_v63, 0  ;;  %v761_v53 = vand.u32 2147483647, %v760_v50  ;;  %v844_v1 = vsel %vm842_vm5, %v843_v48, %v5147_v41 }
  0xc8   : > { %v674_v49 = vxor.u32 2147483648, %v4223_v19  ;;  %v845_v61 = vadd.s32 %v844_v1, %v840_v6  ;;  %v897_v34 = vor.u32 8388608, %v896_v47  ;;  %v903_v30 = vand.u32 31, %v901_v7 }
  0xc9   : > { %v678_v28 = vsel %vm676_vm3, %v677_v2, %v4223_v19  ;;  %v764_v33 = vmul.f32 %v763_v4, %v761_v53  ;;  %v774_v8 = vadd.s32 3, %v770_v55  ;;  %v996_v52 = vand.u32 2139095040, %v4728_v12 }
  0xca   : > { %v675_v42 = vsel %vm673_vm2, %v4221_v56, %v674_v49  ;;  %v846_v45 = vadd.s32 536870912, %v845_v61  ;;  %v902_v51 = vshrl.u32 %v901_v7, 5  ;;  %v904_v62 = vsub.s32 32, %v903_v30 }
  0xcb   : > { %v679_v58 = vsel %vm672_vm6, %v675_v42, %v678_v28  ;;  %v765_v41 = vxor.u32 2147483648, %v764_v33  ;;  %v906_v32 = vshll.u32 %v7343_v60, %v903_v30  ;;  %v909_v31 = vshll.u32 %v7335_v37, %v903_v30 }
  0xcc   : > { %v680_v39 = vsel %vm669_vm15, nan, %v679_v58  ;;  %v847_v3 = vshrl.u32 %v846_v45, 30  ;;  %v907_v40 = vshrl.u32 %v7335_v37, %v904_v62  ;;  %v910_v57 = vshrl.u32 %v7336_v54, %v904_v62 }
  0xcd   : > { %v912_v63 = vshll.u32 %v7336_v54, %v903_v30  ;;  %3699 = vst [vmem:[%s5096_s11 + $0x10] sm:$0xff] %v680_v39  ;;  %v766_v6 = vsel %vm683_vm1, %v765_v41, %v764_v33  ;;  %v913_v48 = vshrl.u32 %v7337_v38, %v904_v62  ;;  %v915_v9 = vshll.u32 %v7337_v38, %v903_v30 }
  0xce   : > { %v916_v47 = vshrl.u32 %v7338_v46, %v904_v62  ;;  %v769_v56 = vsel %vm5153_vm0, %v4894_v43, %v766_v6  ;;  %v848_v50 = vshll.u32 %v847_v3, 30  ;;  %v905_v4 = vshrl.u32 %v7343_v60, %v904_v62 }
  0xcf   : > { %vm921_vm7 = vcmp.lt.s32.totalorder %v902_v51, 1  ;;  %4224 = vcosq.f32 %v769_v56  ;;  %v908_v19 = vor.u32 %v907_v40, %v906_v32  ;;  %v911_v2 = vor.u32 %v910_v57, %v909_v31 }
  0xd0   : > { %v917_v55 = vor.u32 %v916_v47, %v915_v9  ;;  %4226 = vsinq.f32 %v769_v56  ;;  %v5197_v7 = vsub.s32 %v845_v61, %v848_v50  ;;  %v914_v49 = vor.u32 %v913_v48, %v912_v63 }
  0xd1   : > { %v918_v53 = vshll.u32 %v7338_v46, %v903_v30  ;;  %v919_v1 = vshrl.u32 %v7339_v5, %v904_v62  ;;  %vm923_vm8 = vcmp.lt.s32.totalorder %v902_v51, 3  ;;  %vm924_vm9 = vcmp.lt.s32.totalorder %v902_v51, 4 }
  0xd2   : > { %v851_v0 = vsub.s32 0, %v5197_v7  ;;  %vm922_vm10 = vcmp.lt.s32.totalorder %v902_v51, 2  ;;  %v926_v28 = vsel %vm924_vm9, %v914_v49, 2102212464  ;;  %v937_v42 = vshll.u32 %v897_v34, 8 }
  0xd3   : > { %v920_v33 = vor.u32 %v919_v1, %v918_v53  ;;  %v929_v58 = vsel %vm921_vm7, %v908_v19, %v911_v2  ;;  %v930_v45 = vsel %vm924_vm9, %v917_v55, 920167782  ;;  %v997_v61 = vshrl.u32 %v996_v52, 23 }
  0xd4   : > { %v775_v39 = vand.u32 3, %v774_v8  ;;  %v3889_v41 = vmin.u32 %v851_v0, %v5197_v7  ;;  %v925_v30 = vsel %vm921_vm7, %v905_v4, %v908_v19  ;;  %v931_v62 = vsel %vm923_vm8, %v914_v49, %v930_v45 }
  0xd5   : > { %v927_v32 = vsel %vm923_vm8, %v911_v2, %v926_v28  ;;  %v932_v31 = vsel %vm922_vm10, %v929_v58, %v931_v62  ;;  %v933_v40 = vsel %vm921_vm7, %v911_v2, %v914_v49  ;;  %v934_v34 = vsel %vm924_vm9, %v920_v33, 1326507024 }
  0xd6   : > { %vm787_vm11 = vcmp.lt.s32.totalorder %v4722_v10, 0  ;;  %v853_v57 = vclz %v3889_v41  ;;  %v871_v63 = vsub.s32 4, %v847_v3  ;;  %vm773_vm12 = vweird.f32 %v4894_v43 }
  0xd7   : > { %v935_v8 = vsel %vm923_vm8, %v917_v55, %v934_v34  ;;  %v5215_v52 = vmul.u32.u64.low %v937_v42, %v932_v31  ;;  %v5216_v6 = vmul.u32.u64.high %v937_v42, %v932_v31, %v5215_v52  ;;  %v3896_v48 = vadd.s32 4294967169, %v997_v61 }
  0xd8   : > { %vm5221_vm13 = vcmp.le.f32.partialorder %v785_v59, 0.7853982  ;;  %v3890_v47 = vadd.s32 4294967294, %v853_v57  ;;  %v928_v56 = vsel %vm922_vm10, %v925_v30, %v927_v32  ;;  %v936_v50 = vsel %vm922_vm10, %v933_v40, %v935_v8 }
  0xd9   : > { %vm780_vm14 = vcmp.eq.s32.totalorder %v775_v39, 2  ;;  %v5227_v4 = vmul.u32.u64.low %v937_v42, %v936_v50  ;;  %v5228_v19 = vmul.u32.u64.high %v937_v42, %v936_v50, %v5227_v4  ;;  %v1003_v2 = vadd.s32 1, %v3896_v48 }
  0xda   : > { %v841_v55 = vadd.s32 %v5146_v36, %v5160_v35  ;;  %vm3891_vm15 = vcmp.lt.s32.totalorder %v3890_v47, 0  ;;  %v872_v59 = vsel %vm787_vm11, %v871_v63, %v847_v3  ;;  %v993_v49 = vand.u32 2147483647, %v4728_v12 }
  0xdb   : > { %v856_v53 = vsel %vm3891_vm15, 0, %v3890_v47  ;;  %v944_v1 = vmul.u32 %v937_v42, %v928_v56  ;;  %v947_v0 = vadd.s32 1, %v5216_v6  ;;  %vm1004_vm0 = vcmp.gt.s32.totalorder %v1003_v2, 0 }
  0xdc   : > { %v4225_v51 = vpop.eup %4224  ;;  %v857_v28 = vsub.s32 32, %v856_v53  ;;  %v858_v33 = vshll.u32 %v5197_v7, %v856_v53  ;;  %v861_v58 = vsub.s32 4294967266, %v856_v53  ;;  %v1005_v45 = vsel %vm1004_vm0, %v1003_v2, 0 }
  0xdd   : > { %v4227_v61 = vpop.eup %4226  ;;  %vm776_vm1 = vcmp.lt.s32.totalorder %v775_v39, 2  ;;  %vm777_vm2 = vcmp.eq.s32.totalorder %v775_v39, 0  ;;  %v781_v36 = vxor.u32 2147483648, %v4225_v51  ;;  %vm946_vm3 = vc.u32 %v5228_v19, %v5215_v52 }
  0xde   : > { %v778_v35 = vxor.u32 2147483648, %v4227_v61  ;;  %v859_v3 = vshrl.u32 %v841_v55, %v857_v28  ;;  %v862_v41 = vadd.s32 127, %v861_v58  ;;  %v948_v42 = vsel %vm946_vm3, %v947_v0, %v5216_v6 }
  0xdf   : > { %v782_v30 = vsel %vm780_vm14, %v781_v36, %v4227_v61  ;;  %v874_v62 = vsel %vm5221_vm13, 0, %v872_v59  ;;  %v949_v7 = vadd.s32 %v948_v42, %v944_v1  ;;  %v1007_v32 = vand.u32 31, %v1005_v45 }
  0xe0   : > { %v779_v31 = vsel %vm777_vm2, %v4225_v51, %v778_v35  ;;  %v860_v40 = vor.u32 %v859_v3, %v858_v33  ;;  %v863_v34 = vshll.u32 %v862_v41, 23  ;;  %v1000_v57 = vand.u32 8388607, %v993_v49 }
  0xe1   : > { %v783_v63 = vsel %vm776_vm1, %v779_v31, %v782_v30  ;;  %v950_v8 = vadd.s32 536870912, %v949_v7  ;;  %v5246_v48 = vshrl.u32 %v1005_v45, 5  ;;  %v1008_v6 = vsub.s32 32, %v1007_v32 }
  0xe2   : > { %v784_v47 = vsel %vm773_vm12, nan, %v783_v63  ;;  %v864_v56 = vor.u32 4788187, %v863_v34  ;;  %v867_v50 = vcvt.s32.f32 %v860_v40  ;;  %v1010_v4 = vshll.u32 %v7343_v60, %v1007_v32 }
  0xe3   : > { %v951_v2 = vshrl.u32 %v950_v8, 30  ;;  %v1011_v55 = vshrl.u32 %v7335_v37, %v1008_v6  ;;  %v1013_v59 = vshll.u32 %v7335_v37, %v1007_v32  ;;  %v1014_v53 = vshrl.u32 %v7336_v54, %v1008_v6  ;;  %3700 = vst [vmem:[%s5096_s11 + $0x18] sm:$0xff] %v784_v47 }
  0xe4   : > { %v865_v39 = vand.u32 2147483647, %v864_v56  ;;  %v1016_v1 = vshll.u32 %v7336_v54, %v1007_v32  ;;  %v1017_v0 = vshrl.u32 %v7337_v38, %v1008_v6  ;;  %v1019_v43 = vshll.u32 %v7337_v38, %v1007_v32 }
  0xe5   : > { %v878_v51 = vadd.s32 3, %v874_v62  ;;  %vm891_vm4 = vcmp.lt.s32.totalorder %v4725_v11, 0  ;;  %v952_v28 = vshll.u32 %v951_v2, 30  ;;  %v1001_v33 = vor.u32 8388608, %v1000_v57 }
  0xe6   : > { %vm1025_vm5 = vcmp.lt.s32.totalorder %v5246_v48, 1  ;;  %v868_v58 = vmul.f32 %v867_v50, %v865_v39  ;;  %v1009_v45 = vshrl.u32 %v7343_v60, %v1008_v6  ;;  %v1020_v61 = vshrl.u32 %v7338_v46, %v1008_v6 }
  0xe7   : > { %v1022_v36 = vshll.u32 %v7338_v46, %v1007_v32  ;;  %v5263_v35 = vsub.s32 %v949_v7, %v952_v28  ;;  %v1012_v3 = vor.u32 %v1011_v55, %v1010_v4  ;;  %v1015_v41 = vor.u32 %v1014_v53, %v1013_v59 }
  0xe8   : > { %v1023_v42 = vshrl.u32 %v7339_v5, %v1008_v6  ;;  %v869_v30 = vxor.u32 2147483648, %v868_v58  ;;  %v1018_v62 = vor.u32 %v1017_v0, %v1016_v1  ;;  %v1021_v31 = vor.u32 %v1020_v61, %v1019_v43 }
  0xe9   : > { %vm1028_vm6 = vcmp.lt.s32.totalorder %v5246_v48, 4  ;;  %vm5269_vm7 = vcmp.le.f32.partialorder %v889_v44, 0.7853982  ;;  %v955_v34 = vsub.s32 0, %v5263_v35  ;;  %v975_v32 = vsub.s32 4, %v951_v2 }
  0xea   : > { %vm1027_vm8 = vcmp.lt.s32.totalorder %v5246_v48, 3  ;;  %v1100_v7 = vand.u32 2139095040, %v4731_v13  ;;  %v870_v57 = vsel %vm787_vm11, %v869_v30, %v868_v58  ;;  %v1024_v63 = vor.u32 %v1023_v42, %v1022_v36 }
  0xeb   : > { %v1030_v8 = vsel %vm1028_vm6, %v1018_v62, 2102212464  ;;  %v1034_v44 = vsel %vm1028_vm6, %v1021_v31, 920167782  ;;  %v873_v6 = vsel %vm5221_vm13, %v4722_v10, %v870_v57  ;;  %v3893_v47 = vmin.u32 %v955_v34, %v5263_v35 }
  0xec   : > { %vm1026_vm9 = vcmp.lt.s32.totalorder %v5246_v48, 2  ;;  %v1033_v56 = vsel %vm1025_vm5, %v1012_v3, %v1015_v41  ;;  %4228 = vcosq.f32 %v873_v6  ;;  %v1029_v50 = vsel %vm1025_vm5, %v1009_v45, %v1012_v3 }
  0xed   : > { %v1031_v4 = vsel %vm1027_vm8, %v1015_v41, %v1030_v8  ;;  %v1035_v55 = vsel %vm1027_vm8, %v1018_v62, %v1034_v44  ;;  %4230 = vsinq.f32 %v873_v6  ;;  %v957_v9 = vclz %v3893_v47 }
  0xee   : > { %v1037_v59 = vsel %vm1025_vm5, %v1015_v41, %v1018_v62  ;;  %v1097_v53 = vand.u32 2147483647, %v4731_v13  ;;  %v976_v39 = vsel %vm891_vm4, %v975_v32, %v951_v2  ;;  %v1036_v1 = vsel %vm1026_vm9, %v1033_v56, %v1035_v55 }
  0xef   : > { %v1038_v0 = vsel %vm1028_vm6, %v1024_v63, 1326507024  ;;  %v1041_v43 = vshll.u32 %v1001_v33, 8  ;;  %v3894_v28 = vadd.s32 4294967294, %v957_v9  ;;  %v1032_v58 = vsel %vm1026_vm9, %v1029_v50, %v1031_v4 }
  0xf0   : > { %v1039_v45 = vsel %vm1027_vm8, %v1021_v31, %v1038_v0  ;;  %v1101_v61 = vshrl.u32 %v1100_v7, 23  ;;  %v945_v36 = vadd.s32 %v5215_v52, %v5228_v19  ;;  %v978_v31 = vsel %vm5269_vm7, 0, %v976_v39 }
  0xf1   : > { %v1040_v2 = vsel %vm1026_vm9, %v1037_v59, %v1039_v45  ;;  %v5312_v3 = vmul.u32.u64.low %v1041_v43, %v1036_v1  ;;  %v5313_v41 = vmul.u32.u64.high %v1041_v43, %v1036_v1, %v5312_v3  ;;  %vm3895_vm10 = vcmp.lt.s32.totalorder %v3894_v28, 0 }
  0xf2   : > { %v5316_v33 = vmul.u32.u64.low %v1041_v43, %v1040_v2  ;;  %v5317_v42 = vmul.u32.u64.high %v1041_v43, %v1040_v2, %v5316_v33  ;;  %v3900_v30 = vadd.s32 4294967169, %v1101_v61  ;;  %v960_v62 = vsel %vm3895_vm10, 0, %v3894_v28 }
  0xf3   : > { %v1048_v34 = vmul.u32 %v1041_v43, %v1032_v58  ;;  %v1104_v52 = vand.u32 8388607, %v1097_v53  ;;  %v961_v19 = vsub.s32 32, %v960_v62  ;;  %v962_v48 = vshll.u32 %v5263_v35, %v960_v62 }
  0xf4   : > { %v965_v32 = vsub.s32 4294967266, %v960_v62  ;;  %v1107_v7 = vadd.s32 1, %v3900_v30  ;;  %v879_v57 = vand.u32 3, %v878_v51  ;;  %v1051_v63 = vadd.s32 1, %v5313_v41 }
  0xf5   : > { %vm877_vm11 = vweird.f32 %v4722_v10  ;;  %v963_v8 = vshrl.u32 %v945_v36, %v961_v19  ;;  %vm1050_vm12 = vc.u32 %v5317_v42, %v5312_v3  ;;  %v982_v6 = vadd.s32 3, %v978_v31 }
  0xf6   : > { %v966_v44 = vadd.s32 127, %v965_v32  ;;  %v1052_v47 = vsel %vm1050_vm12, %v1051_v63, %v5313_v41  ;;  %v1105_v56 = vor.u32 8388608, %v1104_v52  ;;  %vm1108_vm13 = vcmp.gt.s32.totalorder %v1107_v7, 0 }
  0xf7   : > { %v964_v50 = vor.u32 %v963_v8, %v962_v48  ;;  %v1053_v35 = vadd.s32 %v1052_v47, %v1048_v34  ;;  %v1109_v55 = vsel %vm1108_vm13, %v1107_v7, 0  ;;  %vm880_vm14 = vcmp.lt.s32.totalorder %v879_v57, 2 }
  0xf8   : > { %v967_v4 = vshll.u32 %v966_v44, 23  ;;  %vm881_vm15 = vcmp.eq.s32.totalorder %v879_v57, 0  ;;  %v1111_v51 = vand.u32 31, %v1109_v55  ;;  %v1204_v9 = vand.u32 2139095040, %v4734_v14 }
  0xf9   : > { %v4229_v59 = vpop.eup %4228  ;;  %vm884_vm0 = vcmp.eq.s32.totalorder %v879_v57, 2  ;;  %v971_v1 = vcvt.s32.f32 %v964_v50  ;;  %v1054_v0 = vadd.s32 536870912, %v1053_v35  ;;  %v5330_v58 = vand.u32 3, %v982_v6 }
  0xfa   : > { %v968_v39 = vor.u32 4788187, %v967_v4  ;;  %v4231_v43 = vpop.eup %4230  ;;  %v885_v28 = vxor.u32 2147483648, %v4229_v59  ;;  %v1112_v45 = vsub.s32 32, %v1111_v51  ;;  %v5332_v61 = vshll.u32 %v1105_v56, 8 }
  0xfb   : > { %v882_v36 = vxor.u32 2147483648, %v4231_v43  ;;  %v5334_v41 = vshrl.u32 %v1054_v0, 30  ;;  %v1201_v33 = vand.u32 2147483647, %v4734_v14  ;;  %v1110_v62 = vshrl.u32 %v1109_v55, 5 }
  0xfc   : > { %v969_v2 = vand.u32 2147483647, %v968_v39  ;;  %v886_v30 = vsel %vm884_vm0, %v885_v28, %v4231_v43  ;;  %v1114_v31 = vshll.u32 %v7343_v60, %v1111_v51  ;;  %v1205_v34 = vshrl.u32 %v1204_v9, 23 }
  0xfd   : > { %v883_v52 = vsel %vm881_vm15, %v4229_v59, %v882_v36  ;;  %v1056_v48 = vshll.u32 %v5334_v41, 30  ;;  %v1115_v32 = vshrl.u32 %v7335_v37, %v1112_v45  ;;  %v1117_v63 = vshll.u32 %v7335_v37, %v1111_v51 }
  0xfe   : > { %v972_v19 = vmul.f32 %v971_v1, %v969_v2  ;;  %v887_v7 = vsel %vm880_vm14, %v883_v52, %v886_v30  ;;  %v1118_v8 = vshrl.u32 %v7336_v54, %v1112_v45  ;;  %v1120_v44 = vshll.u32 %v7336_v54, %v1111_v51 }
  0xff   : > { %v888_v6 = vsel %vm877_vm11, nan, %v887_v7  ;;  %v5347_v56 = vsub.s32 %v1053_v35, %v1056_v48  ;;  %v1121_v50 = vshrl.u32 %v7337_v38, %v1112_v45  ;;  %v1113_v4 = vshrl.u32 %v7343_v60, %v1112_v45 }
 0x100   : > { %v973_v47 = vxor.u32 2147483648, %v972_v19  ;;  %v1123_v55 = vshll.u32 %v7337_v38, %v1111_v51  ;;  %v1124_v57 = vshrl.u32 %v7338_v46, %v1112_v45  ;;  %v3904_v9 = vadd.s32 4294967169, %v1205_v34  ;;  %3701 = vst [vmem:[%s5096_s11 + $0x20] sm:$0xff] %v888_v6 }
 0x101   : > { %v1059_v39 = vsub.s32 0, %v5347_v56  ;;  %v1116_v10 = vor.u32 %v1115_v32, %v1114_v31  ;;  %v1126_v1 = vshll.u32 %v7338_v46, %v1111_v51  ;;  %v1119_v0 = vor.u32 %v1118_v8, %v1117_v63 }
 0x102   : > { %v974_v59 = vsel %vm891_vm4, %v973_v47, %v972_v19  ;;  %v1125_v43 = vor.u32 %v1124_v57, %v1123_v55  ;;  %v1127_v28 = vshrl.u32 %v7339_v5, %v1112_v45  ;;  %v1122_v2 = vor.u32 %v1121_v50, %v1120_v44 }
 0x103   : > { %v977_v35 = vsel %vm5269_vm7, %v4725_v11, %v974_v59  ;;  %v3897_v36 = vmin.u32 %v1059_v39, %v5347_v56  ;;  %vm1129_vm1 = vcmp.lt.s32.totalorder %v1110_v62, 1  ;;  %vm1131_vm2 = vcmp.lt.s32.totalorder %v1110_v62, 3 }
 0x104   : > { %4232 = vcosq.f32 %v977_v35  ;;  %v1128_v30 = vor.u32 %v1127_v28, %v1126_v1  ;;  %vm1132_vm3 = vcmp.lt.s32.totalorder %v1110_v62, 4  ;;  %vm995_vm4 = vcmp.lt.s32.totalorder %v4728_v12, 0 }
 0x105   : > { %4234 = vsinq.f32 %v977_v35  ;;  %v1049_v51 = vadd.s32 %v5312_v3, %v5317_v42  ;;  %v1061_v40 = vclz %v3897_v36  ;;  %vm1130_vm5 = vcmp.lt.s32.totalorder %v1110_v62, 2 }
 0x106   : > { %v5368_v31 = vand.u32 8388607, %v1201_v33  ;;  %v1133_v45 = vsel %vm1129_vm1, %v1113_v4, %v1116_v10  ;;  %v1134_v34 = vsel %vm1132_vm3, %v1122_v2, 2102212464  ;;  %v1137_v52 = vsel %vm1129_vm1, %v1116_v10, %v1119_v0 }
 0x107   : > { %v1138_v19 = vsel %vm1132_vm3, %v1125_v43, 920167782  ;;  %v3898_v48 = vadd.s32 4294967294, %v1061_v40  ;;  %v1135_v32 = vsel %vm1131_vm2, %v1119_v0, %v1134_v34  ;;  %v1141_v3 = vsel %vm1129_vm1, %v1119_v0, %v1122_v2 }
 0x108   : > { %v1139_v7 = vsel %vm1131_vm2, %v1122_v2, %v1138_v19  ;;  %v1079_v42 = vsub.s32 4, %v5334_v41  ;;  %v1142_v8 = vsel %vm1132_vm3, %v1128_v30, 1326507024  ;;  %v1211_v44 = vadd.s32 1, %v3904_v9 }
 0x109   : > { %v1140_v63 = vsel %vm1130_vm5, %v1137_v52, %v1139_v7  ;;  %vm985_vm6 = vcmp.eq.s32.totalorder %v5330_v58, 0  ;;  %vm3899_vm7 = vcmp.lt.s32.totalorder %v3898_v48, 0  ;;  %v1143_v6 = vsel %vm1131_vm2, %v1125_v43, %v1142_v8 }
 0x10a   : > { %v5383_v47 = vmul.u32.u64.low %v5332_v61, %v1140_v63  ;;  %v5384_v50 = vmul.u32.u64.high %v5332_v61, %v1140_v63, %v5383_v47  ;;  %vm984_vm8 = vcmp.lt.s32.totalorder %v5330_v58, 2  ;;  %v1064_v4 = vsel %vm3899_vm7, 0, %v3898_v48 }
 0x10b   : > { %v1136_v55 = vsel %vm1130_vm5, %v1133_v45, %v1135_v32  ;;  %v1144_v57 = vsel %vm1130_vm5, %v1141_v3, %v1143_v6  ;;  %vm1212_vm9 = vcmp.gt.s32.totalorder %v1211_v44, 0  ;;  %vm981_vm10 = vweird.f32 %v4725_v11 }
 0x10c   : > { %v1065_v9 = vsub.s32 32, %v1064_v4  ;;  %v1066_v59 = vshll.u32 %v5347_v56, %v1064_v4  ;;  %v1069_v39 = vsub.s32 4294967266, %v1064_v4  ;;  %v1213_v10 = vsel %vm1212_vm9, %v1211_v44, 0 }
 0x10d   : > { %vm988_vm11 = vcmp.eq.s32.totalorder %v5330_v58, 2  ;;  %v5394_v1 = vmul.u32.u64.low %v5332_v61, %v1144_v57  ;;  %v5395_v35 = vmul.u32.u64.high %v5332_v61, %v1144_v57, %v5394_v1  ;;  %v1215_v0 = vand.u32 31, %v1213_v10 }
 0x10e   : > { %vm5399_vm12 = vcmp.le.f32.partialorder %v993_v49, 0.7853982  ;;  %v1067_v43 = vshrl.u32 %v1049_v51, %v1065_v9  ;;  %v1070_v28 = vadd.s32 127, %v1069_v39  ;;  %v1155_v36 = vadd.s32 1, %v5384_v50 }
 0x10f   : > { %v1209_v56 = vor.u32 8388608, %v5368_v31  ;;  %v1080_v2 = vsel %vm995_vm4, %v1079_v42, %v5334_v41  ;;  %v1152_v30 = vmul.u32 %v5332_v61, %v1136_v55  ;;  %v5409_v40 = vshrl.u32 %v1213_v10, 5 }
 0x110   : > { %v1216_v45 = vsub.s32 32, %v1215_v0  ;;  %v1068_v34 = vor.u32 %v1067_v43, %v1066_v59  ;;  %v1071_v49 = vshll.u32 %v1070_v28, 23  ;;  %v1218_v52 = vshll.u32 %v7343_v60, %v1215_v0 }
 0x111   : > { %v1221_v51 = vshll.u32 %v7335_v37, %v1215_v0  ;;  %v4233_v19 = vpop.eup %4232  ;;  %vm1154_vm13 = vc.u32 %v5395_v35, %v5383_v47  ;;  %v1224_v48 = vshll.u32 %v7336_v54, %v1215_v0  ;;  %v1227_v41 = vshll.u32 %v7337_v38, %v1215_v0 }
 0x112   : > { %v1219_v31 = vshrl.u32 %v7335_v37, %v1216_v45  ;;  %v4235_v61 = vpop.eup %4234  ;;  %v989_v32 = vxor.u32 2147483648, %v4233_v19  ;;  %v1072_v7 = vor.u32 4788187, %v1071_v49  ;;  %v1075_v3 = vcvt.s32.f32 %v1068_v34 }
 0x113   : > { %v1156_v42 = vsel %vm1154_vm13, %v1155_v36, %v5384_v50  ;;  %v986_v63 = vxor.u32 2147483648, %v4235_v61  ;;  %v1222_v44 = vshrl.u32 %v7336_v54, %v1216_v45  ;;  %v1230_v6 = vshll.u32 %v7338_v46, %v1215_v0 }
 0x114   : > { %v1157_v8 = vadd.s32 %v1156_v42, %v1152_v30  ;;  %v990_v4 = vsel %vm988_vm11, %v989_v32, %v4235_v61  ;;  %v1073_v55 = vand.u32 2147483647, %v1072_v7  ;;  %v1225_v57 = vshrl.u32 %v7337_v38, %v1216_v45 }
 0x115   : > { %v1228_v9 = vshrl.u32 %v7338_v46, %v1216_v45  ;;  %v987_v59 = vsel %vm985_vm6, %v4233_v19, %v986_v63  ;;  %v1220_v50 = vor.u32 %v1219_v31, %v1218_v52  ;;  %v1231_v10 = vshrl.u32 %v7339_v5, %v1216_v45 }
 0x116   : > { %v1158_v39 = vadd.s32 536870912, %v1157_v8  ;;  %v991_v1 = vsel %vm984_vm8, %v987_v59, %v990_v4  ;;  %v1076_v0 = vmul.f32 %v1075_v3, %v1073_v55  ;;  %v1223_v43 = vor.u32 %v1222_v44, %v1221_v51 }
 0x117   : > { %v1229_v28 = vor.u32 %v1228_v9, %v1227_v41  ;;  %v992_v36 = vsel %vm981_vm10, nan, %v991_v1  ;;  %v1082_v30 = vsel %vm5399_vm12, 0, %v1080_v2  ;;  %vm1233_vm14 = vcmp.lt.s32.totalorder %v5409_v40, 1 }
 0x118   : > { %v1159_v34 = vshrl.u32 %v1158_v39, 30  ;;  %v1077_v49 = vxor.u32 2147483648, %v1076_v0  ;;  %v1217_v52 = vshrl.u32 %v7343_v60, %v1216_v45  ;;  %v1226_v19 = vor.u32 %v1225_v57, %v1224_v48  ;;  %3702 = vst [vmem:[%s5096_s11 + $0x28] sm:$0xff] %v992_v36 }
 0x119   : > { %vm1236_vm15 = vcmp.lt.s32.totalorder %v5409_v40, 4  ;;  %v1232_v31 = vor.u32 %v1231_v10, %v1230_v6  ;;  %vm1235_vm0 = vcmp.lt.s32.totalorder %v5409_v40, 3  ;;  %v1249_v51 = vshll.u32 %v1209_v56, 8 }
 0x11a   : > { %v1160_v58 = vshll.u32 %v1159_v34, 30  ;;  %v1078_v11 = vsel %vm995_vm4, %v1077_v49, %v1076_v0  ;;  %vm1234_vm1 = vcmp.lt.s32.totalorder %v5409_v40, 2  ;;  %v1241_v2 = vsel %vm1233_vm14, %v1220_v50, %v1223_v43 }
 0x11b   : > { %v1242_v45 = vsel %vm1236_vm15, %v1229_v28, 920167782  ;;  %v1081_v48 = vsel %vm5399_vm12, %v4728_v12, %v1078_v11  ;;  %v1238_v61 = vsel %vm1236_vm15, %v1226_v19, 2102212464  ;;  %v1086_v56 = vadd.s32 3, %v1082_v30 }
 0x11c   : > { %v1161_v41 = vsub.s32 %v1157_v8, %v1160_v58  ;;  %4236 = vcosq.f32 %v1081_v48  ;;  %v1237_v32 = vsel %vm1233_vm14, %v1217_v52, %v1220_v50  ;;  %v1243_v7 = vsel %vm1235_vm0, %v1226_v19, %v1242_v45 }
 0x11d   : > { %4238 = vsinq.f32 %v1081_v48  ;;  %v1244_v42 = vsel %vm1234_vm1, %v1241_v2, %v1243_v7  ;;  %v1245_v62 = vsel %vm1233_vm14, %v1223_v43, %v1226_v19  ;;  %v1239_v63 = vsel %vm1235_vm0, %v1223_v43, %v1238_v61 }
 0x11e   : > { %v1163_v3 = vsub.s32 0, %v1161_v41  ;;  %v1246_v8 = vsel %vm1236_vm15, %v1232_v31, 1326507024  ;;  %v5463_v44 = vmul.u32.u64.low %v1249_v51, %v1244_v42  ;;  %v5464_v6 = vmul.u32.u64.high %v1249_v51, %v1244_v42, %v5463_v44 }
 0x11f   : > { %v1183_v55 = vsub.s32 4, %v1159_v34  ;;  %v1247_v57 = vsel %vm1235_vm0, %v1229_v28, %v1246_v8  ;;  %v1308_v59 = vand.u32 2139095040, %v4737_v15  ;;  %v1240_v50 = vsel %vm1234_vm1, %v1237_v32, %v1239_v63 }
 0x120   : > { %v3901_v4 = vmin.u32 %v1163_v3, %v1161_v41  ;;  %v1248_v9 = vsel %vm1234_vm1, %v1245_v62, %v1247_v57  ;;  %v1087_v10 = vand.u32 3, %v1086_v56  ;;  %vm1099_vm2 = vcmp.lt.s32.totalorder %v4731_v13, 0 }
 0x121   : > { %v5475_v1 = vmul.u32.u64.low %v1249_v51, %v1248_v9  ;;  %v5476_v0 = vmul.u32.u64.high %v1249_v51, %v1248_v9, %v5475_v1  ;;  %v1184_v36 = vsel %vm1099_vm2, %v1183_v55, %v1159_v34  ;;  %v1259_v28 = vadd.s32 1, %v5464_v6 }
 0x122   : > { %v1165_v39 = vclz %v3901_v4  ;;  %v1309_v30 = vshrl.u32 %v1308_v59, 23  ;;  %vm1085_vm3 = vweird.f32 %v4728_v12  ;;  %v1256_v49 = vmul.u32 %v1249_v51, %v1240_v50 }
 0x123   : > { %v1305_v52 = vand.u32 2147483647, %v4737_v15  ;;  %vm5485_vm4 = vcmp.le.f32.partialorder %v1097_v53, 0.7853982  ;;  %v1153_v19 = vadd.s32 %v5383_v47, %v5395_v35  ;;  %vm1088_vm6 = vcmp.lt.s32.totalorder %v1087_v10, 2 }
 0x124   : > { %v3902_v43 = vadd.s32 4294967294, %v1165_v39  ;;  %v3908_v58 = vadd.s32 4294967169, %v1309_v30  ;;  %v1186_v31 = vsel %vm5485_vm4, 0, %v1184_v36  ;;  %vm1258_vm7 = vc.u32 %v5476_v0, %v5463_v44 }
 0x125   : > { %v1260_v53 = vsel %vm1258_vm7, %v1259_v28, %v5464_v6  ;;  %vm1089_vm8 = vcmp.eq.s32.totalorder %v1087_v10, 0  ;;  %v1312_v47 = vand.u32 8388607, %v1305_v52  ;;  %vm1092_vm9 = vcmp.eq.s32.totalorder %v1087_v10, 2 }
 0x126   : > { %vm3903_vm5 = vcmp.lt.s32.totalorder %v3902_v43, 0  ;;  %v1261_v45 = vadd.s32 %v1260_v53, %v1256_v49  ;;  %v1315_v35 = vadd.s32 1, %v3908_v58  ;;  %v1412_v32 = vand.u32 2139095040, %v4740_v16 }
 0x127   : > { %v1168_v34 = vsel %vm3903_vm5, 0, %v3902_v43  ;;  %v1190_v42 = vadd.s32 3, %v1186_v31  ;;  %v1313_v57 = vor.u32 8388608, %v1312_v47  ;;  %v1257_v58 = vadd.s32 %v5463_v44, %v5476_v0 }
 0x128   : > { %v1169_v51 = vsub.s32 32, %v1168_v34  ;;  %v1170_v11 = vshll.u32 %v1161_v41, %v1168_v34  ;;  %v1173_v2 = vsub.s32 4294967266, %v1168_v34  ;;  %v1262_v62 = vadd.s32 536870912, %v1261_v45 }
 0x129   : > { %v4237_v48 = vpop.eup %4236  ;;  %vm1316_vm10 = vcmp.gt.s32.totalorder %v1315_v35, 0  ;;  %v1413_v1 = vshrl.u32 %v1412_v32, 23  ;;  %v5503_v36 = vand.u32 3, %v1190_v42  ;;  %v1409_v34 = vand.u32 2147483647, %v4740_v16 }
 0x12a   : > { %v1171_v61 = vshrl.u32 %v1153_v19, %v1169_v51  ;;  %v1174_v56 = vadd.s32 127, %v1173_v2  ;;  %v4239_v7 = vpop.eup %4238  ;;  %v1093_v3 = vxor.u32 2147483648, %v4237_v48  ;;  %v1317_v6 = vsel %vm1316_vm10, %v1315_v35, 0 }
 0x12b   : > { %v1090_v41 = vxor.u32 2147483648, %v4239_v7  ;;  %v5499_v55 = vshrl.u32 %v1262_v62, 30  ;;  %v1319_v9 = vand.u32 31, %v1317_v6  ;;  %v3912_v47 = vadd.s32 4294967169, %v1413_v1 }
 0x12c   : > { %v1172_v63 = vor.u32 %v1171_v61, %v1170_v11  ;;  %v1175_v8 = vshll.u32 %v1174_v56, 23  ;;  %v1094_v4 = vsel %vm1092_vm9, %v1093_v3, %v4239_v7  ;;  %v5515_v11 = vshll.u32 %v1313_v57, 8 }
 0x12d   : > { %v1091_v59 = vsel %vm1089_vm8, %v4237_v48, %v1090_v41  ;;  %v1264_v28 = vshll.u32 %v5499_v55, 30  ;;  %v1320_v30 = vsub.s32 32, %v1319_v9  ;;  %v1322_v51 = vshll.u32 %v7343_v60, %v1319_v9 }
 0x12e   : > { %v1176_v39 = vor.u32 4788187, %v1175_v8  ;;  %v1179_v50 = vcvt.s32.f32 %v1172_v63  ;;  %v1095_v43 = vsel %vm1088_vm6, %v1091_v59, %v1094_v4  ;;  %v1325_v53 = vshll.u32 %v7335_v37, %v1319_v9 }
 0x12f   : > { %v1096_v49 = vsel %vm1085_vm3, nan, %v1095_v43  ;;  %v5511_v31 = vsub.s32 %v1261_v45, %v1264_v28  ;;  %v1323_v10 = vshrl.u32 %v7335_v37, %v1320_v30  ;;  %v1326_v12 = vshrl.u32 %v7336_v54, %v1320_v30 }
 0x130   : > { %v1177_v19 = vand.u32 2147483647, %v1176_v39  ;;  %3703 = vst [vmem:[%s5096_s11 + $0x30] sm:$0xff] %v1096_v49  ;;  %v1318_v44 = vshrl.u32 %v1317_v6, 5  ;;  %v1328_v0 = vshll.u32 %v7336_v54, %v1319_v9  ;;  %v1329_v45 = vshrl.u32 %v7337_v38, %v1320_v30 }
 0x131   : > { %v1267_v35 = vsub.s32 0, %v5511_v31  ;;  %v1331_v61 = vshll.u32 %v7337_v38, %v1319_v9  ;;  %v1332_v56 = vshrl.u32 %v7338_v46, %v1320_v30  ;;  %v5527_v32 = vand.u32 8388607, %v1409_v34 }
 0x132   : > { %v1180_v2 = vmul.f32 %v1179_v50, %v1177_v19  ;;  %v1321_v3 = vshrl.u32 %v7343_v60, %v1320_v30  ;;  %v1324_v42 = vor.u32 %v1323_v10, %v1322_v51  ;;  %v1334_v62 = vshll.u32 %v7338_v46, %v1319_v9 }
 0x133   : > { %v3905_v7 = vmin.u32 %v1267_v35, %v5511_v31  ;;  %v1327_v63 = vor.u32 %v1326_v12, %v1325_v53  ;;  %v1333_v8 = vor.u32 %v1332_v56, %v1331_v61  ;;  %v1335_v6 = vshrl.u32 %v7339_v5, %v1320_v30 }
 0x134   : > { %v1181_v48 = vxor.u32 2147483648, %v1180_v2  ;;  %vm1203_vm11 = vcmp.lt.s32.totalorder %v4734_v14, 0  ;;  %v1330_v59 = vor.u32 %v1329_v45, %v1328_v0  ;;  %vm1337_vm12 = vcmp.lt.s32.totalorder %v1318_v44, 1 }
 0x135   : > { %v1269_v57 = vclz %v3905_v7  ;;  %v1336_v39 = vor.u32 %v1335_v6, %v1334_v62  ;;  %vm1338_vm13 = vcmp.lt.s32.totalorder %v1318_v44, 2  ;;  %v1419_v9 = vadd.s32 1, %v3912_v47 }
 0x136   : > { %v1182_v41 = vsel %vm1099_vm2, %v1181_v48, %v1180_v2  ;;  %vm1339_vm14 = vcmp.lt.s32.totalorder %v1318_v44, 3  ;;  %vm1340_vm15 = vcmp.lt.s32.totalorder %v1318_v44, 4  ;;  %v1341_v1 = vsel %vm1337_vm12, %v1321_v3, %v1324_v42 }
 0x137   : > { %v1185_v4 = vsel %vm5485_vm4, %v4731_v13, %v1182_v41  ;;  %v3906_v50 = vadd.s32 4294967294, %v1269_v57  ;;  %v1342_v43 = vsel %vm1340_vm15, %v1330_v59, 2102212464  ;;  %v1345_v28 = vsel %vm1337_vm12, %v1324_v42, %v1327_v63 }
 0x138   : > { %4240 = vcosq.f32 %v1185_v4  ;;  %v1346_v40 = vsel %vm1340_vm15, %v1333_v8, 920167782  ;;  %v1343_v30 = vsel %vm1339_vm14, %v1327_v63, %v1342_v43  ;;  %v1349_v19 = vsel %vm1337_vm12, %v1327_v63, %v1330_v59 }
 0x139   : > { %4242 = vsinq.f32 %v1185_v4  ;;  %vm3907_vm0 = vcmp.lt.s32.totalorder %v3906_v50, 0  ;;  %v1347_v49 = vsel %vm1339_vm14, %v1330_v59, %v1346_v40  ;;  %v1287_v10 = vsub.s32 4, %v5499_v55 }
 0x13a   : > { %v1272_v51 = vsel %vm3907_vm0, 0, %v3906_v50  ;;  %v1348_v2 = vsel %vm1338_vm13, %v1345_v28, %v1347_v49  ;;  %v1350_v53 = vsel %vm1340_vm15, %v1336_v39, 1326507024  ;;  %v1344_v45 = vsel %vm1338_vm13, %v1341_v1, %v1343_v30 }
 0x13b   : > { %v1273_v12 = vsub.s32 32, %v1272_v51  ;;  %v1274_v47 = vshll.u32 %v5511_v31, %v1272_v51  ;;  %v1277_v35 = vsub.s32 4294967266, %v1272_v51  ;;  %v1351_v0 = vsel %vm1339_vm14, %v1333_v8, %v1350_v53 }
 0x13c   : > { %v1352_v48 = vsel %vm1338_vm13, %v1349_v19, %v1351_v0  ;;  %v5551_v61 = vmul.u32.u64.low %v5515_v11, %v1348_v2  ;;  %v5552_v56 = vmul.u32.u64.high %v5515_v11, %v1348_v2, %v5551_v61  ;;  %vm1189_vm1 = vweird.f32 %v4731_v13 }
 0x13d   : > { %v1275_v7 = vshrl.u32 %v1257_v58, %v1273_v12  ;;  %v1278_v3 = vadd.s32 127, %v1277_v35  ;;  %v5556_v42 = vmul.u32.u64.low %v5515_v11, %v1352_v48  ;;  %v5557_v62 = vmul.u32.u64.high %v5515_v11, %v1352_v48, %v5556_v42 }
 0x13e   : > { %vm1192_vm2 = vcmp.lt.s32.totalorder %v5503_v36, 2  ;;  %vm5563_vm3 = vcmp.le.f32.partialorder %v1201_v33, 0.7853982  ;;  %v1288_v44 = vsel %vm1203_vm11, %v1287_v10, %v5499_v55  ;;  %vm1420_vm4 = vcmp.gt.s32.totalorder %v1419_v9, 0 }
 0x13f   : > { %v1276_v58 = vor.u32 %v1275_v7, %v1274_v47  ;;  %v1279_v41 = vshll.u32 %v1278_v3, 23  ;;  %v1360_v63 = vmul.u32 %v5515_v11, %v1344_v45  ;;  %v1421_v8 = vsel %vm1420_vm4, %v1419_v9, 0 }
 0x140   : > { %vm1193_vm5 = vcmp.eq.s32.totalorder %v5503_v36, 0  ;;  %vm1196_vm6 = vcmp.eq.s32.totalorder %v5503_v36, 2  ;;  %v1363_v6 = vadd.s32 1, %v5552_v56  ;;  %v1423_v33 = vand.u32 31, %v1421_v8 }
 0x141   : > { %v1280_v4 = vor.u32 4788187, %v1279_v41  ;;  %v1283_v57 = vcvt.s32.f32 %v1276_v58  ;;  %vm1362_vm7 = vc.u32 %v5557_v62, %v5551_v61  ;;  %v1417_v55 = vor.u32 8388608, %v5527_v32 }
 0x142   : > { %v1290_v59 = vsel %vm5563_vm3, 0, %v1288_v44  ;;  %v1364_v11 = vsel %vm1362_vm7, %v1363_v6, %v5552_v56  ;;  %v1424_v39 = vsub.s32 32, %v1423_v33  ;;  %v1516_v9 = vand.u32 2139095040, %v4743_v17 }
 0x143   : > { %v1281_v1 = vand.u32 2147483647, %v1280_v4  ;;  %v1365_v43 = vadd.s32 %v1364_v11, %v1360_v63  ;;  %v1422_v28 = vshrl.u32 %v1421_v8, 5  ;;  %v1426_v40 = vshll.u32 %v7343_v60, %v1423_v33 }
 0x144   : > { %v1427_v19 = vshrl.u32 %v7335_v37, %v1424_v39  ;;  %v1429_v32 = vshll.u32 %v7335_v37, %v1423_v33  ;;  %v1432_v51 = vshll.u32 %v7336_v54, %v1423_v33  ;;  %v1430_v12 = vshrl.u32 %v7336_v54, %v1424_v39 }
 0x145   : > { %v4241_v50 = vpop.eup %4240  ;;  %v1284_v2 = vmul.f32 %v1283_v57, %v1281_v1  ;;  %v1366_v53 = vadd.s32 536870912, %v1365_v43  ;;  %v1425_v35 = vshrl.u32 %v7343_v60, %v1424_v39  ;;  %v1435_v0 = vshll.u32 %v7337_v38, %v1423_v33 }
 0x146   : > { %v4243_v30 = vpop.eup %4242  ;;  %v1197_v49 = vxor.u32 2147483648, %v4241_v50  ;;  %v1436_v45 = vshrl.u32 %v7338_v46, %v1424_v39  ;;  %v1433_v3 = vshrl.u32 %v7337_v38, %v1424_v39  ;;  %v1428_v44 = vor.u32 %v1427_v19, %v1426_v40 }
 0x147   : > { %v1194_v10 = vxor.u32 2147483648, %v4243_v30  ;;  %v1285_v56 = vxor.u32 2147483648, %v1284_v2  ;;  %v5593_v7 = vshrl.u32 %v1366_v53, 30  ;;  %v1438_v58 = vshll.u32 %v7338_v46, %v1423_v33 }
 0x148   : > { %v1198_v47 = vsel %vm1196_vm6, %v1197_v49, %v4243_v30  ;;  %v1439_v41 = vshrl.u32 %v7339_v5, %v1424_v39  ;;  %v1431_v4 = vor.u32 %v1430_v12, %v1429_v32  ;;  %v1437_v36 = vor.u32 %v1436_v45, %v1435_v0 }
 0x149   : > { %v1195_v48 = vsel %vm1193_vm5, %v4241_v50, %v1194_v10  ;;  %v1286_v8 = vsel %vm1203_vm11, %v1285_v56, %v1284_v2  ;;  %v1368_v6 = vshll.u32 %v5593_v7, 30  ;;  %vm1441_vm8 = vcmp.lt.s32.totalorder %v1422_v28, 1 }
 0x14a   : > { %v1199_v42 = vsel %vm1192_vm2, %v1195_v48, %v1198_v47  ;;  %v1289_v57 = vsel %vm5563_vm3, %v4734_v14, %v1286_v8  ;;  %v1440_v11 = vor.u32 %v1439_v41, %v1438_v58  ;;  %v1294_v33 = vadd.s32 3, %v1290_v59 }
 0x14b   : > { %v1200_v63 = vsel %vm1189_vm1, nan, %v1199_v42  ;;  %4244 = vcosq.f32 %v1289_v57  ;;  %v5609_v39 = vsub.s32 %v1365_v43, %v1368_v6  ;;  %v1434_v13 = vor.u32 %v1433_v3, %v1432_v51 }
 0x14c   : > { %3704 = vst [vmem:[%s5096_s11 + $0x38] sm:$0xff] %v1200_v63  ;;  %4246 = vsinq.f32 %v1289_v57  ;;  %vm1443_vm9 = vcmp.lt.s32.totalorder %v1422_v28, 3  ;;  %vm1444_vm10 = vcmp.lt.s32.totalorder %v1422_v28, 4  ;;  %v1517_v50 = vshrl.u32 %v1516_v9, 23 }
 0x14d   : > { %v1371_v1 = vsub.s32 0, %v5609_v39  ;;  %vm1442_vm11 = vcmp.lt.s32.totalorder %v1422_v28, 2  ;;  %v1446_v40 = vsel %vm1444_vm10, %v1434_v13, 2102212464  ;;  %v1449_v31 = vsel %vm1441_vm8, %v1428_v44, %v1431_v4 }
 0x14e   : > { %v1445_v30 = vsel %vm1441_vm8, %v1425_v35, %v1428_v44  ;;  %v1450_v49 = vsel %vm1444_vm10, %v1437_v36, 920167782  ;;  %v1454_v19 = vsel %vm1444_vm10, %v1440_v11, 1326507024  ;;  %v1457_v32 = vshll.u32 %v1417_v55, 8 }
 0x14f   : > { %v3909_v59 = vmin.u32 %v1371_v1, %v5609_v39  ;;  %v1447_v43 = vsel %vm1443_vm9, %v1431_v4, %v1446_v40  ;;  %v1451_v51 = vsel %vm1443_vm9, %v1434_v13, %v1450_v49  ;;  %v1453_v10 = vsel %vm1441_vm8, %v1431_v4, %v1434_v13 }
 0x150   : > { %v1295_v9 = vand.u32 3, %v1294_v33  ;;  %v1452_v2 = vsel %vm1442_vm11, %v1449_v31, %v1451_v51  ;;  %v1455_v53 = vsel %vm1443_vm9, %v1437_v36, %v1454_v19  ;;  %v3916_v12 = vadd.s32 4294967169, %v1517_v50 }
 0x151   : > { %v1373_v47 = vclz %v3909_v59  ;;  %v1391_v35 = vsub.s32 4, %v5593_v7  ;;  %v1513_v0 = vand.u32 2147483647, %v4743_v17  ;;  %v1448_v55 = vsel %vm1442_vm11, %v1445_v30, %v1447_v43 }
 0x152   : > { %v1456_v45 = vsel %vm1442_vm11, %v1453_v10, %v1455_v53  ;;  %v5624_v48 = vmul.u32.u64.low %v1457_v32, %v1452_v2  ;;  %v5625_v56 = vmul.u32.u64.high %v1457_v32, %v1452_v2, %v5624_v48  ;;  %v1523_v58 = vadd.s32 1, %v3916_v12 }
 0x153   : > { %v3910_v3 = vadd.s32 4294967294, %v1373_v47  ;;  %v5628_v42 = vmul.u32.u64.low %v1457_v32, %v1456_v45  ;;  %v5629_v44 = vmul.u32.u64.high %v1457_v32, %v1456_v45, %v5628_v42  ;;  %vm1293_vm12 = vweird.f32 %v4734_v14 }
 0x154   : > { %vm1296_vm13 = vcmp.lt.s32.totalorder %v1295_v9, 2  ;;  %vm5634_vm14 = vcmp.le.f32.partialorder %v1305_v52, 0.7853982  ;;  %vm1307_vm15 = vcmp.lt.s32.totalorder %v4737_v15, 0  ;;  %v1361_v28 = vadd.s32 %v5551_v61, %v5557_v62 }
 0x155   : > { %vm3911_vm0 = vcmp.lt.s32.totalorder %v3910_v3, 0  ;;  %v1520_v63 = vand.u32 8388607, %v1513_v0  ;;  %vm1524_vm1 = vcmp.gt.s32.totalorder %v1523_v58, 0  ;;  %v1464_v6 = vmul.u32 %v1457_v32, %v1448_v55 }
 0x156   : > { %v1376_v8 = vsel %vm3911_vm0, 0, %v3910_v3  ;;  %v1467_v4 = vadd.s32 1, %v5625_v56  ;;  %v1525_v57 = vsel %vm1524_vm1, %v1523_v58, 0  ;;  %v5648_v33 = vsel %vm1307_vm15, %v1391_v35, %v5593_v7 }
 0x157   : > { %v1377_v36 = vsub.s32 32, %v1376_v8  ;;  %v1378_v52 = vshll.u32 %v5609_v39, %v1376_v8  ;;  %v1381_v11 = vsub.s32 4294967266, %v1376_v8  ;;  %vm1297_vm2 = vcmp.eq.s32.totalorder %v1295_v9, 0 }
 0x158   : > { %v4245_v61 = vpop.eup %4244  ;;  %vm1300_vm3 = vcmp.eq.s32.totalorder %v1295_v9, 2  ;;  %vm1466_vm4 = vc.u32 %v5629_v44, %v5624_v48  ;;  %v1527_v62 = vand.u32 31, %v1525_v57  ;;  %v1394_v30 = vsel %vm5634_vm14, 0, %v5648_v33 }
 0x159   : > { %v4247_v13 = vpop.eup %4246  ;;  %v1301_v50 = vxor.u32 2147483648, %v4245_v61  ;;  %v1379_v1 = vshrl.u32 %v1361_v28, %v1377_v36  ;;  %v1382_v40 = vadd.s32 127, %v1381_v11  ;;  %v1468_v31 = vsel %vm1466_vm4, %v1467_v4, %v5625_v56 }
 0x15a   : > { %v1298_v39 = vxor.u32 2147483648, %v4247_v13  ;;  %v1469_v7 = vadd.s32 %v1468_v31, %v1464_v6  ;;  %v1528_v49 = vsub.s32 32, %v1527_v62  ;;  %v1521_v43 = vor.u32 8388608, %v1520_v63 }
 0x15b   : > { %v1302_v19 = vsel %vm1300_vm3, %v1301_v50, %v4247_v13  ;;  %v1380_v32 = vor.u32 %v1379_v1, %v1378_v52  ;;  %v1383_v59 = vshll.u32 %v1382_v40, 23  ;;  %v5657_v2 = vshrl.u32 %v1525_v57, 5 }
 0x15c   : > { %v1299_v51 = vsel %vm1297_vm2, %v4245_v61, %v1298_v39  ;;  %v1470_v10 = vadd.s32 536870912, %v1469_v7  ;;  %v1530_v53 = vshll.u32 %v7343_v60, %v1527_v62  ;;  %v1533_v55 = vshll.u32 %v7335_v37, %v1527_v62 }
 0x15d   : > { %v1303_v12 = vsel %vm1296_vm13, %v1299_v51, %v1302_v19  ;;  %v1384_v47 = vor.u32 4788187, %v1383_v59  ;;  %v1387_v35 = vcvt.s32.f32 %v1380_v32  ;;  %v1531_v3 = vshrl.u32 %v7335_v37, %v1528_v49 }
 0x15e   : > { %v1304_v45 = vsel %vm1293_vm12, nan, %v1303_v12  ;;  %v1471_v56 = vshrl.u32 %v1470_v10, 30  ;;  %v1534_v42 = vshrl.u32 %v7336_v54, %v1528_v49  ;;  %v1536_v28 = vshll.u32 %v7336_v54, %v1527_v62 }
 0x15f   : > { %v1385_v58 = vand.u32 2147483647, %v1384_v47  ;;  %v1537_v63 = vshrl.u32 %v7337_v38, %v1528_v49  ;;  %v1539_v9 = vshll.u32 %v7337_v38, %v1527_v62  ;;  %3705 = vst [vmem:[%s5096_s11 + $0x40] sm:$0xff] %v1304_v45  ;;  %v1540_v6 = vshrl.u32 %v7338_v46, %v1528_v49 }
 0x160   : > { %v1472_v8 = vshll.u32 %v1471_v56, 30  ;;  %v1542_v4 = vshll.u32 %v7338_v46, %v1527_v62  ;;  %v5672_v14 = vshll.u32 %v1521_v43, 8  ;;  %v1529_v36 = vshrl.u32 %v7343_v60, %v1528_v49 }
 0x161   : > { %v1388_v57 = vmul.f32 %v1387_v35, %v1385_v58  ;;  %v1543_v52 = vshrl.u32 %v7339_v5, %v1528_v49  ;;  %v1620_v11 = vand.u32 2139095040, %v4746_v18  ;;  %vm1411_vm5 = vcmp.lt.s32.totalorder %v4740_v16, 0 }
 0x162   : > { %v5678_v33 = vsub.s32 %v1469_v7, %v1472_v8  ;;  %v1532_v61 = vor.u32 %v1531_v3, %v1530_v53  ;;  %v1535_v13 = vor.u32 %v1534_v42, %v1533_v55  ;;  %v1541_v50 = vor.u32 %v1540_v6, %v1539_v9 }
 0x163   : > { %v1389_v1 = vxor.u32 2147483648, %v1388_v57  ;;  %v1538_v40 = vor.u32 %v1537_v63, %v1536_v28  ;;  %vm1545_vm6 = vcmp.lt.s32.totalorder %v5657_v2, 1  ;;  %vm1546_vm7 = vcmp.lt.s32.totalorder %v5657_v2, 2 }
 0x164   : > { %v1475_v62 = vsub.s32 0, %v5678_v33  ;;  %v1544_v31 = vor.u32 %v1543_v52, %v1542_v4  ;;  %vm1547_vm8 = vcmp.lt.s32.totalorder %v5657_v2, 3  ;;  %vm1548_vm9 = vcmp.lt.s32.totalorder %v5657_v2, 4 }
 0x165   : > { %v1390_v39 = vsel %vm1307_vm15, %v1389_v1, %v1388_v57  ;;  %v1549_v7 = vsel %vm1545_vm6, %v1529_v36, %v1532_v61  ;;  %v1550_v49 = vsel %vm1548_vm9, %v1538_v40, 2102212464  ;;  %v1554_v19 = vsel %vm1548_vm9, %v1541_v50, 920167782 }
 0x166   : > { %v1393_v32 = vsel %vm5634_vm14, %v4737_v15, %v1390_v39  ;;  %vm5698_vm10 = vcmp.le.f32.partialorder %v1409_v34, 0.7853982  ;;  %v3913_v43 = vmin.u32 %v1475_v62, %v5678_v33  ;;  %v1551_v51 = vsel %vm1547_vm8, %v1535_v13, %v1550_v49 }
 0x167   : > { %v1553_v10 = vsel %vm1545_vm6, %v1532_v61, %v1535_v13  ;;  %4248 = vcosq.f32 %v1393_v32  ;;  %v1495_v53 = vsub.s32 4, %v1471_v56  ;;  %v1555_v41 = vsel %vm1547_vm8, %v1538_v40, %v1554_v19 }
 0x168   : > { %v1621_v12 = vshrl.u32 %v1620_v11, 23  ;;  %4250 = vsinq.f32 %v1393_v32  ;;  %v1477_v47 = vclz %v3913_v43  ;;  %v1557_v34 = vsel %vm1545_vm6, %v1535_v13, %v1538_v40 }
 0x169   : > { %v1617_v35 = vand.u32 2147483647, %v4746_v18  ;;  %v1398_v55 = vadd.s32 3, %v1394_v30  ;;  %v1552_v45 = vsel %vm1546_vm7, %v1549_v7, %v1551_v51  ;;  %v1556_v3 = vsel %vm1546_vm7, %v1553_v10, %v1555_v41 }
 0x16a   : > { %v1558_v42 = vsel %vm1548_vm9, %v1544_v31, 1326507024  ;;  %v3914_v58 = vadd.s32 4294967294, %v1477_v47  ;;  %v5721_v63 = vmul.u32.u64.low %v5672_v14, %v1556_v3  ;;  %v5722_v9 = vmul.u32.u64.high %v5672_v14, %v1556_v3, %v5721_v63 }
 0x16b   : > { %v1559_v28 = vsel %vm1547_vm8, %v1541_v50, %v1558_v42  ;;  %v1465_v30 = vadd.s32 %v5624_v48, %v5629_v44  ;;  %v1496_v8 = vsel %vm1411_vm5, %v1495_v53, %v1471_v56  ;;  %v3920_v4 = vadd.s32 4294967169, %v1621_v12 }
 0x16c   : > { %v1560_v6 = vsel %vm1546_vm7, %v1557_v34, %v1559_v28  ;;  %vm3915_vm11 = vcmp.lt.s32.totalorder %v3914_v58, 0  ;;  %v1624_v52 = vand.u32 8388607, %v1617_v35  ;;  %v1399_v11 = vand.u32 3, %v1398_v55 }
 0x16d   : > { %v5731_v57 = vmul.u32.u64.low %v5672_v14, %v1560_v6  ;;  %v5732_v36 = vmul.u32.u64.high %v5672_v14, %v1560_v6, %v5731_v57  ;;  %v1480_v61 = vsel %vm3915_vm11, 0, %v3914_v58  ;;  %v1568_v13 = vmul.u32 %v5672_v14, %v1552_v45 }
 0x16e   : > { %v1627_v48 = vadd.s32 1, %v3920_v4  ;;  %v1481_v44 = vsub.s32 32, %v1480_v61  ;;  %v1482_v56 = vshll.u32 %v5678_v33, %v1480_v61  ;;  %v1485_v50 = vsub.s32 4294967266, %v1480_v61 }
 0x16f   : > { %v1571_v2 = vadd.s32 1, %v5722_v9  ;;  %v1498_v1 = vsel %vm5698_vm10, 0, %v1496_v8  ;;  %vm1570_vm13 = vc.u32 %v5732_v36, %v5721_v63  ;;  %v1625_v31 = vor.u32 8388608, %v1624_v52 }
 0x170   : > { %vm1628_vm12 = vcmp.gt.s32.totalorder %v1627_v48, 0  ;;  %v1483_v40 = vshrl.u32 %v1465_v30, %v1481_v44  ;;  %v1486_v62 = vadd.s32 127, %v1485_v50  ;;  %vm1397_vm14 = vweird.f32 %v4737_v15 }
 0x171   : > { %v1572_v14 = vsel %vm1570_vm13, %v1571_v2, %v5722_v9  ;;  %v1629_v39 = vsel %vm1628_vm12, %v1627_v48, 0  ;;  %v1721_v7 = vand.u32 2147483647, %v4749_v20  ;;  %vm1400_vm15 = vcmp.lt.s32.totalorder %v1399_v11, 2 }
 0x172   : > { %v1484_v33 = vor.u32 %v1483_v40, %v1482_v56  ;;  %v1487_v49 = vshll.u32 %v1486_v62, 23  ;;  %v1573_v19 = vadd.s32 %v1572_v14, %v1568_v13  ;;  %vm1401_vm0 = vcmp.eq.s32.totalorder %v1399_v11, 0 }
 0x173   : > { %vm1404_vm1 = vcmp.eq.s32.totalorder %v1399_v11, 2  ;;  %v5745_v32 = vadd.s32 3, %v1498_v1  ;;  %v1631_v43 = vand.u32 31, %v1629_v39  ;;  %v5747_v12 = vshll.u32 %v1625_v31, 8 }
 0x174   : > { %v4249_v51 = vpop.eup %4248  ;;  %v1488_v10 = vor.u32 4788187, %v1487_v49  ;;  %v1491_v53 = vcvt.s32.f32 %v1484_v33  ;;  %v1574_v41 = vadd.s32 536870912, %v1573_v19  ;;  %v1724_v45 = vand.u32 2139095040, %v4749_v20 }
 0x175   : > { %v4251_v47 = vpop.eup %4250  ;;  %v1405_v34 = vxor.u32 2147483648, %v4249_v51  ;;  %v1632_v55 = vsub.s32 32, %v1631_v43  ;;  %v5752_v3 = vand.u32 8388607, %v1721_v7  ;;  %v5755_v28 = vadd.s32 %v5721_v63, %v5732_v36 }
 0x176   : > { %v1402_v42 = vxor.u32 2147483648, %v4251_v47  ;;  %v1489_v58 = vand.u32 2147483647, %v1488_v10  ;;  %v5757_v9 = vshrl.u32 %v1574_v41, 30  ;;  %v1634_v8 = vshll.u32 %v7343_v60, %v1631_v43 }
 0x177   : > { %v1406_v30 = vsel %vm1404_vm1, %v1405_v34, %v4251_v47  ;;  %v1635_v6 = vshrl.u32 %v7335_v37, %v1632_v55  ;;  %v1637_v4 = vshll.u32 %v7335_v37, %v1631_v43  ;;  %v1638_v13 = vshrl.u32 %v7336_v54, %v1632_v55 }
 0x178   : > { %v1403_v57 = vsel %vm1401_vm0, %v4249_v51, %v1402_v42  ;;  %v1492_v52 = vmul.f32 %v1491_v53, %v1489_v58  ;;  %v1576_v61 = vshll.u32 %v5757_v9, 30  ;;  %v1640_v36 = vshll.u32 %v7336_v54, %v1631_v43 }
 0x179   : > { %v1407_v63 = vsel %vm1400_vm15, %v1403_v57, %v1406_v30  ;;  %v1641_v48 = vshrl.u32 %v7337_v38, %v1632_v55  ;;  %v1725_v44 = vshrl.u32 %v1724_v45, 23  ;;  %v1630_v1 = vshrl.u32 %v1629_v39, 5 }
 0x17a   : > { %v1408_v56 = vsel %vm1397_vm14, nan, %v1407_v63  ;;  %v1493_v50 = vxor.u32 2147483648, %v1492_v52  ;;  %v5771_v2 = vsub.s32 %v1573_v19, %v1576_v61  ;;  %v1633_v40 = vshrl.u32 %v7343_v60, %v1632_v55 }
 0x17b   : > { %v1636_v62 = vor.u32 %v1635_v6, %v1634_v8  ;;  %v1643_v31 = vshll.u32 %v7337_v38, %v1631_v43  ;;  %v1644_v11 = vshrl.u32 %v7338_v46, %v1632_v55  ;;  %3706 = vst [vmem:[%s5096_s11 + $0x48] sm:$0xff] %v1408_v56  ;;  %v1639_v49 = vor.u32 %v1638_v13, %v1637_v4 }
 0x17c   : > { %v1494_v14 = vsel %vm1411_vm5, %v1493_v50, %v1492_v52  ;;  %v1579_v33 = vsub.s32 0, %v5771_v2  ;;  %v1646_v15 = vshll.u32 %v7338_v46, %v1631_v43  ;;  %v1642_v19 = vor.u32 %v1641_v48, %v1640_v36 }
 0x17d   : > { %v1497_v39 = vsel %vm5698_vm10, %v4740_v16, %v1494_v14  ;;  %v1645_v51 = vor.u32 %v1644_v11, %v1643_v31  ;;  %v1647_v10 = vshrl.u32 %v7339_v5, %v1632_v55  ;;  %vm1649_vm2 = vcmp.lt.s32.totalorder %v1630_v1, 1 }
 0x17e   : > { %4252 = vcosq.f32 %v1497_v39  ;;  %v3917_v53 = vmin.u32 %v1579_v33, %v5771_v2  ;;  %v3924_v41 = vadd.s32 4294967169, %v1725_v44  ;;  %vm1651_vm3 = vcmp.lt.s32.totalorder %v1630_v1, 3 }
 0x17f   : > { %4254 = vsinq.f32 %v1497_v39  ;;  %v1648_v47 = vor.u32 %v1647_v10, %v1646_v15  ;;  %vm1652_vm4 = vcmp.lt.s32.totalorder %v1630_v1, 4  ;;  %v1599_v43 = vsub.s32 4, %v5757_v9 }
 0x180   : > { %v1581_v34 = vclz %v3917_v53  ;;  %vm1650_vm5 = vcmp.lt.s32.totalorder %v1630_v1, 2  ;;  %v1653_v45 = vsel %vm1649_vm2, %v1633_v40, %v1636_v62  ;;  %v1654_v59 = vsel %vm1652_vm4, %v1642_v19, 2102212464 }
 0x181   : > { %v1657_v42 = vsel %vm1649_vm2, %v1636_v62, %v1639_v49  ;;  %v1658_v58 = vsel %vm1652_vm4, %v1645_v51, 920167782  ;;  %v1661_v30 = vsel %vm1649_vm2, %v1639_v49, %v1642_v19  ;;  %vm5789_vm6 = vcmp.le.f32.partialorder %v1513_v0, 0.7853982 }
 0x182   : > { %v3918_v8 = vadd.s32 4294967294, %v1581_v34  ;;  %v1655_v6 = vsel %vm1651_vm3, %v1639_v49, %v1654_v59  ;;  %v1659_v4 = vsel %vm1651_vm3, %v1642_v19, %v1658_v58  ;;  %v1662_v57 = vsel %vm1652_vm4, %v1648_v47, 1326507024 }
 0x183   : > { %v1656_v52 = vsel %vm1650_vm5, %v1653_v45, %v1655_v6  ;;  %v1660_v61 = vsel %vm1650_vm5, %v1657_v42, %v1659_v4  ;;  %v1663_v13 = vsel %vm1651_vm3, %v1645_v51, %v1662_v57  ;;  %v1731_v63 = vadd.s32 1, %v3924_v41 }
 0x184   : > { %vm3919_vm7 = vcmp.lt.s32.totalorder %v3918_v8, 0  ;;  %v1664_v36 = vsel %vm1650_vm5, %v1661_v30, %v1663_v13  ;;  %v5800_v0 = vmul.u32.u64.low %v5747_v12, %v1660_v61  ;;  %v5801_v48 = vmul.u32.u64.high %v5747_v12, %v1660_v61, %v5800_v0 }
 0x185   : > { %v1503_v44 = vand.u32 3, %v5745_v32  ;;  %v1584_v56 = vsel %vm3919_vm7, 0, %v3918_v8  ;;  %v5806_v50 = vmul.u32.u64.low %v5747_v12, %v1664_v36  ;;  %v5807_v40 = vmul.u32.u64.high %v5747_v12, %v1664_v36, %v5806_v50 }
 0x186   : > { %vm1501_vm8 = vweird.f32 %v4740_v16  ;;  %v1585_v62 = vsub.s32 32, %v1584_v56  ;;  %v1586_v31 = vshll.u32 %v5771_v2, %v1584_v56  ;;  %v1589_v11 = vsub.s32 4294967266, %v1584_v56 }
 0x187   : > { %vm1732_vm9 = vcmp.gt.s32.totalorder %v1731_v63, 0  ;;  %vm1515_vm10 = vcmp.lt.s32.totalorder %v4743_v17, 0  ;;  %v1672_v1 = vmul.u32 %v5747_v12, %v1656_v52  ;;  %v1729_v14 = vor.u32 8388608, %v5752_v3 }
 0x188   : > { %v1733_v33 = vsel %vm1732_vm9, %v1731_v63, 0  ;;  %v1587_v32 = vshrl.u32 %v5755_v28, %v1585_v62  ;;  %v1590_v49 = vadd.s32 127, %v1589_v11  ;;  %v5818_v15 = vsel %vm1515_vm10, %v1599_v43, %v5757_v9 }
 0x189   : > { %v1675_v39 = vadd.s32 1, %v5801_v48  ;;  %vm1504_vm11 = vcmp.lt.s32.totalorder %v1503_v44, 2  ;;  %vm1505_vm12 = vcmp.eq.s32.totalorder %v1503_v44, 0  ;;  %vm1674_vm13 = vc.u32 %v5807_v40, %v5800_v0 }
 0x18a   : > { %v1735_v2 = vand.u32 31, %v1733_v33  ;;  %vm1508_vm14 = vcmp.eq.s32.totalorder %v1503_v44, 2  ;;  %v1588_v12 = vor.u32 %v1587_v32, %v1586_v31  ;;  %v1591_v3 = vshll.u32 %v1590_v49, 23 }
 0x18b   : > { %v1676_v19 = vsel %vm1674_vm13, %v1675_v39, %v5801_v48  ;;  %v4253_v28 = vpop.eup %4252  ;;  %v1602_v51 = vsel %vm5789_vm6, 0, %v5818_v15  ;;  %v5827_v53 = vshll.u32 %v1729_v14, 8  ;;  %v1828_v45 = vand.u32 2139095040, %v4752_v21 }
 0x18c   : > { %v1677_v9 = vadd.s32 %v1676_v19, %v1672_v1  ;;  %v1736_v10 = vsub.s32 32, %v1735_v2  ;;  %v4255_v41 = vpop.eup %4254  ;;  %v1509_v47 = vxor.u32 2147483648, %v4253_v28  ;;  %v1592_v34 = vor.u32 4788187, %v1591_v3 }
 0x18d   : > { %v1595_v43 = vcvt.s32.f32 %v1588_v12  ;;  %v1506_v59 = vxor.u32 2147483648, %v4255_v41  ;;  %v1734_v58 = vshrl.u32 %v1733_v33, 5  ;;  %v1738_v30 = vshll.u32 %v7343_v60, %v1735_v2 }
 0x18e   : > { %v1678_v42 = vadd.s32 536870912, %v1677_v9  ;;  %v1510_v8 = vsel %vm1508_vm14, %v1509_v47, %v4255_v41  ;;  %v1593_v6 = vand.u32 2147483647, %v1592_v34  ;;  %v1739_v4 = vshrl.u32 %v7335_v37, %v1736_v10 }
 0x18f   : > { %v1741_v57 = vshll.u32 %v7335_v37, %v1735_v2  ;;  %v1507_v52 = vsel %vm1505_vm12, %v4253_v28, %v1506_v59  ;;  %v1742_v13 = vshrl.u32 %v7336_v54, %v1736_v10  ;;  %v1747_v63 = vshll.u32 %v7337_v38, %v1735_v2 }
 0x190   : > { %v1679_v61 = vshrl.u32 %v1678_v42, 30  ;;  %v1511_v36 = vsel %vm1504_vm11, %v1507_v52, %v1510_v8  ;;  %v1596_v48 = vmul.f32 %v1595_v43, %v1593_v6  ;;  %v1744_v56 = vshll.u32 %v7336_v54, %v1735_v2 }
 0x191   : > { %v1745_v50 = vshrl.u32 %v7337_v38, %v1736_v10  ;;  %v1512_v62 = vsel %vm1501_vm8, nan, %v1511_v36  ;;  %v1748_v11 = vshrl.u32 %v7338_v46, %v1736_v10  ;;  %vm1753_vm15 = vcmp.lt.s32.totalorder %v1734_v58, 1 }
 0x192   : > { %v1680_v31 = vshll.u32 %v1679_v61, 30  ;;  %v1597_v1 = vxor.u32 2147483648, %v1596_v48  ;;  %v1737_v14 = vshrl.u32 %v7343_v60, %v1736_v10  ;;  %v1750_v33 = vshll.u32 %v7338_v46, %v1735_v2  ;;  %3707 = vst [vmem:[%s5096_s11 + $0x50] sm:$0xff] %v1512_v62 }
 0x193   : > { %v1751_v44 = vshrl.u32 %v7339_v5, %v1736_v10  ;;  %v1740_v49 = vor.u32 %v1739_v4, %v1738_v30  ;;  %v1743_v15 = vor.u32 %v1742_v13, %v1741_v57  ;;  %v1749_v39 = vor.u32 %v1748_v11, %v1747_v63 }
 0x194   : > { %v5847_v32 = vsub.s32 %v1677_v9, %v1680_v31  ;;  %v1598_v16 = vsel %vm1515_vm10, %v1597_v1, %v1596_v48  ;;  %v1746_v12 = vor.u32 %v1745_v50, %v1744_v56  ;;  %vm1756_vm0 = vcmp.lt.s32.totalorder %v1734_v58, 4 }
 0x195   : > { %v1752_v3 = vor.u32 %v1751_v44, %v1750_v33  ;;  %v1601_v19 = vsel %vm5789_vm6, %v4743_v17, %v1598_v16  ;;  %vm1754_vm1 = vcmp.lt.s32.totalorder %v1734_v58, 2  ;;  %vm1755_vm2 = vcmp.lt.s32.totalorder %v1734_v58, 3 }
 0x196   : > { %v1683_v2 = vsub.s32 0, %v5847_v32  ;;  %4256 = vcosq.f32 %v1601_v19  ;;  %v1757_v28 = vsel %vm1753_vm15, %v1737_v14, %v1740_v49  ;;  %v1758_v9 = vsel %vm1756_vm0, %v1746_v12, 2102212464 }
 0x197   : > { %v1762_v10 = vsel %vm1756_vm0, %v1749_v39, 920167782  ;;  %4258 = vsinq.f32 %v1601_v19  ;;  %v1759_v47 = vsel %vm1755_vm2, %v1743_v15, %v1758_v9  ;;  %v1761_v34 = vsel %vm1753_vm15, %v1740_v49, %v1743_v15 }
 0x198   : > { %v3921_v41 = vmin.u32 %v1683_v2, %v5847_v32  ;;  %v1763_v43 = vsel %vm1755_vm2, %v1746_v12, %v1762_v10  ;;  %v1765_v55 = vsel %vm1753_vm15, %v1743_v15, %v1746_v12  ;;  %v1766_v59 = vsel %vm1756_vm0, %v1752_v3, 1326507024 }
 0x199   : > { %v1606_v42 = vadd.s32 3, %v1602_v51  ;;  %vm1619_vm3 = vcmp.lt.s32.totalorder %v4746_v18, 0  ;;  %v1703_v8 = vsub.s32 4, %v1679_v61  ;;  %v1760_v6 = vsel %vm1754_vm1, %v1757_v28, %v1759_v47 }
 0x19a   : > { %v1685_v30 = vclz %v3921_v41  ;;  %v1764_v4 = vsel %vm1754_vm1, %v1761_v34, %v1763_v43  ;;  %v1767_v57 = vsel %vm1755_vm2, %v1749_v39, %v1766_v59  ;;  %v1829_v52 = vshrl.u32 %v1828_v45, 23 }
 0x19b   : > { %v1768_v63 = vsel %vm1754_vm1, %v1765_v55, %v1767_v57  ;;  %v5867_v36 = vmul.u32.u64.low %v5827_v53, %v1764_v4  ;;  %v5868_v48 = vmul.u32.u64.high %v5827_v53, %v1764_v4, %v5867_v36  ;;  %v1825_v50 = vand.u32 2147483647, %v4752_v21 }
 0x19c   : > { %v3922_v13 = vadd.s32 4294967294, %v1685_v30  ;;  %v5871_v51 = vmul.u32.u64.low %v5827_v53, %v1768_v63  ;;  %v5872_v56 = vmul.u32.u64.high %v5827_v53, %v1768_v63, %v5871_v51  ;;  %v3928_v62 = vadd.s32 4294967169, %v1829_v52 }
 0x19d   : > { %vm5877_vm4 = vcmp.le.f32.partialorder %v1617_v35, 0.7853982  ;;  %v1673_v45 = vadd.s32 %v5800_v0, %v5807_v40  ;;  %v1704_v58 = vsel %vm1619_vm3, %v1703_v8, %v1679_v61  ;;  %vm1605_vm6 = vweird.f32 %v4743_v17 }
 0x19e   : > { %vm3923_vm5 = vcmp.lt.s32.totalorder %v3922_v13, 0  ;;  %v1607_v11 = vand.u32 3, %v1606_v42  ;;  %v1776_v14 = vmul.u32 %v5827_v53, %v1760_v6  ;;  %v1835_v33 = vadd.s32 1, %v3928_v62 }
 0x19f   : > { %v1688_v1 = vsel %vm3923_vm5, 0, %v3922_v13  ;;  %v1779_v15 = vadd.s32 1, %v5868_v48  ;;  %v1706_v0 = vsel %vm5877_vm4, 0, %v1704_v58  ;;  %vm1778_vm7 = vc.u32 %v5872_v56, %v5867_v36 }
 0x1a0   : > { %v1689_v44 = vsub.s32 32, %v1688_v1  ;;  %v1690_v35 = vshll.u32 %v5847_v32, %v1688_v1  ;;  %v1693_v49 = vsub.s32 4294967266, %v1688_v1  ;;  %v1832_v40 = vand.u32 8388607, %v1825_v50 }
 0x1a1   : > { %vm1836_vm8 = vcmp.gt.s32.totalorder %v1835_v33, 0  ;;  %v1780_v53 = vsel %vm1778_vm7, %v1779_v15, %v5868_v48  ;;  %vm1608_vm9 = vcmp.lt.s32.totalorder %v1607_v11, 2  ;;  %vm1609_vm10 = vcmp.eq.s32.totalorder %v1607_v11, 0 }
 0x1a2   : > { %v1691_v61 = vshrl.u32 %v1673_v45, %v1689_v44  ;;  %v1694_v39 = vadd.s32 127, %v1693_v49  ;;  %v1837_v16 = vsel %vm1836_vm8, %v1835_v33, 0  ;;  %v1781_v32 = vadd.s32 %v1780_v53, %v1776_v14 }
 0x1a3   : > { %v1839_v12 = vand.u32 31, %v1837_v16  ;;  %v4257_v3 = vpop.eup %4256  ;;  %vm1612_vm11 = vcmp.eq.s32.totalorder %v1607_v11, 2  ;;  %v5895_v28 = vadd.s32 3, %v1706_v0  ;;  %v1833_v47 = vor.u32 8388608, %v1832_v40 }
 0x1a4   : > { %v1692_v19 = vor.u32 %v1691_v61, %v1690_v35  ;;  %v1695_v2 = vshll.u32 %v1694_v39, 23  ;;  %v4259_v9 = vpop.eup %4258  ;;  %v1613_v10 = vxor.u32 2147483648, %v4257_v3  ;;  %v1782_v41 = vadd.s32 536870912, %v1781_v32 }
 0x1a5   : > { %v1840_v34 = vsub.s32 32, %v1839_v12  ;;  %v1610_v43 = vxor.u32 2147483648, %v4259_v9  ;;  %v1932_v42 = vand.u32 2139095040, %v4755_v22  ;;  %v5899_v8 = vadd.s32 %v5867_v36, %v5872_v56 }
 0x1a6   : > { %v1696_v55 = vor.u32 4788187, %v1695_v2  ;;  %v1699_v59 = vcvt.s32.f32 %v1692_v19  ;;  %v1614_v30 = vsel %vm1612_vm11, %v1613_v10, %v4259_v9  ;;  %v1783_v6 = vshrl.u32 %v1782_v41, 30 }
 0x1a7   : > { %v1838_v4 = vshrl.u32 %v1837_v16, 5  ;;  %v1611_v57 = vsel %vm1609_vm10, %v4257_v3, %v1610_v43  ;;  %v1842_v13 = vshll.u32 %v7343_v60, %v1839_v12  ;;  %v1845_v63 = vshll.u32 %v7335_v37, %v1839_v12 }
 0x1a8   : > { %v1697_v52 = vand.u32 2147483647, %v1696_v55  ;;  %v1615_v48 = vsel %vm1608_vm9, %v1611_v57, %v1614_v30  ;;  %vm1723_vm12 = vcmp.lt.s32.totalorder %v4749_v20, 0  ;;  %v1784_v51 = vshll.u32 %v1783_v6, 30 }
 0x1a9   : > { %v1843_v62 = vshrl.u32 %v7335_v37, %v1840_v34  ;;  %v1846_v36 = vshrl.u32 %v7336_v54, %v1840_v34  ;;  %v1616_v56 = vsel %vm1605_vm6, nan, %v1615_v48  ;;  %v1848_v58 = vshll.u32 %v7336_v54, %v1839_v12 }
 0x1aa   : > { %v1700_v45 = vmul.f32 %v1699_v59, %v1697_v52  ;;  %v1849_v1 = vshrl.u32 %v7337_v38, %v1840_v34  ;;  %v5912_v14 = vsub.s32 %v1781_v32, %v1784_v51  ;;  %v1851_v11 = vshll.u32 %v7337_v38, %v1839_v12  ;;  %3708 = vst [vmem:[%s5096_s11 + $0x58] sm:$0xff] %v1616_v56 }
 0x1ab   : > { %v1852_v33 = vshrl.u32 %v7338_v46, %v1840_v34  ;;  %v5916_v44 = vshll.u32 %v1833_v47, 8  ;;  %v1807_v49 = vsub.s32 4, %v1783_v6  ;;  %v1841_v15 = vshrl.u32 %v7343_v60, %v1840_v34 }
 0x1ac   : > { %v1701_v35 = vxor.u32 2147483648, %v1700_v45  ;;  %v1854_v17 = vshll.u32 %v7338_v46, %v1839_v12  ;;  %v1787_v0 = vsub.s32 0, %v5912_v14  ;;  %v1844_v40 = vor.u32 %v1843_v62, %v1842_v13 }
 0x1ad   : > { %v1847_v61 = vor.u32 %v1846_v36, %v1845_v63  ;;  %v1855_v39 = vshrl.u32 %v7339_v5, %v1840_v34  ;;  %v1850_v16 = vor.u32 %v1849_v1, %v1848_v58  ;;  %v1853_v32 = vor.u32 %v1852_v33, %v1851_v11 }
 0x1ae   : > { %v1702_v53 = vsel %vm1619_vm3, %v1701_v35, %v1700_v45  ;;  %vm1857_vm13 = vcmp.lt.s32.totalorder %v1838_v4, 1  ;;  %v3925_v19 = vmin.u32 %v1787_v0, %v5912_v14  ;;  %v1933_v12 = vshrl.u32 %v1932_v42, 23 }
 0x1af   : > { %v1705_v3 = vsel %vm5877_vm4, %v4746_v18, %v1702_v53  ;;  %v1856_v2 = vor.u32 %v1855_v39, %v1854_v17  ;;  %vm1858_vm14 = vcmp.lt.s32.totalorder %v1838_v4, 2  ;;  %vm1859_vm15 = vcmp.lt.s32.totalorder %v1838_v4, 3 }
 0x1b0   : > { %4260 = vcosq.f32 %v1705_v3  ;;  %vm1860_vm0 = vcmp.lt.s32.totalorder %v1838_v4, 4  ;;  %v1789_v9 = vclz %v3925_v19  ;;  %v1861_v10 = vsel %vm1857_vm13, %v1841_v15, %v1844_v40 }
 0x1b1   : > { %4262 = vsinq.f32 %v1705_v3  ;;  %v1865_v41 = vsel %vm1857_vm13, %v1844_v40, %v1847_v61  ;;  %v1808_v47 = vsel %vm1723_vm12, %v1807_v49, %v1783_v6  ;;  %v1862_v34 = vsel %vm1860_vm0, %v1850_v16, 2102212464 }
 0x1b2   : > { %v1866_v31 = vsel %vm1860_vm0, %v1853_v32, 920167782  ;;  %v1869_v43 = vsel %vm1857_vm13, %v1847_v61, %v1850_v16  ;;  %v3926_v55 = vadd.s32 4294967294, %v1789_v9  ;;  %v1863_v59 = vsel %vm1859_vm15, %v1847_v61, %v1862_v34 }
 0x1b3   : > { %v1867_v42 = vsel %vm1859_vm15, %v1850_v16, %v1866_v31  ;;  %v1870_v30 = vsel %vm1860_vm0, %v1856_v2, 1326507024  ;;  %v1864_v57 = vsel %vm1858_vm14, %v1861_v10, %v1863_v59  ;;  %v3932_v63 = vadd.s32 4294967169, %v1933_v12 }
 0x1b4   : > { %v1868_v52 = vsel %vm1858_vm14, %v1865_v41, %v1867_v42  ;;  %v1871_v13 = vsel %vm1859_vm15, %v1853_v32, %v1870_v30  ;;  %vm3927_vm1 = vcmp.lt.s32.totalorder %v3926_v55, 0  ;;  %vm5947_vm2 = vcmp.le.f32.partialorder %v1721_v7, 0.7853982 }
 0x1b5   : > { %v1872_v6 = vsel %vm1858_vm14, %v1869_v43, %v1871_v13  ;;  %v5941_v48 = vmul.u32.u64.low %v5916_v44, %v1868_v52  ;;  %v5942_v51 = vmul.u32.u64.high %v5916_v44, %v1868_v52, %v5941_v48  ;;  %v1792_v36 = vsel %vm3927_vm1, 0, %v3926_v55 }
 0x1b6   : > { %v5952_v56 = vmul.u32.u64.low %v5916_v44, %v1872_v6  ;;  %v5953_v45 = vmul.u32.u64.high %v5916_v44, %v1872_v6, %v5952_v56  ;;  %v1793_v58 = vsub.s32 32, %v1792_v36  ;;  %v1794_v4 = vshll.u32 %v5912_v14, %v1792_v36 }
 0x1b7   : > { %v1797_v1 = vsub.s32 4294967266, %v1792_v36  ;;  %v1810_v11 = vsel %vm5947_vm2, 0, %v1808_v47  ;;  %v1880_v33 = vmul.u32 %v5916_v44, %v1864_v57  ;;  %v1939_v35 = vadd.s32 1, %v3932_v63 }
 0x1b8   : > { %v1711_v7 = vand.u32 3, %v5895_v28  ;;  %v1795_v49 = vshrl.u32 %v5899_v8, %v1793_v58  ;;  %v1883_v17 = vadd.s32 1, %v5942_v51  ;;  %v1814_v0 = vadd.s32 3, %v1810_v11 }
 0x1b9   : > { %v1798_v15 = vadd.s32 127, %v1797_v1  ;;  %vm1882_vm3 = vc.u32 %v5953_v45, %v5941_v48  ;;  %v1929_v14 = vand.u32 2147483647, %v4755_v22  ;;  %vm1940_vm4 = vcmp.gt.s32.totalorder %v1939_v35, 0 }
 0x1ba   : > { %v1796_v40 = vor.u32 %v1795_v49, %v1794_v4  ;;  %v1884_v39 = vsel %vm1882_vm3, %v1883_v17, %v5942_v51  ;;  %v1941_v44 = vsel %vm1940_vm4, %v1939_v35, 0  ;;  %vm1709_vm5 = vweird.f32 %v4746_v18 }
 0x1bb   : > { %v1799_v61 = vshll.u32 %v1798_v15, 23  ;;  %v1885_v28 = vadd.s32 %v1884_v39, %v1880_v33  ;;  %v1943_v53 = vand.u32 31, %v1941_v44  ;;  %vm1712_vm6 = vcmp.lt.s32.totalorder %v1711_v7, 2 }
 0x1bc   : > { %vm1716_vm7 = vcmp.eq.s32.totalorder %v1711_v7, 2  ;;  %v1803_v32 = vcvt.s32.f32 %v1796_v40  ;;  %vm1713_vm8 = vcmp.eq.s32.totalorder %v1711_v7, 0  ;;  %v5967_v41 = vand.u32 3, %v1814_v0 }
 0x1bd   : > { %v4261_v8 = vpop.eup %4260  ;;  %v1800_v16 = vor.u32 4788187, %v1799_v61  ;;  %v1886_v2 = vadd.s32 536870912, %v1885_v28  ;;  %v1944_v12 = vsub.s32 32, %v1943_v53  ;;  %v1936_v47 = vand.u32 8388607, %v1929_v14 }
 0x1be   : > { %v4263_v3 = vpop.eup %4262  ;;  %v1717_v19 = vxor.u32 2147483648, %v4261_v8  ;;  %v1946_v43 = vshll.u32 %v7343_v60, %v1943_v53  ;;  %v1949_v55 = vshll.u32 %v7335_v37, %v1943_v53  ;;  %v1952_v57 = vshll.u32 %v7336_v54, %v1943_v53 }
 0x1bf   : > { %v1714_v9 = vxor.u32 2147483648, %v4263_v3  ;;  %v1801_v10 = vand.u32 2147483647, %v1800_v16  ;;  %v5971_v31 = vshrl.u32 %v1886_v2, 30  ;;  %v1947_v30 = vshrl.u32 %v7335_v37, %v1944_v12 }
 0x1c0   : > { %v1718_v34 = vsel %vm1716_vm7, %v1717_v19, %v4263_v3  ;;  %v1950_v63 = vshrl.u32 %v7336_v54, %v1944_v12  ;;  %v1953_v6 = vshrl.u32 %v7337_v38, %v1944_v12  ;;  %v1937_v56 = vor.u32 8388608, %v1936_v47 }
 0x1c1   : > { %v1715_v59 = vsel %vm1713_vm8, %v4261_v8, %v1714_v9  ;;  %v1804_v42 = vmul.f32 %v1803_v32, %v1801_v10  ;;  %v1888_v13 = vshll.u32 %v5971_v31, 30  ;;  %v1942_v58 = vshrl.u32 %v1941_v44, 5 }
 0x1c2   : > { %v1719_v52 = vsel %vm1712_vm6, %v1715_v59, %v1718_v34  ;;  %v1945_v1 = vshrl.u32 %v7343_v60, %v1944_v12  ;;  %v1955_v11 = vshll.u32 %v7337_v38, %v1943_v53  ;;  %v1956_v33 = vshrl.u32 %v7338_v46, %v1944_v12 }
 0x1c3   : > { %v1720_v51 = vsel %vm1709_vm5, nan, %v1719_v52  ;;  %v1805_v36 = vxor.u32 2147483648, %v1804_v42  ;;  %v5983_v4 = vsub.s32 %v1885_v28, %v1888_v13  ;;  %v1948_v7 = vor.u32 %v1947_v30, %v1946_v43 }
 0x1c4   : > { %3709 = vst [vmem:[%s5096_s11 + $0x60] sm:$0xff] %v1720_v51  ;;  %v1958_v49 = vshll.u32 %v7338_v46, %v1943_v53  ;;  %v1959_v18 = vshrl.u32 %v7339_v5, %v1944_v12  ;;  %v1951_v0 = vor.u32 %v1950_v63, %v1949_v55  ;;  %v1954_v40 = vor.u32 %v1953_v6, %v1952_v57 }
 0x1c5   : > { %v1806_v35 = vsel %vm1723_vm12, %v1805_v36, %v1804_v42  ;;  %v1891_v17 = vsub.s32 0, %v5983_v4  ;;  %v1957_v61 = vor.u32 %v1956_v33, %v1955_v11  ;;  %vm1961_vm9 = vcmp.lt.s32.totalorder %v1942_v58, 1 }
 0x1c6   : > { %v1809_v15 = vsel %vm5947_vm2, %v4749_v20, %v1806_v35  ;;  %v1960_v39 = vor.u32 %v1959_v18, %v1958_v49  ;;  %v1977_v28 = vshll.u32 %v1937_v56, 8  ;;  %v2033_v53 = vand.u32 2147483647, %v4758_v23 }
 0x1c7   : > { %4264 = vcosq.f32 %v1809_v15  ;;  %v3929_v44 = vmin.u32 %v1891_v17, %v5983_v4  ;;  %v1881_v8 = vadd.s32 %v5941_v48, %v5953_v45  ;;  %vm1963_vm10 = vcmp.lt.s32.totalorder %v1942_v58, 3 }
 0x1c8   : > { %4266 = vsinq.f32 %v1809_v15  ;;  %vm1964_vm11 = vcmp.lt.s32.totalorder %v1942_v58, 4  ;;  %v2036_v62 = vand.u32 2139095040, %v4758_v23  ;;  %vm1962_vm12 = vcmp.lt.s32.totalorder %v1942_v58, 2 }
 0x1c9   : > { %v1893_v16 = vclz %v3929_v44  ;;  %v1969_v32 = vsel %vm1961_vm9, %v1948_v7, %v1951_v0  ;;  %v1973_v3 = vsel %vm1961_vm9, %v1951_v0, %v1954_v40  ;;  %v1965_v19 = vsel %vm1961_vm9, %v1945_v1, %v1948_v7 }
 0x1ca   : > { %v1966_v2 = vsel %vm1964_vm11, %v1954_v40, 2102212464  ;;  %v1970_v12 = vsel %vm1964_vm11, %v1957_v61, 920167782  ;;  %v1974_v9 = vsel %vm1964_vm11, %v1960_v39, 1326507024  ;;  %vm1813_vm14 = vweird.f32 %v4749_v20 }
 0x1cb   : > { %v3930_v10 = vadd.s32 4294967294, %v1893_v16  ;;  %v1967_v47 = vsel %vm1963_vm10, %v1951_v0, %v1966_v2  ;;  %v1971_v34 = vsel %vm1963_vm10, %v1954_v40, %v1970_v12  ;;  %v1975_v43 = vsel %vm1963_vm10, %v1957_v61, %v1974_v9 }
 0x1cc   : > { %v1911_v55 = vsub.s32 4, %v5971_v31  ;;  %v1972_v48 = vsel %vm1962_vm12, %v1969_v32, %v1971_v34  ;;  %v1976_v45 = vsel %vm1962_vm12, %v1973_v3, %v1975_v43  ;;  %v2037_v59 = vshrl.u32 %v2036_v62, 23 }
 0x1cd   : > { %vm3931_vm13 = vcmp.lt.s32.totalorder %v3930_v10, 0  ;;  %v1968_v42 = vsel %vm1962_vm12, %v1965_v19, %v1967_v47  ;;  %v6006_v30 = vmul.u32.u64.low %v1977_v28, %v1976_v45  ;;  %v6007_v57 = vmul.u32.u64.high %v1977_v28, %v1976_v45, %v6006_v30 }
 0x1ce   : > { %v1896_v52 = vsel %vm3931_vm13, 0, %v3930_v10  ;;  %v6010_v13 = vmul.u32.u64.low %v1977_v28, %v1972_v48  ;;  %v6011_v63 = vmul.u32.u64.high %v1977_v28, %v1972_v48, %v6010_v13  ;;  %v3936_v6 = vadd.s32 4294967169, %v2037_v59 }
 0x1cf   : > { %vm1827_vm15 = vcmp.lt.s32.totalorder %v4752_v21, 0  ;;  %v1897_v51 = vsub.s32 32, %v1896_v52  ;;  %v1898_v36 = vshll.u32 %v5983_v4, %v1896_v52  ;;  %v1901_v56 = vsub.s32 4294967266, %v1896_v52 }
 0x1d0   : > { %vm1816_vm0 = vcmp.lt.s32.totalorder %v5967_v41, 2  ;;  %vm6019_vm1 = vcmp.le.f32.partialorder %v1825_v50, 0.7853982  ;;  %v6026_v1 = vsel %vm1827_vm15, %v1911_v55, %v5971_v31  ;;  %v2043_v11 = vadd.s32 1, %v3936_v6 }
 0x1d1   : > { %v1899_v33 = vshrl.u32 %v1881_v8, %v1897_v51  ;;  %v1902_v35 = vadd.s32 127, %v1901_v56  ;;  %v1984_v7 = vmul.u32 %v1977_v28, %v1968_v42  ;;  %vm1986_vm2 = vc.u32 %v6007_v57, %v6010_v13 }
 0x1d2   : > { %vm1817_vm3 = vcmp.eq.s32.totalorder %v5967_v41, 0  ;;  %v1987_v4 = vadd.s32 1, %v6011_v63  ;;  %v2040_v50 = vand.u32 8388607, %v2033_v53  ;;  %vm2044_vm4 = vcmp.gt.s32.totalorder %v2043_v11, 0 }
 0x1d3   : > { %vm1820_vm5 = vcmp.eq.s32.totalorder %v5967_v41, 2  ;;  %v1900_v31 = vor.u32 %v1899_v33, %v1898_v36  ;;  %v1903_v18 = vshll.u32 %v1902_v35, 23  ;;  %v2045_v15 = vsel %vm2044_vm4, %v2043_v11, 0 }
 0x1d4   : > { %v4265_v49 = vpop.eup %4264  ;;  %v1914_v40 = vsel %vm6019_vm1, 0, %v6026_v1  ;;  %v1988_v61 = vsel %vm1986_vm2, %v1987_v4, %v6011_v63  ;;  %v2047_v39 = vand.u32 31, %v2045_v15  ;;  %v2041_v32 = vor.u32 8388608, %v2040_v50 }
 0x1d5   : > { %v4267_v17 = vpop.eup %4266  ;;  %v1821_v0 = vxor.u32 2147483648, %v4265_v49  ;;  %v1904_v28 = vor.u32 4788187, %v1903_v18  ;;  %v1907_v8 = vcvt.s32.f32 %v1900_v31  ;;  %v1989_v62 = vadd.s32 %v1988_v61, %v1984_v7 }
 0x1d6   : > { %v1818_v44 = vxor.u32 2147483648, %v4267_v17  ;;  %v2048_v3 = vsub.s32 32, %v2047_v39  ;;  %v2140_v19 = vand.u32 2139095040, %v4761_v24  ;;  %v2046_v10 = vshrl.u32 %v2045_v15, 5 }
 0x1d7   : > { %v1822_v16 = vsel %vm1820_vm5, %v1821_v0, %v4267_v17  ;;  %v1905_v12 = vand.u32 2147483647, %v1904_v28  ;;  %v1990_v9 = vadd.s32 536870912, %v1989_v62  ;;  %v2050_v34 = vshll.u32 %v7343_v60, %v2047_v39 }
 0x1d8   : > { %v1819_v2 = vsel %vm1817_vm3, %v4265_v49, %v1818_v44  ;;  %v2051_v43 = vshrl.u32 %v7335_v37, %v2048_v3  ;;  %v2053_v55 = vshll.u32 %v7335_v37, %v2047_v39  ;;  %v2054_v42 = vshrl.u32 %v7336_v54, %v2048_v3 }
 0x1d9   : > { %v1823_v47 = vsel %vm1816_vm0, %v1819_v2, %v1822_v16  ;;  %v1908_v45 = vmul.f32 %v1907_v8, %v1905_v12  ;;  %v6049_v59 = vshrl.u32 %v1990_v9, 30  ;;  %v2056_v30 = vshll.u32 %v7336_v54, %v2047_v39 }
 0x1da   : > { %v1824_v48 = vsel %vm1813_vm14, nan, %v1823_v47  ;;  %v2057_v52 = vshrl.u32 %v7337_v38, %v2048_v3  ;;  %v2059_v41 = vshll.u32 %v7337_v38, %v2047_v39  ;;  %v2060_v63 = vshrl.u32 %v7338_v46, %v2048_v3 }
 0x1db   : > { %3710 = vst [vmem:[%s5096_s11 + $0x68] sm:$0xff] %v1824_v48  ;;  %v1909_v6 = vxor.u32 2147483648, %v1908_v45  ;;  %v1992_v51 = vshll.u32 %v6049_v59, 30  ;;  %v6058_v36 = vshll.u32 %v2041_v32, 8  ;;  %v2141_v20 = vshrl.u32 %v2140_v19, 23 }
 0x1dc   : > { %v2049_v56 = vshrl.u32 %v7343_v60, %v2048_v3  ;;  %v2052_v1 = vor.u32 %v2051_v43, %v2050_v34  ;;  %v2062_v11 = vshll.u32 %v7338_v46, %v2047_v39  ;;  %v2063_v33 = vshrl.u32 %v7339_v5, %v2048_v3 }
 0x1dd   : > { %v1910_v35 = vsel %vm1827_vm15, %v1909_v6, %v1908_v45  ;;  %v6065_v7 = vsub.s32 %v1989_v62, %v1992_v51  ;;  %v2055_v4 = vor.u32 %v2054_v42, %v2053_v55  ;;  %v2061_v50 = vor.u32 %v2060_v63, %v2059_v41 }
 0x1de   : > { %v1913_v49 = vsel %vm6019_vm1, %v4752_v21, %v1910_v35  ;;  %v2058_v31 = vor.u32 %v2057_v52, %v2056_v30  ;;  %v2064_v18 = vor.u32 %v2063_v33, %v2062_v11  ;;  %vm2065_vm6 = vcmp.lt.s32.totalorder %v2046_v10, 1 }
 0x1df   : > { %4268 = vcosq.f32 %v1913_v49  ;;  %v1995_v15 = vsub.s32 0, %v6065_v7  ;;  %vm2067_vm7 = vcmp.lt.s32.totalorder %v2046_v10, 3  ;;  %vm2068_vm8 = vcmp.lt.s32.totalorder %v2046_v10, 4 }
 0x1e0   : > { %4270 = vsinq.f32 %v1913_v49  ;;  %vm2066_vm9 = vcmp.lt.s32.totalorder %v2046_v10, 2  ;;  %v2069_v17 = vsel %vm2065_vm6, %v2049_v56, %v2052_v1  ;;  %v2070_v0 = vsel %vm2068_vm8, %v2058_v31, 2102212464 }
 0x1e1   : > { %v3933_v61 = vmin.u32 %v1995_v15, %v6065_v7  ;;  %v2071_v39 = vsel %vm2067_vm7, %v2055_v4, %v2070_v0  ;;  %v2073_v44 = vsel %vm2065_vm6, %v2052_v1, %v2055_v4  ;;  %v2074_v28 = vsel %vm2068_vm8, %v2061_v50, 920167782 }
 0x1e2   : > { %v2075_v58 = vsel %vm2067_vm7, %v2058_v31, %v2074_v28  ;;  %v2077_v8 = vsel %vm2065_vm6, %v2055_v4, %v2058_v31  ;;  %v2078_v62 = vsel %vm2068_vm8, %v2064_v18, 1326507024  ;;  %v1918_v16 = vadd.s32 3, %v1914_v40 }
 0x1e3   : > { %v1997_v32 = vclz %v3933_v61  ;;  %v2137_v3 = vand.u32 2147483647, %v4761_v24  ;;  %v2072_v19 = vsel %vm2066_vm9, %v2069_v17, %v2071_v39  ;;  %v2076_v2 = vsel %vm2066_vm9, %v2073_v44, %v2075_v58 }
 0x1e4   : > { %v2079_v12 = vsel %vm2067_vm7, %v2061_v50, %v2078_v62  ;;  %v3940_v9 = vadd.s32 4294967169, %v2141_v20  ;;  %v6080_v43 = vmul.u32.u64.low %v6058_v36, %v2076_v2  ;;  %v6081_v55 = vmul.u32.u64.high %v6058_v36, %v2076_v2, %v6080_v43 }
 0x1e5   : > { %v3934_v47 = vadd.s32 4294967294, %v1997_v32  ;;  %v2080_v34 = vsel %vm2066_vm9, %v2077_v8, %v2079_v12  ;;  %v2015_v40 = vsub.s32 4, %v6049_v59  ;;  %vm1917_vm10 = vweird.f32 %v4752_v21 }
 0x1e6   : > { %v6086_v48 = vmul.u32.u64.low %v6058_v36, %v2080_v34  ;;  %v6087_v45 = vmul.u32.u64.high %v6058_v36, %v2080_v34, %v6086_v48  ;;  %v2147_v42 = vadd.s32 1, %v3940_v9  ;;  %v1919_v30 = vand.u32 3, %v1918_v16 }
 0x1e7   : > { %vm1931_vm11 = vcmp.lt.s32.totalorder %v4755_v22, 0  ;;  %v1985_v10 = vadd.s32 %v6010_v13, %v6007_v57  ;;  %vm3935_vm12 = vcmp.lt.s32.totalorder %v3934_v47, 0  ;;  %vm6095_vm13 = vcmp.le.f32.partialorder %v1929_v14, 0.7853982 }
 0x1e8   : > { %v2000_v41 = vsel %vm3935_vm12, 0, %v3934_v47  ;;  %v2088_v63 = vmul.u32 %v6058_v36, %v2072_v19  ;;  %vm2148_vm14 = vcmp.gt.s32.totalorder %v2147_v42, 0  ;;  %v2091_v56 = vadd.s32 1, %v6081_v55 }
 0x1e9   : > { %v2001_v6 = vsub.s32 32, %v2000_v41  ;;  %v2002_v51 = vshll.u32 %v6065_v7, %v2000_v41  ;;  %v2005_v20 = vsub.s32 4294967266, %v2000_v41  ;;  %v6105_v57 = vsel %vm1931_vm11, %v2015_v40, %v6049_v59 }
 0x1ea   : > { %vm2090_vm15 = vc.u32 %v6087_v45, %v6080_v43  ;;  %v2144_v14 = vand.u32 8388607, %v2137_v3  ;;  %v2149_v13 = vsel %vm2148_vm14, %v2147_v42, 0  ;;  %vm1920_vm0 = vcmp.lt.s32.totalorder %v1919_v30, 2 }
 0x1eb   : > { %v2003_v36 = vshrl.u32 %v1985_v10, %v2001_v6  ;;  %v2006_v1 = vadd.s32 127, %v2005_v20  ;;  %v2092_v11 = vsel %vm2090_vm15, %v2091_v56, %v6081_v55  ;;  %vm1921_vm1 = vcmp.eq.s32.totalorder %v1919_v30, 0 }
 0x1ec   : > { %v4269_v33 = vpop.eup %4268  ;;  %vm1924_vm2 = vcmp.eq.s32.totalorder %v1919_v30, 2  ;;  %v2093_v35 = vadd.s32 %v2092_v11, %v2088_v63  ;;  %v2151_v7 = vand.u32 31, %v2149_v13  ;;  %v2018_v31 = vsel %vm6095_vm13, 0, %v6105_v57 }
 0x1ed   : > { %v4271_v4 = vpop.eup %4270  ;;  %v1925_v59 = vxor.u32 2147483648, %v4269_v33  ;;  %v2004_v50 = vor.u32 %v2003_v36, %v2002_v51  ;;  %v2007_v49 = vshll.u32 %v2006_v1, 23  ;;  %v2145_v17 = vor.u32 8388608, %v2144_v14 }
 0x1ee   : > { %v1922_v18 = vxor.u32 2147483648, %v4271_v4  ;;  %v2094_v15 = vadd.s32 536870912, %v2093_v35  ;;  %v2152_v0 = vsub.s32 32, %v2151_v7  ;;  %v6115_v28 = vshrl.u32 %v2149_v13, 5 }
 0x1ef   : > { %v1926_v61 = vsel %vm1924_vm2, %v1925_v59, %v4271_v4  ;;  %v2008_v39 = vor.u32 4788187, %v2007_v49  ;;  %v2011_v44 = vcvt.s32.f32 %v2004_v50  ;;  %v2154_v62 = vshll.u32 %v7343_v60, %v2151_v7 }
 0x1f0   : > { %v1923_v58 = vsel %vm1921_vm1, %v4269_v33, %v1922_v18  ;;  %v2095_v8 = vshrl.u32 %v2094_v15, 30  ;;  %v2157_v16 = vshll.u32 %v7335_v37, %v2151_v7  ;;  %v2155_v2 = vshrl.u32 %v7335_v37, %v2152_v0 }
 0x1f1   : > { %v1927_v32 = vsel %vm1920_vm0, %v1923_v58, %v1926_v61  ;;  %v2009_v19 = vand.u32 2147483647, %v2008_v39  ;;  %v2158_v12 = vshrl.u32 %v7336_v54, %v2152_v0  ;;  %v6125_v34 = vshll.u32 %v2145_v17, 8 }
 0x1f2   : > { %v1928_v9 = vsel %vm1917_vm10, nan, %v1927_v32  ;;  %v2096_v47 = vshll.u32 %v2095_v8, 30  ;;  %v2244_v55 = vand.u32 2139095040, %v4764_v25  ;;  %v2160_v48 = vshll.u32 %v7336_v54, %v2151_v7 }
 0x1f3   : > { %v2012_v40 = vmul.f32 %v2011_v44, %v2009_v19  ;;  %v2161_v42 = vshrl.u32 %v7337_v38, %v2152_v0  ;;  %v2163_v30 = vshll.u32 %v7337_v38, %v2151_v7  ;;  %3711 = vst [vmem:[%s5096_s11 + $0x70] sm:$0xff] %v1928_v9  ;;  %vm2035_vm3 = vcmp.lt.s32.totalorder %v4758_v23, 0 }
 0x1f4   : > { %v6133_v10 = vsub.s32 %v2093_v35, %v2096_v47  ;;  %v2164_v21 = vshrl.u32 %v7338_v46, %v2152_v0  ;;  %v2166_v41 = vshll.u32 %v7338_v46, %v2151_v7  ;;  %vm2169_vm4 = vcmp.lt.s32.totalorder %v6115_v28, 1 }
 0x1f5   : > { %v2013_v63 = vxor.u32 2147483648, %v2012_v40  ;;  %v2156_v6 = vor.u32 %v2155_v2, %v2154_v62  ;;  %v2159_v51 = vor.u32 %v2158_v12, %v2157_v16  ;;  %v2167_v20 = vshrl.u32 %v7339_v5, %v2152_v0 }
 0x1f6   : > { %v2099_v56 = vsub.s32 0, %v6133_v10  ;;  %v2119_v57 = vsub.s32 4, %v2095_v8  ;;  %v2153_v14 = vshrl.u32 %v7343_v60, %v2152_v0  ;;  %v2165_v13 = vor.u32 %v2164_v21, %v2163_v30 }
 0x1f7   : > { %v2014_v36 = vsel %vm1931_vm11, %v2013_v63, %v2012_v40  ;;  %vm6145_vm5 = vcmp.le.f32.partialorder %v2033_v53, 0.7853982  ;;  %v2162_v11 = vor.u32 %v2161_v42, %v2160_v48  ;;  %vm2170_vm6 = vcmp.lt.s32.totalorder %v6115_v28, 2 }
 0x1f8   : > { %vm2172_vm7 = vcmp.lt.s32.totalorder %v6115_v28, 4  ;;  %v2017_v33 = vsel %vm6095_vm13, %v4755_v22, %v2014_v36  ;;  %v3937_v35 = vmin.u32 %v2099_v56, %v6133_v10  ;;  %v2168_v7 = vor.u32 %v2167_v20, %v2166_v41 }
 0x1f9   : > { %vm2171_vm8 = vcmp.lt.s32.totalorder %v6115_v28, 3  ;;  %4272 = vcosq.f32 %v2017_v33  ;;  %v2174_v53 = vsel %vm2172_vm7, %v2162_v11, 2102212464  ;;  %v2177_v4 = vsel %vm2169_vm4, %v2156_v6, %v2159_v51 }
 0x1fa   : > { %v2178_v59 = vsel %vm2172_vm7, %v2165_v13, 920167782  ;;  %4274 = vsinq.f32 %v2017_v33  ;;  %v2022_v50 = vadd.s32 3, %v2018_v31  ;;  %v2101_v49 = vclz %v3937_v35 }
 0x1fb   : > { %v2245_v52 = vshrl.u32 %v2244_v55, 23  ;;  %v2173_v18 = vsel %vm2169_vm4, %v2153_v14, %v2156_v6  ;;  %v2175_v15 = vsel %vm2171_vm8, %v2159_v51, %v2174_v53  ;;  %v2179_v17 = vsel %vm2171_vm8, %v2162_v11, %v2178_v59 }
 0x1fc   : > { %v2181_v0 = vsel %vm2169_vm4, %v2159_v51, %v2162_v11  ;;  %v2089_v61 = vadd.s32 %v6080_v43, %v6087_v45  ;;  %v3938_v39 = vadd.s32 4294967294, %v2101_v49  ;;  %v2180_v31 = vsel %vm2170_vm6, %v2177_v4, %v2179_v17 }
 0x1fd   : > { %v2182_v44 = vsel %vm2172_vm7, %v2168_v7, 1326507024  ;;  %v2120_v58 = vsel %vm2035_vm3, %v2119_v57, %v2095_v8  ;;  %v6181_v16 = vmul.u32.u64.low %v6125_v34, %v2180_v31  ;;  %v6182_v32 = vmul.u32.u64.high %v6125_v34, %v2180_v31, %v6181_v16 }
 0x1fe   : > { %v2183_v62 = vsel %vm2171_vm8, %v2165_v13, %v2182_v44  ;;  %vm3939_vm9 = vcmp.lt.s32.totalorder %v3938_v39, 0  ;;  %v2176_v43 = vsel %vm2170_vm6, %v2173_v18, %v2175_v15  ;;  %v3944_v19 = vadd.s32 4294967169, %v2245_v52 }
 0x1ff   : > { %v2184_v45 = vsel %vm2170_vm6, %v2181_v0, %v2183_v62  ;;  %v2104_v2 = vsel %vm3939_vm9, 0, %v3938_v39  ;;  %v2241_v9 = vand.u32 2147483647, %v4764_v25  ;;  %v2122_v48 = vsel %vm6145_vm5, 0, %v2120_v58 }
 0x200   : > { %v6190_v12 = vmul.u32.u64.low %v6125_v34, %v2184_v45  ;;  %v6191_v8 = vmul.u32.u64.high %v6125_v34, %v2184_v45, %v6190_v12  ;;  %v2105_v47 = vsub.s32 32, %v2104_v2  ;;  %v2106_v55 = vshll.u32 %v6133_v10, %v2104_v2 }
 0x201   : > { %v2109_v40 = vsub.s32 4294967266, %v2104_v2  ;;  %v2023_v42 = vand.u32 3, %v2022_v50  ;;  %v2192_v30 = vmul.u32 %v6125_v34, %v2176_v43  ;;  %v2195_v28 = vadd.s32 1, %v6182_v32 }
 0x202   : > { %v2251_v21 = vadd.s32 1, %v3944_v19  ;;  %v2107_v41 = vshrl.u32 %v2089_v61, %v2105_v47  ;;  %v2126_v6 = vadd.s32 3, %v2122_v48  ;;  %vm2194_vm10 = vc.u32 %v6191_v8, %v6181_v16 }
 0x203   : > { %v2110_v63 = vadd.s32 127, %v2109_v40  ;;  %v2248_v51 = vand.u32 8388607, %v2241_v9  ;;  %v2196_v56 = vsel %vm2194_vm10, %v2195_v28, %v6182_v32  ;;  %vm2021_vm12 = vweird.f32 %v4755_v22 }
 0x204   : > { %vm2252_vm11 = vcmp.gt.s32.totalorder %v2251_v21, 0  ;;  %v2108_v10 = vor.u32 %v2107_v41, %v2106_v55  ;;  %vm2024_vm13 = vcmp.lt.s32.totalorder %v2023_v42, 2  ;;  %v2197_v34 = vadd.s32 %v2196_v56, %v2192_v30 }
 0x205   : > { %v2111_v20 = vshll.u32 %v2110_v63, 23  ;;  %v2253_v57 = vsel %vm2252_vm11, %v2251_v21, 0  ;;  %vm2025_vm14 = vcmp.eq.s32.totalorder %v2023_v42, 0  ;;  %vm2028_vm15 = vcmp.eq.s32.totalorder %v2023_v42, 2 }
 0x206   : > { %v2255_v14 = vand.u32 31, %v2253_v57  ;;  %v4273_v13 = vpop.eup %4272  ;;  %v2115_v11 = vcvt.s32.f32 %v2108_v10  ;;  %v6205_v7 = vand.u32 3, %v2126_v6  ;;  %v2198_v53 = vadd.s32 536870912, %v2197_v34 }
 0x207   : > { %v2112_v36 = vor.u32 4788187, %v2111_v20  ;;  %v4275_v33 = vpop.eup %4274  ;;  %v2029_v35 = vxor.u32 2147483648, %v4273_v13  ;;  %v2249_v49 = vor.u32 8388608, %v2248_v51  ;;  %v2345_v52 = vand.u32 2147483647, %v4767_v26 }
 0x208   : > { %v2256_v4 = vsub.s32 32, %v2255_v14  ;;  %v2026_v59 = vxor.u32 2147483648, %v4275_v33  ;;  %v6208_v15 = vshrl.u32 %v2198_v53, 30  ;;  %v2258_v17 = vshll.u32 %v7343_v60, %v2255_v14 }
 0x209   : > { %v2113_v50 = vand.u32 2147483647, %v2112_v36  ;;  %v2030_v18 = vsel %vm2028_vm15, %v2029_v35, %v4275_v33  ;;  %v2261_v0 = vshll.u32 %v7335_v37, %v2255_v14  ;;  %v2264_v44 = vshll.u32 %v7336_v54, %v2255_v14 }
 0x20a   : > { %v2027_v61 = vsel %vm2025_vm14, %v4273_v13, %v2026_v59  ;;  %v2259_v31 = vshrl.u32 %v7335_v37, %v2256_v4  ;;  %v2200_v62 = vshll.u32 %v6208_v15, 30  ;;  %v2262_v32 = vshrl.u32 %v7336_v54, %v2256_v4 }
 0x20b   : > { %v2116_v39 = vmul.f32 %v2115_v11, %v2113_v50  ;;  %v2031_v58 = vsel %vm2024_vm13, %v2027_v61, %v2030_v18  ;;  %v2265_v43 = vshrl.u32 %v7337_v38, %v2256_v4  ;;  %v2254_v2 = vshrl.u32 %v2253_v57, 5 }
 0x20c   : > { %v2032_v45 = vsel %vm2021_vm12, nan, %v2031_v58  ;;  %v2348_v12 = vand.u32 2139095040, %v4767_v26  ;;  %v6222_v47 = vsub.s32 %v2197_v34, %v2200_v62  ;;  %v2257_v55 = vshrl.u32 %v7343_v60, %v2256_v4 }
 0x20d   : > { %v2117_v19 = vxor.u32 2147483648, %v2116_v39  ;;  %v2267_v40 = vshll.u32 %v7337_v38, %v2255_v14  ;;  %v2268_v48 = vshrl.u32 %v7338_v46, %v2256_v4  ;;  %3712 = vst [vmem:[%s5096_s11 + $0x78] sm:$0xff] %v2032_v45  ;;  %v2260_v30 = vor.u32 %v2259_v31, %v2258_v17 }
 0x20e   : > { %v2270_v22 = vshll.u32 %v7338_v46, %v2255_v14  ;;  %v2271_v28 = vshrl.u32 %v7339_v5, %v2256_v4  ;;  %v2203_v41 = vsub.s32 0, %v6222_v47  ;;  %v2263_v63 = vor.u32 %v2262_v32, %v2261_v0 }
 0x20f   : > { %v2118_v42 = vsel %vm2035_vm3, %v2117_v19, %v2116_v39  ;;  %v2266_v6 = vor.u32 %v2265_v43, %v2264_v44  ;;  %v2269_v51 = vor.u32 %v2268_v48, %v2267_v40  ;;  %vm2273_vm0 = vcmp.lt.s32.totalorder %v2254_v2, 1 }
 0x210   : > { %v2121_v21 = vsel %vm6145_vm5, %v4758_v23, %v2118_v42  ;;  %v2272_v10 = vor.u32 %v2271_v28, %v2270_v22  ;;  %v2193_v20 = vadd.s32 %v6181_v16, %v6191_v8  ;;  %v3941_v56 = vmin.u32 %v2203_v41, %v6222_v47 }
 0x211   : > { %4276 = vcosq.f32 %v2121_v21  ;;  %v2289_v57 = vshll.u32 %v2249_v49, 8  ;;  %vm2275_vm1 = vcmp.lt.s32.totalorder %v2254_v2, 3  ;;  %vm2276_vm2 = vcmp.lt.s32.totalorder %v2254_v2, 4 }
 0x212   : > { %4278 = vsinq.f32 %v2121_v21  ;;  %v2349_v34 = vshrl.u32 %v2348_v12, 23  ;;  %v2352_v1 = vand.u32 8388607, %v2345_v52  ;;  %v2205_v14 = vclz %v3941_v56 }
 0x213   : > { %vm2274_vm3 = vcmp.lt.s32.totalorder %v2254_v2, 2  ;;  %v2281_v13 = vsel %vm2273_vm0, %v2260_v30, %v2263_v63  ;;  %v2285_v36 = vsel %vm2273_vm0, %v2263_v63, %v2266_v6  ;;  %v2277_v11 = vsel %vm2273_vm0, %v2257_v55, %v2260_v30 }
 0x214   : > { %v2278_v33 = vsel %vm2276_vm2, %v2266_v6, 2102212464  ;;  %v2282_v35 = vsel %vm2276_vm2, %v2269_v51, 920167782  ;;  %v2286_v53 = vsel %vm2276_vm2, %v2272_v10, 1326507024  ;;  %vm2125_vm6 = vweird.f32 %v4758_v23 }
 0x215   : > { %v3942_v4 = vadd.s32 4294967294, %v2205_v14  ;;  %v2279_v59 = vsel %vm2275_vm1, %v2263_v63, %v2278_v33  ;;  %v2283_v16 = vsel %vm2275_vm1, %v2266_v6, %v2282_v35  ;;  %v2287_v8 = vsel %vm2275_vm1, %v2269_v51, %v2286_v53 }
 0x216   : > { %v2223_v50 = vsub.s32 4, %v6208_v15  ;;  %v2284_v49 = vsel %vm2274_vm3, %v2281_v13, %v2283_v16  ;;  %v2288_v18 = vsel %vm2274_vm3, %v2285_v36, %v2287_v8  ;;  %v3948_v17 = vadd.s32 4294967169, %v2349_v34 }
 0x217   : > { %vm3943_vm4 = vcmp.lt.s32.totalorder %v3942_v4, 0  ;;  %v2280_v0 = vsel %vm2274_vm3, %v2277_v11, %v2279_v59  ;;  %v6245_v61 = vmul.u32.u64.low %v2289_v57, %v2288_v18  ;;  %v6246_v39 = vmul.u32.u64.high %v2289_v57, %v2288_v18, %v6245_v61 }
 0x218   : > { %v2208_v31 = vsel %vm3943_vm4, 0, %v3942_v4  ;;  %v6248_v44 = vmul.u32.u64.low %v2289_v57, %v2284_v49  ;;  %v6249_v58 = vmul.u32.u64.high %v2289_v57, %v2284_v49, %v6248_v44  ;;  %v2355_v62 = vadd.s32 1, %v3948_v17 }
 0x219   : > { %vm2139_vm5 = vcmp.lt.s32.totalorder %v4761_v24, 0  ;;  %v2209_v32 = vsub.s32 32, %v2208_v31  ;;  %v2210_v43 = vshll.u32 %v6222_v47, %v2208_v31  ;;  %v2213_v45 = vsub.s32 4294967266, %v2208_v31 }
 0x21a   : > { %vm6257_vm7 = vcmp.le.f32.partialorder %v2137_v3, 0.7853982  ;;  %v6264_v2 = vsel %vm2139_vm5, %v2223_v50, %v6208_v15  ;;  %vm2356_vm8 = vcmp.gt.s32.totalorder %v2355_v62, 0  ;;  %v2296_v40 = vmul.u32 %v2289_v57, %v2280_v0 }
 0x21b   : > { %v2211_v12 = vshrl.u32 %v2193_v20, %v2209_v32  ;;  %v2214_v55 = vadd.s32 127, %v2213_v45  ;;  %vm2298_vm9 = vc.u32 %v6246_v39, %v6248_v44  ;;  %vm2128_vm10 = vcmp.lt.s32.totalorder %v6205_v7, 2 }
 0x21c   : > { %v2299_v47 = vadd.s32 1, %v6249_v58  ;;  %v2353_v3 = vor.u32 8388608, %v2352_v1  ;;  %v2357_v48 = vsel %vm2356_vm8, %v2355_v62, 0  ;;  %vm2132_vm11 = vcmp.eq.s32.totalorder %v6205_v7, 2 }
 0x21d   : > { %v2212_v30 = vor.u32 %v2211_v12, %v2210_v43  ;;  %v2215_v22 = vshll.u32 %v2214_v55, 23  ;;  %v2359_v15 = vand.u32 31, %v2357_v48  ;;  %vm2129_vm12 = vcmp.eq.s32.totalorder %v6205_v7, 0 }
 0x21e   : > { %v4277_v42 = vpop.eup %4276  ;;  %v2226_v41 = vsel %vm6257_vm7, 0, %v6264_v2  ;;  %v2300_v63 = vsel %vm2298_vm9, %v2299_v47, %v6249_v58  ;;  %v6276_v34 = vshll.u32 %v2353_v3, 8  ;;  %v2452_v1 = vand.u32 2139095040, %v4770_v27 }
 0x21f   : > { %v4279_v28 = vpop.eup %4278  ;;  %v2133_v21 = vxor.u32 2147483648, %v4277_v42  ;;  %v2216_v51 = vor.u32 4788187, %v2215_v22  ;;  %v2219_v10 = vcvt.s32.f32 %v2212_v30  ;;  %v2301_v20 = vadd.s32 %v2300_v63, %v2296_v40 }
 0x220   : > { %v2130_v6 = vxor.u32 2147483648, %v4279_v28  ;;  %v2360_v57 = vsub.s32 32, %v2359_v15  ;;  %v2362_v11 = vshll.u32 %v7343_v60, %v2359_v15  ;;  %v2365_v53 = vshll.u32 %v7335_v37, %v2359_v15 }
 0x221   : > { %v2134_v56 = vsel %vm2132_vm11, %v2133_v21, %v4279_v28  ;;  %v2217_v13 = vand.u32 2147483647, %v2216_v51  ;;  %v2302_v36 = vadd.s32 536870912, %v2301_v20  ;;  %v2358_v50 = vshrl.u32 %v2357_v48, 5 }
 0x222   : > { %v2131_v14 = vsel %vm2129_vm12, %v4277_v42, %v2130_v6  ;;  %v2363_v35 = vshrl.u32 %v7335_v37, %v2360_v57  ;;  %v2366_v4 = vshrl.u32 %v7336_v54, %v2360_v57  ;;  %v2368_v49 = vshll.u32 %v7336_v54, %v2359_v15 }
 0x223   : > { %v2135_v33 = vsel %vm2128_vm10, %v2131_v14, %v2134_v56  ;;  %v2220_v16 = vmul.f32 %v2219_v10, %v2217_v13  ;;  %v2303_v8 = vshrl.u32 %v2302_v36, 30  ;;  %v2369_v18 = vshrl.u32 %v7337_v38, %v2360_v57 }
 0x224   : > { %v2136_v59 = vsel %vm2125_vm6, nan, %v2135_v33  ;;  %v2371_v17 = vshll.u32 %v7337_v38, %v2359_v15  ;;  %v2372_v7 = vshrl.u32 %v7338_v46, %v2360_v57  ;;  %v2361_v31 = vshrl.u32 %v7343_v60, %v2360_v57 }
 0x225   : > { %3713 = vst [vmem:[%s5096_s11 + $0x80] sm:$0xff] %v2136_v59  ;;  %v2221_v0 = vxor.u32 2147483648, %v2220_v16  ;;  %v2304_v61 = vshll.u32 %v2303_v8, 30  ;;  %v2453_v58 = vshrl.u32 %v2452_v1, 23  ;;  %v2364_v62 = vor.u32 %v2363_v35, %v2362_v11 }
 0x226   : > { %v2367_v23 = vor.u32 %v2366_v4, %v2365_v53  ;;  %v2374_v32 = vshll.u32 %v7338_v46, %v2359_v15  ;;  %v2375_v43 = vshrl.u32 %v7339_v5, %v2360_v57  ;;  %v2327_v12 = vsub.s32 4, %v2303_v8 }
 0x227   : > { %v2222_v45 = vsel %vm2139_vm5, %v2221_v0, %v2220_v16  ;;  %v6297_v2 = vsub.s32 %v2301_v20, %v2304_v61  ;;  %v2373_v55 = vor.u32 %v2372_v7, %v2371_v17  ;;  %v2370_v47 = vor.u32 %v2369_v18, %v2368_v49 }
 0x228   : > { %v2225_v40 = vsel %vm6257_vm7, %v4761_v24, %v2222_v45  ;;  %v2376_v3 = vor.u32 %v2375_v43, %v2374_v32  ;;  %vm2377_vm13 = vcmp.lt.s32.totalorder %v2358_v50, 1  ;;  %vm2379_vm14 = vcmp.lt.s32.totalorder %v2358_v50, 3 }
 0x229   : > { %4280 = vcosq.f32 %v2225_v40  ;;  %v2307_v48 = vsub.s32 0, %v6297_v2  ;;  %vm2380_vm15 = vcmp.lt.s32.totalorder %v2358_v50, 4  ;;  %vm2378_vm0 = vcmp.lt.s32.totalorder %v2358_v50, 2 }
 0x22a   : > { %4282 = vsinq.f32 %v2225_v40  ;;  %v2381_v42 = vsel %vm2377_vm13, %v2361_v31, %v2364_v62  ;;  %v2382_v30 = vsel %vm2380_vm15, %v2370_v47, 2102212464  ;;  %v2385_v28 = vsel %vm2377_vm13, %v2364_v62, %v2367_v23 }
 0x22b   : > { %v3945_v22 = vmin.u32 %v2307_v48, %v6297_v2  ;;  %v2383_v15 = vsel %vm2379_vm14, %v2367_v23, %v2382_v30  ;;  %v2386_v21 = vsel %vm2380_vm15, %v2373_v55, 920167782  ;;  %v2389_v63 = vsel %vm2377_vm13, %v2367_v23, %v2370_v47 }
 0x22c   : > { %v2387_v19 = vsel %vm2379_vm14, %v2370_v47, %v2386_v21  ;;  %v2390_v6 = vsel %vm2380_vm15, %v2376_v3, 1326507024  ;;  %v3952_v51 = vadd.s32 4294967169, %v2453_v58  ;;  %v2230_v10 = vadd.s32 3, %v2226_v41 }
 0x22d   : > { %vm2243_vm1 = vcmp.lt.s32.totalorder %v4764_v25, 0  ;;  %v2309_v20 = vclz %v3945_v22  ;;  %v2384_v57 = vsel %vm2378_vm0, %v2381_v42, %v2383_v15  ;;  %v2388_v1 = vsel %vm2378_vm0, %v2385_v28, %v2387_v19 }
 0x22e   : > { %v2328_v56 = vsel %vm2243_vm1, %v2327_v12, %v2303_v8  ;;  %v2391_v14 = vsel %vm2379_vm14, %v2373_v55, %v2390_v6  ;;  %v6314_v11 = vmul.u32.u64.low %v6276_v34, %v2388_v1  ;;  %v6315_v33 = vmul.u32.u64.high %v6276_v34, %v2388_v1, %v6314_v11 }
 0x22f   : > { %v3946_v13 = vadd.s32 4294967294, %v2309_v20  ;;  %v2392_v36 = vsel %vm2378_vm0, %v2389_v63, %v2391_v14  ;;  %v2449_v53 = vand.u32 2147483647, %v4770_v27  ;;  %v2459_v4 = vadd.s32 1, %v3952_v51 }
 0x230   : > { %v6319_v41 = vmul.u32.u64.low %v6276_v34, %v2392_v36  ;;  %v6320_v35 = vmul.u32.u64.high %v6276_v34, %v2392_v36, %v6319_v41  ;;  %v2231_v59 = vand.u32 3, %v2230_v10  ;;  %vm6325_vm2 = vcmp.le.f32.partialorder %v2241_v9, 0.7853982 }
 0x231   : > { %v2297_v8 = vadd.s32 %v6248_v44, %v6246_v39  ;;  %vm3947_vm3 = vcmp.lt.s32.totalorder %v3946_v13, 0  ;;  %v2330_v49 = vsel %vm6325_vm2, 0, %v2328_v56  ;;  %v2400_v18 = vmul.u32 %v6276_v34, %v2384_v57 }
 0x232   : > { %v2312_v50 = vsel %vm3947_vm3, 0, %v3946_v13  ;;  %vm2460_vm4 = vcmp.gt.s32.totalorder %v2459_v4, 0  ;;  %v2403_v9 = vadd.s32 1, %v6315_v33  ;;  %vm2229_vm5 = vweird.f32 %v4761_v24 }
 0x233   : > { %v2313_v17 = vsub.s32 32, %v2312_v50  ;;  %v2314_v7 = vshll.u32 %v6297_v2, %v2312_v50  ;;  %v2317_v0 = vsub.s32 4294967266, %v2312_v50  ;;  %vm2402_vm6 = vc.u32 %v6320_v35, %v6314_v11 }
 0x234   : > { %v2456_v39 = vand.u32 8388607, %v2449_v53  ;;  %v2461_v44 = vsel %vm2460_vm4, %v2459_v4, 0  ;;  %v2334_v58 = vadd.s32 3, %v2330_v49  ;;  %v2404_v34 = vsel %vm2402_vm6, %v2403_v9, %v6315_v33 }
 0x235   : > { %v2315_v61 = vshrl.u32 %v2297_v8, %v2313_v17  ;;  %v2318_v31 = vadd.s32 127, %v2317_v0  ;;  %vm2232_vm7 = vcmp.lt.s32.totalorder %v2231_v59, 2  ;;  %vm2236_vm8 = vcmp.eq.s32.totalorder %v2231_v59, 2 }
 0x236   : > { %v4281_v62 = vpop.eup %4280  ;;  %v2405_v23 = vadd.s32 %v2404_v34, %v2400_v18  ;;  %v2463_v32 = vand.u32 31, %v2461_v44  ;;  %vm2233_vm9 = vcmp.eq.s32.totalorder %v2231_v59, 0  ;;  %v2457_v47 = vor.u32 8388608, %v2456_v39 }
 0x237   : > { %v4283_v43 = vpop.eup %4282  ;;  %v2237_v45 = vxor.u32 2147483648, %v4281_v62  ;;  %v2316_v2 = vor.u32 %v2315_v61, %v2314_v7  ;;  %v2319_v12 = vshll.u32 %v2318_v31, 23  ;;  %v6342_v22 = vand.u32 3, %v2334_v58 }
 0x238   : > { %v2234_v55 = vxor.u32 2147483648, %v4283_v43  ;;  %v2406_v40 = vadd.s32 536870912, %v2405_v23  ;;  %v2464_v3 = vsub.s32 32, %v2463_v32  ;;  %v2466_v21 = vshll.u32 %v7343_v60, %v2463_v32 }
 0x239   : > { %v2238_v48 = vsel %vm2236_vm8, %v2237_v45, %v4283_v43  ;;  %v2320_v42 = vor.u32 4788187, %v2319_v12  ;;  %v2323_v30 = vcvt.s32.f32 %v2316_v2  ;;  %v2469_v19 = vshll.u32 %v7335_v37, %v2463_v32 }
 0x23a   : > { %v2235_v15 = vsel %vm2233_vm9, %v4281_v62, %v2234_v55  ;;  %v2407_v28 = vshrl.u32 %v2406_v40, 30  ;;  %v2467_v51 = vshrl.u32 %v7335_v37, %v2464_v3  ;;  %v2470_v10 = vshrl.u32 %v7336_v54, %v2464_v3 }
 0x23b   : > { %v2239_v63 = vsel %vm2232_vm7, %v2235_v15, %v2238_v48  ;;  %v2321_v6 = vand.u32 2147483647, %v2320_v42  ;;  %v2462_v57 = vshrl.u32 %v2461_v44, 5  ;;  %v6351_v1 = vshll.u32 %v2457_v47, 8 }
 0x23c   : > { %v2240_v20 = vsel %vm2229_vm5, nan, %v2239_v63  ;;  %v2408_v56 = vshll.u32 %v2407_v28, 30  ;;  %v2472_v13 = vshll.u32 %v7336_v54, %v2463_v32  ;;  %v2473_v36 = vshrl.u32 %v7337_v38, %v2464_v3 }
 0x23d   : > { %v2324_v14 = vmul.f32 %v2323_v30, %v2321_v6  ;;  %v2475_v33 = vshll.u32 %v7337_v38, %v2463_v32  ;;  %3714 = vst [vmem:[%s5096_s11 + $0x88] sm:$0xff] %v2240_v20  ;;  %v2476_v4 = vshrl.u32 %v7338_v46, %v2464_v3  ;;  %v2478_v59 = vshll.u32 %v7338_v46, %v2463_v32 }
 0x23e   : > { %v6357_v41 = vsub.s32 %v2405_v23, %v2408_v56  ;;  %v2556_v24 = vand.u32 2139095040, %v4773_v29  ;;  %v2468_v50 = vor.u32 %v2467_v51, %v2466_v21  ;;  %v2471_v49 = vor.u32 %v2470_v10, %v2469_v19 }
 0x23f   : > { %v2325_v8 = vxor.u32 2147483648, %v2324_v14  ;;  %v2479_v18 = vshrl.u32 %v7339_v5, %v2464_v3  ;;  %vm2347_vm10 = vcmp.lt.s32.totalorder %v4767_v26, 0  ;;  %v2465_v7 = vshrl.u32 %v7343_v60, %v2464_v3 }
 0x240   : > { %v2411_v17 = vsub.s32 0, %v6357_v41  ;;  %v2477_v0 = vor.u32 %v2476_v4, %v2475_v33  ;;  %vm2481_vm11 = vcmp.lt.s32.totalorder %v2462_v57, 1  ;;  %v2474_v39 = vor.u32 %v2473_v36, %v2472_v13 }
 0x241   : > { %v2326_v9 = vsel %vm2243_vm1, %v2325_v8, %v2324_v14  ;;  %vm2482_vm12 = vcmp.lt.s32.totalorder %v2462_v57, 2  ;;  %vm2484_vm13 = vcmp.lt.s32.totalorder %v2462_v57, 4  ;;  %v2480_v31 = vor.u32 %v2479_v18, %v2478_v59  ;;  %v7386_v8 = vld [vmem:[#allocation11_spill] sm:$0xff] }
 0x242   : > { %v2329_v44 = vsel %vm6325_vm2, %v4764_v25, %v2326_v9  ;;  %v3949_v61 = vmin.u32 %v2411_v17, %v6357_v41  ;;  %vm2483_vm14 = vcmp.lt.s32.totalorder %v2462_v57, 3  ;;  %v2486_v58 = vsel %vm2484_vm13, %v2474_v39, 2102212464 }
 0x243   : > { %4284 = vcosq.f32 %v2329_v44  ;;  %v2489_v34 = vsel %vm2481_vm11, %v2468_v50, %v2471_v49  ;;  %v2490_v62 = vsel %vm2484_vm13, %v2477_v0, 920167782  ;;  %v2431_v32 = vsub.s32 4, %v2407_v28 }
 0x244   : > { %4286 = vsinq.f32 %v2329_v44  ;;  %v2413_v23 = vclz %v3949_v61  ;;  %v2557_v43 = vshrl.u32 %v2556_v24, 23  ;;  %v2485_v45 = vsel %vm2481_vm11, %v2465_v7, %v2468_v50 }
 0x245   : > { %v2487_v16 = vsel %vm2483_vm14, %v2471_v49, %v2486_v58  ;;  %v2491_v2 = vsel %vm2483_vm14, %v2474_v39, %v2490_v62  ;;  %v2493_v12 = vsel %vm2481_vm11, %v2471_v49, %v2474_v39  ;;  %v2494_v47 = vsel %vm2484_vm13, %v2480_v31, 1326507024 }
 0x246   : > { %v3950_v55 = vadd.s32 4294967294, %v2413_v23  ;;  %v2492_v40 = vsel %vm2482_vm12, %v2489_v34, %v2491_v2  ;;  %v2553_v3 = vand.u32 2147483647, %v4773_v29  ;;  %v2401_v48 = vadd.s32 %v6314_v11, %v6320_v35 }
 0x247   : > { %v2495_v42 = vsel %vm2483_vm14, %v2477_v0, %v2494_v47  ;;  %v6386_v30 = vmul.u32.u64.low %v6351_v1, %v2492_v40  ;;  %v6387_v15 = vmul.u32.u64.high %v6351_v1, %v2492_v40, %v6386_v30  ;;  %v2488_v21 = vsel %vm2482_vm12, %v2485_v45, %v2487_v16 }
 0x248   : > { %vm3951_vm15 = vcmp.lt.s32.totalorder %v3950_v55, 0  ;;  %v2496_v19 = vsel %vm2482_vm12, %v2493_v12, %v2495_v42  ;;  %v3956_v63 = vadd.s32 4294967169, %v2557_v43  ;;  %v2432_v51 = vsel %vm2347_vm10, %v2431_v32, %v2407_v28 }
 0x249   : > { %v2416_v6 = vsel %vm3951_vm15, 0, %v3950_v55  ;;  %v6395_v10 = vmul.u32.u64.low %v6351_v1, %v2496_v19  ;;  %v6396_v11 = vmul.u32.u64.high %v6351_v1, %v2496_v19, %v6395_v10  ;;  %vm2333_vm0 = vweird.f32 %v4764_v25 }
 0x24a   : > { %v2417_v35 = vsub.s32 32, %v2416_v6  ;;  %v2418_v20 = vshll.u32 %v6357_v41, %v2416_v6  ;;  %v2421_v56 = vsub.s32 4294967266, %v2416_v6  ;;  %v2563_v14 = vadd.s32 1, %v3956_v63 }
 0x24b   : > { %vm6402_vm1 = vcmp.le.f32.partialorder %v2345_v52, 0.7853982  ;;  %v2504_v13 = vmul.u32 %v6351_v1, %v2488_v21  ;;  %v2507_v28 = vadd.s32 1, %v6387_v15  ;;  %vm2336_vm2 = vcmp.lt.s32.totalorder %v6342_v22, 2 }
 0x24c   : > { %v2419_v36 = vshrl.u32 %v2401_v48, %v2417_v35  ;;  %v2422_v33 = vadd.s32 127, %v2421_v56  ;;  %vm2564_vm3 = vcmp.gt.s32.totalorder %v2563_v14, 0  ;;  %v2434_v41 = vsel %vm6402_vm1, 0, %v2432_v51 }
 0x24d   : > { %vm2506_vm4 = vc.u32 %v6396_v11, %v6386_v30  ;;  %v2560_v52 = vand.u32 8388607, %v2553_v3  ;;  %v2565_v4 = vsel %vm2564_vm3, %v2563_v14, 0  ;;  %v2660_v50 = vand.u32 2139095040, %v7386_v8 }
 0x24e   : > { %v2420_v59 = vor.u32 %v2419_v36, %v2418_v20  ;;  %v2423_v24 = vshll.u32 %v2422_v33, 23  ;;  %v2508_v1 = vsel %vm2506_vm4, %v2507_v28, %v6387_v15  ;;  %vm2337_vm5 = vcmp.eq.s32.totalorder %v6342_v22, 0 }
 0x24f   : > { %vm2340_vm6 = vcmp.eq.s32.totalorder %v6342_v22, 2  ;;  %v2509_v49 = vadd.s32 %v2508_v1, %v2504_v13  ;;  %v2567_v18 = vand.u32 31, %v2565_v4  ;;  %v2438_v9 = vadd.s32 3, %v2434_v41 }
 0x250   : > { %v4285_v17 = vpop.eup %4284  ;;  %v2424_v7 = vor.u32 4788187, %v2423_v24  ;;  %v2427_v0 = vcvt.s32.f32 %v2420_v59  ;;  %v2657_v39 = vand.u32 2147483647, %v7386_v8  ;;  %v2561_v58 = vor.u32 8388608, %v2560_v52 }
 0x251   : > { %v4287_v44 = vpop.eup %4286  ;;  %v2341_v61 = vxor.u32 2147483648, %v4285_v17  ;;  %v2510_v31 = vadd.s32 536870912, %v2509_v49  ;;  %v2568_v34 = vsub.s32 32, %v2567_v18  ;;  %v2566_v32 = vshrl.u32 %v2565_v4, 5 }
 0x252   : > { %v2338_v62 = vxor.u32 2147483648, %v4287_v44  ;;  %v2425_v23 = vand.u32 2147483647, %v2424_v7  ;;  %v2661_v43 = vshrl.u32 %v2660_v50, 23  ;;  %v2570_v2 = vshll.u32 %v7343_v60, %v2567_v18 }
 0x253   : > { %v2342_v45 = vsel %vm2340_vm6, %v2341_v61, %v4287_v44  ;;  %v6422_v16 = vshrl.u32 %v2510_v31, 30  ;;  %v2571_v12 = vshrl.u32 %v7335_v37, %v2568_v34  ;;  %v2573_v47 = vshll.u32 %v7335_v37, %v2567_v18 }
 0x254   : > { %v2339_v55 = vsel %vm2337_vm5, %v4285_v17, %v2338_v62  ;;  %v2428_v40 = vmul.f32 %v2427_v0, %v2425_v23  ;;  %v2574_v48 = vshrl.u32 %v7336_v54, %v2568_v34  ;;  %v2576_v21 = vshll.u32 %v7336_v54, %v2567_v18 }
 0x255   : > { %v2343_v42 = vsel %vm2336_vm2, %v2339_v55, %v2342_v45  ;;  %v2512_v15 = vshll.u32 %v6422_v16, 30  ;;  %v2577_v19 = vshrl.u32 %v7337_v38, %v2568_v34  ;;  %v2569_v51 = vshrl.u32 %v7343_v60, %v2568_v34 }
 0x256   : > { %v2344_v63 = vsel %vm2333_vm0, nan, %v2343_v42  ;;  %v2429_v6 = vxor.u32 2147483648, %v2428_v40  ;;  %vm2585_vm7 = vcmp.lt.s32.totalorder %v2566_v32, 1  ;;  %v2572_v35 = vor.u32 %v2571_v12, %v2570_v2 }
 0x257   : > { %v6438_v10 = vsub.s32 %v2509_v49, %v2512_v15  ;;  %v2579_v20 = vshll.u32 %v7337_v38, %v2567_v18  ;;  %v2580_v22 = vshrl.u32 %v7338_v46, %v2568_v34  ;;  %3715 = vst [vmem:[%s5096_s11 + $0x90] sm:$0xff] %v2344_v63  ;;  %v2575_v14 = vor.u32 %v2574_v48, %v2573_v47 }
 0x258   : > { %v2430_v56 = vsel %vm2347_vm10, %v2429_v6, %v2428_v40  ;;  %v2582_v13 = vshll.u32 %v7338_v46, %v2567_v18  ;;  %v2583_v25 = vshrl.u32 %v7339_v5, %v2568_v34  ;;  %v2578_v33 = vor.u32 %v2577_v19, %v2576_v21 }
 0x259   : > { %v2433_v28 = vsel %vm6402_vm1, %v4767_v26, %v2430_v56  ;;  %v2515_v36 = vsub.s32 0, %v6438_v10  ;;  %v2581_v41 = vor.u32 %v2580_v22, %v2579_v20  ;;  %vm2588_vm8 = vcmp.lt.s32.totalorder %v2566_v32, 4 }
 0x25a   : > { %4288 = vcosq.f32 %v2433_v28  ;;  %v2584_v52 = vor.u32 %v2583_v25, %v2582_v13  ;;  %v3960_v4 = vadd.s32 4294967169, %v2661_v43  ;;  %vm2587_vm9 = vcmp.lt.s32.totalorder %v2566_v32, 3 }
 0x25b   : > { %4290 = vsinq.f32 %v2433_v28  ;;  %v3953_v59 = vmin.u32 %v2515_v36, %v6438_v10  ;;  %v2601_v24 = vshll.u32 %v2561_v58, 8  ;;  %vm2586_vm10 = vcmp.lt.s32.totalorder %v2566_v32, 2 }
 0x25c   : > { %v2590_v1 = vsel %vm2588_vm8, %v2578_v33, 2102212464  ;;  %v2593_v50 = vsel %vm2585_vm7, %v2572_v35, %v2575_v14  ;;  %v2594_v57 = vsel %vm2588_vm8, %v2581_v41, 920167782  ;;  %v6455_v49 = vand.u32 3, %v2438_v9 }
 0x25d   : > { %v2517_v18 = vclz %v3953_v59  ;;  %v2589_v17 = vsel %vm2585_vm7, %v2569_v51, %v2572_v35  ;;  %v2597_v7 = vsel %vm2585_vm7, %v2575_v14, %v2578_v33  ;;  %vm2451_vm11 = vcmp.lt.s32.totalorder %v4770_v27, 0 }
 0x25e   : > { %v2591_v0 = vsel %vm2587_vm9, %v2575_v14, %v2590_v1  ;;  %v2595_v44 = vsel %vm2587_vm9, %v2578_v33, %v2594_v57  ;;  %v2598_v61 = vsel %vm2588_vm8, %v2584_v52, 1326507024  ;;  %v2667_v31 = vadd.s32 1, %v3960_v4 }
 0x25f   : > { %v2505_v58 = vadd.s32 %v6386_v30, %v6396_v11  ;;  %v3954_v34 = vadd.s32 4294967294, %v2517_v18  ;;  %v2596_v9 = vsel %vm2586_vm10, %v2593_v50, %v2595_v44  ;;  %v2599_v62 = vsel %vm2587_vm9, %v2581_v41, %v2598_v61 }
 0x260   : > { %v2592_v23 = vsel %vm2586_vm10, %v2589_v17, %v2591_v0  ;;  %v2600_v43 = vsel %vm2586_vm10, %v2597_v7, %v2599_v62  ;;  %v6469_v45 = vmul.u32.u64.low %v2601_v24, %v2596_v9  ;;  %v6470_v2 = vmul.u32.u64.high %v2601_v24, %v2596_v9, %v6469_v45 }
 0x261   : > { %vm3955_vm12 = vcmp.lt.s32.totalorder %v3954_v34, 0  ;;  %v6473_v12 = vmul.u32.u64.low %v2601_v24, %v2600_v43  ;;  %v6474_v55 = vmul.u32.u64.high %v2601_v24, %v2600_v43, %v6473_v12  ;;  %vm2668_vm13 = vcmp.gt.s32.totalorder %v2667_v31, 0 }
 0x262   : > { %vm2437_vm14 = vweird.f32 %v4767_v26  ;;  %v2520_v30 = vsel %vm3955_vm12, 0, %v3954_v34  ;;  %v2535_v11 = vsub.s32 4, %v6422_v16  ;;  %v2664_v40 = vand.u32 8388607, %v2657_v39 }
 0x263   : > { %v2669_v47 = vsel %vm2668_vm13, %v2667_v31, 0  ;;  %v2521_v32 = vsub.s32 32, %v2520_v30  ;;  %v2522_v48 = vshll.u32 %v6438_v10, %v2520_v30  ;;  %v2525_v42 = vsub.s32 4294967266, %v2520_v30 }
 0x264   : > { %v2608_v15 = vmul.u32 %v2601_v24, %v2592_v23  ;;  %vm2440_vm15 = vcmp.lt.s32.totalorder %v6455_v49, 2  ;;  %vm6484_vm0 = vcmp.le.f32.partialorder %v2449_v53, 0.7853982  ;;  %v2611_v19 = vadd.s32 1, %v6470_v2 }
 0x265   : > { %v2671_v63 = vand.u32 31, %v2669_v47  ;;  %vm2441_vm1 = vcmp.eq.s32.totalorder %v6455_v49, 0  ;;  %v2523_v6 = vshrl.u32 %v2505_v58, %v2521_v32  ;;  %v2526_v51 = vadd.s32 127, %v2525_v42 }
 0x266   : > { %vm2610_vm2 = vc.u32 %v6474_v55, %v6469_v45  ;;  %vm2444_vm3 = vcmp.eq.s32.totalorder %v6455_v49, 2  ;;  %v2665_v35 = vor.u32 8388608, %v2664_v40  ;;  %v2536_v14 = vsel %vm2451_vm11, %v2535_v11, %v6422_v16 }
 0x267   : > { %v2612_v10 = vsel %vm2610_vm2, %v2611_v19, %v6470_v2  ;;  %v2672_v20 = vsub.s32 32, %v2671_v63  ;;  %v4289_v53 = vpop.eup %4288  ;;  %v2524_v22 = vor.u32 %v2523_v6, %v2522_v48  ;;  %v2527_v56 = vshll.u32 %v2526_v51, 23 }
 0x268   : > { %v2613_v13 = vadd.s32 %v2612_v10, %v2608_v15  ;;  %v4291_v25 = vpop.eup %4290  ;;  %v2445_v28 = vxor.u32 2147483648, %v4289_v53  ;;  %v2674_v36 = vshll.u32 %v7343_v60, %v2671_v63  ;;  %v2677_v33 = vshll.u32 %v7335_v37, %v2671_v63 }
 0x269   : > { %v2680_v41 = vshll.u32 %v7336_v54, %v2671_v63  ;;  %v2442_v52 = vxor.u32 2147483648, %v4291_v25  ;;  %v2528_v4 = vor.u32 4788187, %v2527_v56  ;;  %v2531_v59 = vcvt.s32.f32 %v2524_v22 }
 0x26a   : > { %v2614_v24 = vadd.s32 536870912, %v2613_v13  ;;  %v2446_v1 = vsel %vm2444_vm3, %v2445_v28, %v4291_v25  ;;  %v2675_v50 = vshrl.u32 %v7335_v37, %v2672_v20  ;;  %v2678_v16 = vshrl.u32 %v7336_v54, %v2672_v20 }
 0x26b   : > { %v2681_v57 = vshrl.u32 %v7337_v38, %v2672_v20  ;;  %v2443_v18 = vsel %vm2441_vm1, %v4289_v53, %v2442_v52  ;;  %v2529_v17 = vand.u32 2147483647, %v2528_v4  ;;  %v2683_v0 = vshll.u32 %v7337_v38, %v2671_v63 }
 0x26c   : > { %v2615_v7 = vshrl.u32 %v2614_v24, 30  ;;  %v2447_v44 = vsel %vm2440_vm15, %v2443_v18, %v2446_v1  ;;  %v2670_v61 = vshrl.u32 %v2669_v47, 5  ;;  %v2684_v31 = vshrl.u32 %v7338_v46, %v2672_v20  ;;  %v7391_v1 = vld [vmem:[#allocation12_spill] sm:$0xff] }
 0x26d   : > { %v2686_v58 = vshll.u32 %v7338_v46, %v2671_v63  ;;  %v2448_v34 = vsel %vm2437_vm14, nan, %v2447_v44  ;;  %v2532_v9 = vmul.f32 %v2531_v59, %v2529_v17  ;;  %v2538_v62 = vsel %vm6484_vm0, 0, %v2536_v14 }
 0x26e   : > { %v2616_v23 = vshll.u32 %v2615_v7, 30  ;;  %v2673_v43 = vshrl.u32 %v7343_v60, %v2672_v20  ;;  %v2676_v2 = vor.u32 %v2675_v50, %v2674_v36  ;;  %v2685_v12 = vor.u32 %v2684_v31, %v2683_v0  ;;  %3716 = vst [vmem:[%s5096_s11 + $0x98] sm:$0xff] %v2448_v34 }
 0x26f   : > { %v2687_v49 = vshrl.u32 %v7339_v5, %v2672_v20  ;;  %v2533_v30 = vxor.u32 2147483648, %v2532_v9  ;;  %v2679_v40 = vor.u32 %v2678_v16, %v2677_v33  ;;  %v2682_v47 = vor.u32 %v2681_v57, %v2680_v41 }
 0x270   : > { %v2617_v11 = vsub.s32 %v2613_v13, %v2616_v23  ;;  %vm2689_vm4 = vcmp.lt.s32.totalorder %v2670_v61, 1  ;;  %vm2692_vm5 = vcmp.lt.s32.totalorder %v2670_v61, 4  ;;  %v2705_v26 = vshll.u32 %v2665_v35, 8 }
 0x271   : > { %v2688_v32 = vor.u32 %v2687_v49, %v2686_v58  ;;  %v2534_v48 = vsel %vm2451_vm11, %v2533_v30, %v2532_v9  ;;  %vm2691_vm6 = vcmp.lt.s32.totalorder %v2670_v61, 3  ;;  %v2694_v15 = vsel %vm2692_vm5, %v2682_v47, 2102212464 }
 0x272   : > { %v2619_v42 = vsub.s32 0, %v2617_v11  ;;  %v2537_v19 = vsel %vm6484_vm0, %v4770_v27, %v2534_v48  ;;  %vm2690_vm7 = vcmp.lt.s32.totalorder %v2670_v61, 2  ;;  %v2693_v63 = vsel %vm2689_vm4, %v2673_v43, %v2676_v2 }
 0x273   : > { %v2698_v6 = vsel %vm2692_vm5, %v2685_v12, 920167782  ;;  %4292 = vcosq.f32 %v2537_v19  ;;  %v2695_v10 = vsel %vm2691_vm6, %v2679_v40, %v2694_v15  ;;  %v2697_v35 = vsel %vm2689_vm4, %v2676_v2, %v2679_v40 }
 0x274   : > { %v3957_v51 = vmin.u32 %v2619_v42, %v2617_v11  ;;  %4294 = vsinq.f32 %v2537_v19  ;;  %v2699_v20 = vsel %vm2691_vm6, %v2682_v47, %v2698_v6  ;;  %v2701_v53 = vsel %vm2689_vm4, %v2679_v40, %v2682_v47  ;;  %v7392_v47 = vld [vmem:[#allocation13_spill] sm:$0xff] }
 0x275   : > { %v2702_v22 = vsel %vm2692_vm5, %v2688_v32, 1326507024  ;;  %v2542_v21 = vadd.s32 3, %v2538_v62  ;;  %v2639_v14 = vsub.s32 4, %v2615_v7  ;;  %vm2555_vm8 = vcmp.lt.s32.totalorder %v4773_v29, 0 }
 0x276   : > { %v2621_v56 = vclz %v3957_v51  ;;  %v2696_v13 = vsel %vm2690_vm7, %v2693_v63, %v2695_v10  ;;  %v2700_v25 = vsel %vm2690_vm7, %v2697_v35, %v2699_v20  ;;  %v2703_v28 = vsel %vm2691_vm6, %v2685_v12, %v2702_v22 }
 0x277   : > { %v2704_v33 = vsel %vm2690_vm7, %v2701_v53, %v2703_v28  ;;  %v6537_v41 = vmul.u32.u64.low %v2705_v26, %v2700_v25  ;;  %v6538_v52 = vmul.u32.u64.high %v2705_v26, %v2700_v25, %v6537_v41  ;;  %vm6542_vm9 = vcmp.le.f32.partialorder %v2553_v3, 0.7853982 }
 0x278   : > { %v3958_v36 = vadd.s32 4294967294, %v2621_v56  ;;  %v6546_v59 = vmul.u32.u64.low %v2705_v26, %v2704_v33  ;;  %v6547_v24 = vmul.u32.u64.high %v2705_v26, %v2704_v33, %v6546_v59  ;;  %v2764_v50 = vand.u32 2139095040, %v7391_v1 }
 0x279   : > { %v2543_v16 = vand.u32 3, %v2542_v21  ;;  %v2609_v57 = vadd.s32 %v6469_v45, %v6474_v55  ;;  %v2640_v18 = vsel %vm2555_vm8, %v2639_v14, %v2615_v7  ;;  %v2712_v0 = vmul.u32 %v2705_v26, %v2696_v13 }
 0x27a   : > { %vm3959_vm10 = vcmp.lt.s32.totalorder %v3958_v36, 0  ;;  %v2761_v3 = vand.u32 2147483647, %v7391_v1  ;;  %v2765_v44 = vshrl.u32 %v2764_v50, 23  ;;  %v2715_v34 = vadd.s32 1, %v6538_v52 }
 0x27b   : > { %v2624_v17 = vsel %vm3959_vm10, 0, %v3958_v36  ;;  %v2642_v9 = vsel %vm6542_vm9, 0, %v2640_v18  ;;  %vm2714_vm11 = vc.u32 %v6547_v24, %v6537_v41  ;;  %vm2541_vm12 = vweird.f32 %v4770_v27 }
 0x27c   : > { %v2625_v61 = vsub.s32 32, %v2624_v17  ;;  %v2626_v31 = vshll.u32 %v2617_v11, %v2624_v17  ;;  %v2629_v58 = vsub.s32 4294967266, %v2624_v17  ;;  %v3964_v45 = vadd.s32 4294967169, %v2765_v44 }
 0x27d   : > { %v2716_v7 = vsel %vm2714_vm11, %v2715_v34, %v6538_v52  ;;  %vm2545_vm13 = vcmp.eq.s32.totalorder %v2543_v16, 0  ;;  %v2646_v49 = vadd.s32 3, %v2642_v9  ;;  %v2768_v30 = vand.u32 8388607, %v2761_v3 }
 0x27e   : > { %v2627_v55 = vshrl.u32 %v2609_v57, %v2625_v61  ;;  %v2630_v62 = vadd.s32 127, %v2629_v58  ;;  %v2717_v23 = vadd.s32 %v2716_v7, %v2712_v0  ;;  %v2771_v43 = vadd.s32 1, %v3964_v45 }
 0x27f   : > { %vm2548_vm14 = vcmp.eq.s32.totalorder %v2543_v16, 2  ;;  %v2868_v32 = vand.u32 2139095040, %v7392_v47  ;;  %vm2544_vm0 = vcmp.lt.s32.totalorder %v2543_v16, 2  ;;  %v6566_v20 = vand.u32 3, %v2646_v49 }
 0x280   : > { %v2628_v2 = vor.u32 %v2627_v55, %v2626_v31  ;;  %v2631_v12 = vshll.u32 %v2630_v62, 23  ;;  %v4293_v11 = vpop.eup %4292  ;;  %v2718_v40 = vadd.s32 536870912, %v2717_v23  ;;  %vm2772_vm15 = vcmp.gt.s32.totalorder %v2771_v43, 0 }
 0x281   : > { %v4295_v26 = vpop.eup %4294  ;;  %v2549_v48 = vxor.u32 2147483648, %v4293_v11  ;;  %v2773_v19 = vsel %vm2772_vm15, %v2771_v43, 0  ;;  %v2769_v53 = vor.u32 8388608, %v2768_v30  ;;  %v2869_v14 = vshrl.u32 %v2868_v32, 23 }
 0x282   : > { %v2632_v42 = vor.u32 4788187, %v2631_v12  ;;  %v2635_v15 = vcvt.s32.f32 %v2628_v2  ;;  %v2546_v63 = vxor.u32 2147483648, %v4295_v26  ;;  %v6564_v6 = vshrl.u32 %v2718_v40, 30 }
 0x283   : > { %v2775_v51 = vand.u32 31, %v2773_v19  ;;  %v2550_v10 = vsel %vm2548_vm14, %v2549_v48, %v4295_v26  ;;  %v2713_v28 = vadd.s32 %v6537_v41, %v6547_v24  ;;  %v2865_v36 = vand.u32 2147483647, %v7392_v47 }
 0x284   : > { %v2633_v35 = vand.u32 2147483647, %v2632_v42  ;;  %v2547_v22 = vsel %vm2545_vm13, %v4293_v11, %v2546_v63  ;;  %v2720_v21 = vshll.u32 %v6564_v6, 30  ;;  %v6580_v17 = vshll.u32 %v2769_v53, 8 }
 0x285   : > { %v2776_v56 = vsub.s32 32, %v2775_v51  ;;  %v2551_v13 = vsel %vm2544_vm0, %v2547_v22, %v2550_v10  ;;  %v2778_v59 = vshll.u32 %v7343_v60, %v2775_v51  ;;  %v2781_v50 = vshll.u32 %v7335_v37, %v2775_v51 }
 0x286   : > { %v2636_v25 = vmul.f32 %v2635_v15, %v2633_v35  ;;  %v2552_v33 = vsel %vm2541_vm12, nan, %v2551_v13  ;;  %v6574_v52 = vsub.s32 %v2717_v23, %v2720_v21  ;;  %v2784_v24 = vshll.u32 %v7336_v54, %v2775_v51 }
 0x287   : > { %v2779_v57 = vshrl.u32 %v7335_v37, %v2776_v56  ;;  %v2782_v18 = vshrl.u32 %v7336_v54, %v2776_v56  ;;  %3717 = vst [vmem:[%s5096_s11 + $0xa0] sm:$0xff] %v2552_v33  ;;  %v2785_v27 = vshrl.u32 %v7337_v38, %v2776_v56  ;;  %v3968_v0 = vadd.s32 4294967169, %v2869_v14 }
 0x288   : > { %v2637_v16 = vxor.u32 2147483648, %v2636_v25  ;;  %v2723_v41 = vsub.s32 0, %v6574_v52  ;;  %v2774_v61 = vshrl.u32 %v2773_v19, 5  ;;  %v2777_v31 = vshrl.u32 %v7343_v60, %v2776_v56 }
 0x289   : > { %v2787_v58 = vshll.u32 %v7337_v38, %v2775_v51  ;;  %v2780_v45 = vor.u32 %v2779_v57, %v2778_v59  ;;  %v2783_v55 = vor.u32 %v2782_v18, %v2781_v50  ;;  %v2788_v62 = vshrl.u32 %v7338_v46, %v2776_v56 }
 0x28a   : > { %v2638_v44 = vsel %vm2555_vm8, %v2637_v16, %v2636_v25  ;;  %v3961_v9 = vmin.u32 %v2723_v41, %v6574_v52  ;;  %v2790_v7 = vshll.u32 %v7338_v46, %v2775_v51  ;;  %v2791_v23 = vshrl.u32 %v7339_v5, %v2776_v56 }
 0x28b   : > { %v2641_v34 = vsel %vm6542_vm9, %v4773_v29, %v2638_v44  ;;  %vm2659_vm1 = vcmp.lt.s32.totalorder %v7386_v8, 0  ;;  %v2786_v2 = vor.u32 %v2785_v27, %v2784_v24  ;;  %v6600_v4 = vand.u32 8388607, %v2865_v36 }
 0x28c   : > { %4296 = vcosq.f32 %v2641_v34  ;;  %v2725_v43 = vclz %v3961_v9  ;;  %v2789_v12 = vor.u32 %v2788_v62, %v2787_v58  ;;  %v2792_v49 = vor.u32 %v2791_v23, %v2790_v7  ;;  %v7395_v23 = vld [vmem:[#allocation14_spill] sm:$0xff] }
 0x28d   : > { %4298 = vsinq.f32 %v2641_v34  ;;  %vm2793_vm2 = vcmp.lt.s32.totalorder %v2774_v61, 1  ;;  %v2875_v30 = vadd.s32 1, %v3968_v0  ;;  %vm2794_vm3 = vcmp.lt.s32.totalorder %v2774_v61, 2 }
 0x28e   : > { %v3962_v11 = vadd.s32 4294967294, %v2725_v43  ;;  %vm2795_vm4 = vcmp.lt.s32.totalorder %v2774_v61, 3  ;;  %vm2796_vm5 = vcmp.lt.s32.totalorder %v2774_v61, 4  ;;  %v2797_v40 = vsel %vm2793_vm2, %v2777_v31, %v2780_v45 }
 0x28f   : > { %v2798_v32 = vsel %vm2796_vm5, %v2786_v2, 2102212464  ;;  %v2801_v26 = vsel %vm2793_vm2, %v2780_v45, %v2783_v55  ;;  %v2802_v48 = vsel %vm2796_vm5, %v2789_v12, 920167782  ;;  %v2805_v19 = vsel %vm2793_vm2, %v2783_v55, %v2786_v2 }
 0x290   : > { %vm3963_vm6 = vcmp.lt.s32.totalorder %v3962_v11, 0  ;;  %v2799_v42 = vsel %vm2795_vm4, %v2783_v55, %v2798_v32  ;;  %v2803_v15 = vsel %vm2795_vm4, %v2786_v2, %v2802_v48  ;;  %v2743_v51 = vsub.s32 4, %v6564_v6 }
 0x291   : > { %v2728_v63 = vsel %vm3963_vm6, 0, %v3962_v11  ;;  %v2804_v10 = vsel %vm2794_vm3, %v2801_v26, %v2803_v15  ;;  %v2806_v35 = vsel %vm2796_vm5, %v2792_v49, 1326507024  ;;  %vm2645_vm7 = vweird.f32 %v4773_v29 }
 0x292   : > { %v2729_v53 = vsub.s32 32, %v2728_v63  ;;  %v2730_v22 = vshll.u32 %v6574_v52, %v2728_v63  ;;  %v2733_v21 = vsub.s32 4294967266, %v2728_v63  ;;  %v2807_v56 = vsel %vm2795_vm4, %v2789_v12, %v2806_v35 }
 0x293   : > { %v2800_v14 = vsel %vm2794_vm3, %v2797_v40, %v2799_v42  ;;  %v2808_v13 = vsel %vm2794_vm3, %v2805_v19, %v2807_v56  ;;  %v6612_v25 = vmul.u32.u64.low %v6580_v17, %v2804_v10  ;;  %v6613_v33 = vmul.u32.u64.high %v6580_v17, %v2804_v10, %v6612_v25 }
 0x294   : > { %v2731_v59 = vshrl.u32 %v2713_v28, %v2729_v53  ;;  %v2734_v50 = vadd.s32 127, %v2733_v21  ;;  %v6617_v16 = vmul.u32.u64.low %v6580_v17, %v2808_v13  ;;  %v6618_v57 = vmul.u32.u64.high %v6580_v17, %v2808_v13, %v6617_v16 }
 0x295   : > { %vm2648_vm8 = vcmp.lt.s32.totalorder %v6566_v20, 2  ;;  %vm6623_vm9 = vcmp.le.f32.partialorder %v2657_v39, 0.7853982  ;;  %v2744_v18 = vsel %vm2659_vm1, %v2743_v51, %v6564_v6  ;;  %vm2876_vm10 = vcmp.gt.s32.totalorder %v2875_v30, 0 }
 0x296   : > { %v2732_v41 = vor.u32 %v2731_v59, %v2730_v22  ;;  %v2735_v28 = vshll.u32 %v2734_v50, 23  ;;  %v2816_v24 = vmul.u32 %v6580_v17, %v2800_v14  ;;  %v2877_v27 = vsel %vm2876_vm10, %v2875_v30, 0 }
 0x297   : > { %vm2649_vm11 = vcmp.eq.s32.totalorder %v6566_v20, 0  ;;  %vm2652_vm12 = vcmp.eq.s32.totalorder %v6566_v20, 2  ;;  %v2819_v0 = vadd.s32 1, %v6613_v33  ;;  %v2879_v39 = vand.u32 31, %v2877_v27 }
 0x298   : > { %v2736_v61 = vor.u32 4788187, %v2735_v28  ;;  %v2739_v31 = vcvt.s32.f32 %v2732_v41  ;;  %vm2818_vm13 = vc.u32 %v6618_v57, %v6612_v25  ;;  %v2873_v6 = vor.u32 8388608, %v6600_v4 }
 0x299   : > { %v4297_v44 = vpop.eup %4296  ;;  %v2746_v17 = vsel %vm6623_vm9, 0, %v2744_v18  ;;  %v2820_v9 = vsel %vm2818_vm13, %v2819_v0, %v6613_v33  ;;  %v2880_v45 = vsub.s32 32, %v2879_v39  ;;  %v2972_v43 = vand.u32 2139095040, %v7395_v23 }
 0x29a   : > { %v4299_v58 = vpop.eup %4298  ;;  %v2653_v34 = vxor.u32 2147483648, %v4297_v44  ;;  %v2737_v62 = vand.u32 2147483647, %v2736_v61  ;;  %v2821_v7 = vadd.s32 %v2820_v9, %v2816_v24  ;;  %v2882_v12 = vshll.u32 %v7343_v60, %v2879_v39 }
 0x29b   : > { %v2650_v55 = vxor.u32 2147483648, %v4299_v58  ;;  %v2883_v4 = vshrl.u32 %v7335_v37, %v2880_v45  ;;  %v2885_v49 = vshll.u32 %v7335_v37, %v2879_v39  ;;  %v2886_v32 = vshrl.u32 %v7336_v54, %v2880_v45 }
 0x29c   : > { %v2654_v2 = vsel %vm2652_vm12, %v2653_v34, %v4299_v58  ;;  %v2740_v11 = vmul.f32 %v2739_v31, %v2737_v62  ;;  %v2822_v40 = vadd.s32 536870912, %v2821_v7  ;;  %v2878_v48 = vshrl.u32 %v2877_v27, 5 }
 0x29d   : > { %v2651_v30 = vsel %vm2649_vm11, %v4297_v44, %v2650_v55  ;;  %v2888_v42 = vshll.u32 %v7336_v54, %v2879_v39  ;;  %v2889_v15 = vshrl.u32 %v7337_v38, %v2880_v45  ;;  %v2891_v10 = vshll.u32 %v7337_v38, %v2879_v39 }
 0x29e   : > { %v2655_v26 = vsel %vm2648_vm8, %v2651_v30, %v2654_v2  ;;  %v2741_v63 = vxor.u32 2147483648, %v2740_v11  ;;  %v6655_v51 = vshrl.u32 %v2822_v40, 30  ;;  %v2881_v35 = vshrl.u32 %v7343_v60, %v2880_v45 }
 0x29f   : > { %v2656_v19 = vsel %vm2645_vm7, nan, %v2655_v26  ;;  %v2892_v53 = vshrl.u32 %v7338_v46, %v2880_v45  ;;  %v2894_v20 = vshll.u32 %v7338_v46, %v2879_v39  ;;  %v2895_v22 = vshrl.u32 %v7339_v5, %v2880_v45 }
 0x2a0   : > { %3718 = vst [vmem:[%s5096_s11 + $0xa8] sm:$0xff] %v2656_v19  ;;  %v2742_v21 = vsel %vm2659_vm1, %v2741_v63, %v2740_v11  ;;  %v2824_v29 = vshll.u32 %v6655_v51, 30  ;;  %v2884_v56 = vor.u32 %v2883_v4, %v2882_v12  ;;  %v2887_v14 = vor.u32 %v2886_v32, %v2885_v49 }
 0x2a1   : > { %v2745_v13 = vsel %vm6623_vm9, %v7386_v8, %v2742_v21  ;;  %v2893_v33 = vor.u32 %v2892_v53, %v2891_v10  ;;  %v2896_v59 = vor.u32 %v2895_v22, %v2894_v20  ;;  %vm2897_vm14 = vcmp.lt.s32.totalorder %v2878_v48, 1 }
 0x2a2   : > { %4300 = vcosq.f32 %v2745_v13  ;;  %v2750_v50 = vadd.s32 3, %v2746_v17  ;;  %v6669_v16 = vsub.s32 %v2821_v7, %v2824_v29  ;;  %v2890_v18 = vor.u32 %v2889_v15, %v2888_v42 }
 0x2a3   : > { %4302 = vsinq.f32 %v2745_v13  ;;  %vm2899_vm15 = vcmp.lt.s32.totalorder %v2878_v48, 3  ;;  %vm2900_vm0 = vcmp.lt.s32.totalorder %v2878_v48, 4  ;;  %v2973_v41 = vshrl.u32 %v2972_v43, 23 }
 0x2a4   : > { %v2827_v28 = vsub.s32 0, %v6669_v16  ;;  %vm2898_vm1 = vcmp.lt.s32.totalorder %v2878_v48, 2  ;;  %v2902_v24 = vsel %vm2900_vm0, %v2890_v18, 2102212464  ;;  %v2905_v27 = vsel %vm2897_vm14, %v2884_v56, %v2887_v14 }
 0x2a5   : > { %v2901_v52 = vsel %vm2897_vm14, %v2881_v35, %v2884_v56  ;;  %v2906_v0 = vsel %vm2900_vm0, %v2893_v33, 920167782  ;;  %v2910_v39 = vsel %vm2900_vm0, %v2896_v59, 1326507024  ;;  %v2913_v44 = vshll.u32 %v2873_v6, 8 }
 0x2a6   : > { %v3965_v61 = vmin.u32 %v2827_v28, %v6669_v16  ;;  %v2903_v31 = vsel %vm2899_vm15, %v2887_v14, %v2902_v24  ;;  %v2907_v58 = vsel %vm2899_vm15, %v2890_v18, %v2906_v0  ;;  %v2909_v34 = vsel %vm2897_vm14, %v2887_v14, %v2890_v18 }
 0x2a7   : > { %v2751_v17 = vand.u32 3, %v2750_v50  ;;  %v2908_v9 = vsel %vm2898_vm1, %v2905_v27, %v2907_v58  ;;  %v2911_v45 = vsel %vm2899_vm15, %v2893_v33, %v2910_v39  ;;  %v3972_v55 = vadd.s32 4294967169, %v2973_v41 }
 0x2a8   : > { %v2829_v62 = vclz %v3965_v61  ;;  %v2847_v7 = vsub.s32 4, %v6655_v51  ;;  %v2969_v43 = vand.u32 2147483647, %v7395_v23  ;;  %v2904_v6 = vsel %vm2898_vm1, %v2901_v52, %v2903_v31 }
 0x2a9   : > { %v2912_v2 = vsel %vm2898_vm1, %v2909_v34, %v2911_v45  ;;  %v6684_v12 = vmul.u32.u64.low %v2913_v44, %v2908_v9  ;;  %v6685_v4 = vmul.u32.u64.high %v2913_v44, %v2908_v9, %v6684_v12  ;;  %v2979_v40 = vadd.s32 1, %v3972_v55 }
 0x2aa   : > { %v3966_v49 = vadd.s32 4294967294, %v2829_v62  ;;  %v6688_v30 = vmul.u32.u64.low %v2913_v44, %v2912_v2  ;;  %v6689_v11 = vmul.u32.u64.high %v2913_v44, %v2912_v2, %v6688_v30  ;;  %vm2749_vm2 = vweird.f32 %v7386_v8 }
 0x2ab   : > { %vm2752_vm3 = vcmp.lt.s32.totalorder %v2751_v17, 2  ;;  %vm6694_vm4 = vcmp.le.f32.partialorder %v2761_v3, 0.7853982  ;;  %vm2763_vm5 = vcmp.lt.s32.totalorder %v7391_v1, 0  ;;  %v2817_v26 = vadd.s32 %v6612_v25, %v6618_v57  ;;  %v7398_v30 = vld [vmem:[#allocation15_spill] sm:$0xff] }
 0x2ac   : > { %vm3967_vm6 = vcmp.lt.s32.totalorder %v3966_v49, 0  ;;  %v2976_v48 = vand.u32 8388607, %v2969_v43  ;;  %vm2980_vm7 = vcmp.gt.s32.totalorder %v2979_v40, 0  ;;  %v2920_v15 = vmul.u32 %v2913_v44, %v2904_v6 }
 0x2ad   : > { %v2832_v42 = vsel %vm3967_vm6, 0, %v3966_v49  ;;  %v2923_v19 = vadd.s32 1, %v6685_v4  ;;  %v2981_v63 = vsel %vm2980_vm7, %v2979_v40, 0  ;;  %v6708_v53 = vsel %vm2763_vm5, %v2847_v7, %v6655_v51 }
 0x2ae   : > { %v2833_v10 = vsub.s32 32, %v2832_v42  ;;  %v2834_v3 = vshll.u32 %v6669_v16, %v2832_v42  ;;  %v2837_v35 = vsub.s32 4294967266, %v2832_v42  ;;  %vm2753_vm8 = vcmp.eq.s32.totalorder %v2751_v17, 0 }
 0x2af   : > { %v4301_v25 = vpop.eup %4300  ;;  %vm2756_vm9 = vcmp.eq.s32.totalorder %v2751_v17, 2  ;;  %vm2922_vm10 = vc.u32 %v6689_v11, %v6684_v12  ;;  %v2983_v57 = vand.u32 31, %v2981_v63  ;;  %v2850_v13 = vsel %vm6694_vm4, 0, %v6708_v53 }
 0x2b0   : > { %v4303_v20 = vpop.eup %4302  ;;  %v2757_v22 = vxor.u32 2147483648, %v4301_v25  ;;  %v2835_v21 = vshrl.u32 %v2817_v26, %v2833_v10  ;;  %v2838_v29 = vadd.s32 127, %v2837_v35  ;;  %v2924_v56 = vsel %vm2922_vm10, %v2923_v19, %v6685_v4 }
 0x2b1   : > { %v2754_v14 = vxor.u32 2147483648, %v4303_v20  ;;  %v2925_v51 = vadd.s32 %v2924_v56, %v2920_v15  ;;  %v2984_v33 = vsub.s32 32, %v2983_v57  ;;  %v2977_v18 = vor.u32 8388608, %v2976_v48 }
 0x2b2   : > { %v2758_v59 = vsel %vm2756_vm9, %v2757_v22, %v4303_v20  ;;  %v2836_v50 = vor.u32 %v2835_v21, %v2834_v3  ;;  %v2839_v16 = vshll.u32 %v2838_v29, 23  ;;  %v6717_v24 = vshrl.u32 %v2981_v63, 5 }
 0x2b3   : > { %v2755_v41 = vsel %vm2753_vm8, %v4301_v25, %v2754_v14  ;;  %v2926_v28 = vadd.s32 536870912, %v2925_v51  ;;  %v2986_v27 = vshll.u32 %v7343_v60, %v2983_v57  ;;  %v2989_v44 = vshll.u32 %v7335_v37, %v2983_v57 }
 0x2b4   : > { %v2759_v52 = vsel %vm2752_vm3, %v2755_v41, %v2758_v59  ;;  %v2840_v0 = vor.u32 4788187, %v2839_v16  ;;  %v2843_v39 = vcvt.s32.f32 %v2836_v50  ;;  %v2987_v58 = vshrl.u32 %v7335_v37, %v2984_v33 }
 0x2b5   : > { %v2760_v61 = vsel %vm2749_vm2, nan, %v2759_v52  ;;  %v2927_v31 = vshrl.u32 %v2926_v28, 30  ;;  %v2990_v34 = vshrl.u32 %v7336_v54, %v2984_v33  ;;  %v2992_v45 = vshll.u32 %v7336_v54, %v2983_v57 }
 0x2b6   : > { %v2841_v9 = vand.u32 2147483647, %v2840_v0  ;;  %v2993_v55 = vshrl.u32 %v7337_v38, %v2984_v33  ;;  %v2995_v17 = vshll.u32 %v7337_v38, %v2983_v57  ;;  %3719 = vst [vmem:[%s5096_s11 + $0xb0] sm:$0xff] %v2760_v61  ;;  %v2996_v7 = vshrl.u32 %v7338_v46, %v2984_v33 }
 0x2b7   : > { %v2928_v62 = vshll.u32 %v2927_v31, 30  ;;  %v2998_v6 = vshll.u32 %v7338_v46, %v2983_v57  ;;  %v6732_v8 = vshll.u32 %v2977_v18, 8  ;;  %v2985_v4 = vshrl.u32 %v7343_v60, %v2984_v33 }
 0x2b8   : > { %v2844_v2 = vmul.f32 %v2843_v39, %v2841_v9  ;;  %v2999_v49 = vshrl.u32 %v7339_v5, %v2984_v33  ;;  %v3076_v40 = vand.u32 2139095040, %v7398_v30  ;;  %vm2867_vm11 = vcmp.lt.s32.totalorder %v7392_v47, 0 }
 0x2b9   : > { %v6738_v26 = vsub.s32 %v2925_v51, %v2928_v62  ;;  %v2988_v48 = vor.u32 %v2987_v58, %v2986_v27  ;;  %v2991_v42 = vor.u32 %v2990_v34, %v2989_v44  ;;  %v2997_v15 = vor.u32 %v2996_v7, %v2995_v17 }
 0x2ba   : > { %v2845_v19 = vxor.u32 2147483648, %v2844_v2  ;;  %v2994_v63 = vor.u32 %v2993_v55, %v2992_v45  ;;  %vm3001_vm12 = vcmp.lt.s32.totalorder %v6717_v24, 1  ;;  %vm3002_vm13 = vcmp.lt.s32.totalorder %v6717_v24, 2 }
 0x2bb   : > { %v2931_v10 = vsub.s32 0, %v6738_v26  ;;  %v3000_v3 = vor.u32 %v2999_v49, %v2998_v6  ;;  %vm3003_vm14 = vcmp.lt.s32.totalorder %v6717_v24, 3  ;;  %vm3004_vm15 = vcmp.lt.s32.totalorder %v6717_v24, 4 }
 0x2bc   : > { %v2846_v35 = vsel %vm2763_vm5, %v2845_v19, %v2844_v2  ;;  %v3005_v53 = vsel %vm3001_vm12, %v2985_v4, %v2988_v48  ;;  %v3006_v25 = vsel %vm3004_vm15, %v2994_v63, 2102212464  ;;  %v3010_v57 = vsel %vm3004_vm15, %v2997_v15, 920167782 }
 0x2bd   : > { %v2849_v20 = vsel %vm6694_vm4, %v7391_v1, %v2846_v35  ;;  %vm6758_vm0 = vcmp.le.f32.partialorder %v2865_v36, 0.7853982  ;;  %v3969_v21 = vmin.u32 %v2931_v10, %v6738_v26  ;;  %v3007_v29 = vsel %vm3003_vm14, %v2991_v42, %v3006_v25 }
 0x2be   : > { %v3009_v56 = vsel %vm3001_vm12, %v2988_v48, %v2991_v42  ;;  %4304 = vcosq.f32 %v2849_v20  ;;  %v2951_v14 = vsub.s32 4, %v2927_v31  ;;  %v3011_v32 = vsel %vm3003_vm14, %v2994_v63, %v3010_v57 }
 0x2bf   : > { %v3077_v51 = vshrl.u32 %v3076_v40, 23  ;;  %4306 = vsinq.f32 %v2849_v20  ;;  %v2933_v33 = vclz %v3969_v21  ;;  %v3013_v36 = vsel %vm3001_vm12, %v2991_v42, %v2994_v63  ;;  %v7401_v40 = vld [vmem:[#allocation16_spill] sm:$0xff] }
 0x2c0   : > { %v3073_v59 = vand.u32 2147483647, %v7398_v30  ;;  %v2854_v50 = vadd.s32 3, %v2850_v13  ;;  %v3008_v16 = vsel %vm3002_vm13, %v3005_v53, %v3007_v29  ;;  %v3012_v18 = vsel %vm3002_vm13, %v3009_v56, %v3011_v32 }
 0x2c1   : > { %v3014_v41 = vsel %vm3004_vm15, %v3000_v3, 1326507024  ;;  %v3970_v28 = vadd.s32 4294967294, %v2933_v33  ;;  %v6781_v52 = vmul.u32.u64.low %v6732_v8, %v3012_v18  ;;  %v6782_v0 = vmul.u32.u64.high %v6732_v8, %v3012_v18, %v6781_v52 }
 0x2c2   : > { %v3015_v27 = vsel %vm3003_vm14, %v2997_v15, %v3014_v41  ;;  %v2921_v13 = vadd.s32 %v6684_v12, %v6689_v11  ;;  %v2952_v39 = vsel %vm2867_vm11, %v2951_v14, %v2927_v31  ;;  %v3976_v61 = vadd.s32 4294967169, %v3077_v51 }
 0x2c3   : > { %v3016_v44 = vsel %vm3002_vm13, %v3013_v36, %v3015_v27  ;;  %vm3971_vm1 = vcmp.lt.s32.totalorder %v3970_v28, 0  ;;  %v3080_v9 = vand.u32 8388607, %v3073_v59  ;;  %v2855_v45 = vand.u32 3, %v2854_v50 }
 0x2c4   : > { %v6791_v58 = vmul.u32.u64.low %v6732_v8, %v3016_v44  ;;  %v6792_v34 = vmul.u32.u64.high %v6732_v8, %v3016_v44, %v6791_v58  ;;  %v2936_v55 = vsel %vm3971_vm1, 0, %v3970_v28  ;;  %v3024_v17 = vmul.u32 %v6732_v8, %v3008_v16 }
 0x2c5   : > { %v3083_v12 = vadd.s32 1, %v3976_v61  ;;  %v2937_v11 = vsub.s32 32, %v2936_v55  ;;  %v2938_v31 = vshll.u32 %v6738_v26, %v2936_v55  ;;  %v2941_v62 = vsub.s32 4294967266, %v2936_v55 }
 0x2c6   : > { %v3027_v24 = vadd.s32 1, %v6782_v0  ;;  %v2954_v7 = vsel %vm6758_vm0, 0, %v2952_v39  ;;  %vm3026_vm3 = vc.u32 %v6792_v34, %v6781_v52  ;;  %v3081_v4 = vor.u32 8388608, %v3080_v9 }
 0x2c7   : > { %vm3084_vm2 = vcmp.gt.s32.totalorder %v3083_v12, 0  ;;  %v2939_v6 = vshrl.u32 %v2921_v13, %v2937_v11  ;;  %v2942_v2 = vadd.s32 127, %v2941_v62  ;;  %vm2853_vm4 = vweird.f32 %v7391_v1 }
 0x2c8   : > { %v3028_v8 = vsel %vm3026_vm3, %v3027_v24, %v6782_v0  ;;  %v3085_v49 = vsel %vm3084_vm2, %v3083_v12, 0  ;;  %v3177_v48 = vand.u32 2147483647, %v7401_v40  ;;  %vm2856_vm5 = vcmp.lt.s32.totalorder %v2855_v45, 2 }
 0x2c9   : > { %v2940_v26 = vor.u32 %v2939_v6, %v2938_v31  ;;  %v2943_v42 = vshll.u32 %v2942_v2, 23  ;;  %v3029_v15 = vadd.s32 %v3028_v8, %v3024_v17  ;;  %vm2857_vm6 = vcmp.eq.s32.totalorder %v2855_v45, 0 }
 0x2ca   : > { %vm2860_vm7 = vcmp.eq.s32.totalorder %v2855_v45, 2  ;;  %v6805_v19 = vadd.s32 3, %v2954_v7  ;;  %v3087_v63 = vand.u32 31, %v3085_v49  ;;  %v6807_v25 = vshll.u32 %v3081_v4, 8 }
 0x2cb   : > { %v4305_v10 = vpop.eup %4304  ;;  %v2944_v3 = vor.u32 4788187, %v2943_v42  ;;  %v2947_v35 = vcvt.s32.f32 %v2940_v26  ;;  %v3030_v53 = vadd.s32 536870912, %v3029_v15  ;;  %v3180_v29 = vand.u32 2139095040, %v7401_v40 }
 0x2cc   : > { %v4307_v57 = vpop.eup %4306  ;;  %v2861_v20 = vxor.u32 2147483648, %v4305_v10  ;;  %v3088_v21 = vsub.s32 32, %v3087_v63  ;;  %v6812_v56 = vand.u32 8388607, %v3177_v48  ;;  %v6815_v51 = vadd.s32 %v6781_v52, %v6792_v34 }
 0x2cd   : > { %v2858_v14 = vxor.u32 2147483648, %v4307_v57  ;;  %v2945_v32 = vand.u32 2147483647, %v2944_v3  ;;  %v6817_v33 = vshrl.u32 %v3030_v53, 30  ;;  %v3090_v50 = vshll.u32 %v7343_v60, %v3087_v63 }
 0x2ce   : > { %v2862_v36 = vsel %vm2860_vm7, %v2861_v20, %v4307_v57  ;;  %v3091_v16 = vshrl.u32 %v7335_v37, %v3088_v21  ;;  %v3093_v18 = vshll.u32 %v7335_v37, %v3087_v63  ;;  %v3094_v0 = vshrl.u32 %v7336_v54, %v3088_v21 }
 0x2cf   : > { %v2859_v41 = vsel %vm2857_vm6, %v4305_v10, %v2858_v14  ;;  %v2948_v28 = vmul.f32 %v2947_v35, %v2945_v32  ;;  %v3032_v27 = vshll.u32 %v6817_v33, 30  ;;  %v3096_v13 = vshll.u32 %v7336_v54, %v3087_v63 }
 0x2d0   : > { %v2863_v52 = vsel %vm2856_vm5, %v2859_v41, %v2862_v36  ;;  %v3097_v39 = vshrl.u32 %v7337_v38, %v3088_v21  ;;  %v3181_v44 = vshrl.u32 %v3180_v29, 23  ;;  %v3086_v9 = vshrl.u32 %v3085_v49, 5 }
 0x2d1   : > { %v2864_v61 = vsel %vm2853_vm4, nan, %v2863_v52  ;;  %v2949_v58 = vxor.u32 2147483648, %v2948_v28  ;;  %v6831_v34 = vsub.s32 %v3029_v15, %v3032_v27  ;;  %v3089_v55 = vshrl.u32 %v7343_v60, %v3088_v21 }
 0x2d2   : > { %v3092_v17 = vor.u32 %v3091_v16, %v3090_v50  ;;  %v3099_v12 = vshll.u32 %v7337_v38, %v3087_v63  ;;  %v3100_v45 = vshrl.u32 %v7338_v46, %v3088_v21  ;;  %3720 = vst [vmem:[%s5096_s11 + $0xb8] sm:$0xff] %v2864_v61  ;;  %v3095_v62 = vor.u32 %v3094_v0, %v3093_v18 }
 0x2d3   : > { %v2950_v11 = vsel %vm2867_vm11, %v2949_v58, %v2948_v28  ;;  %v3035_v31 = vsub.s32 0, %v6831_v34  ;;  %v3102_v1 = vshll.u32 %v7338_v46, %v3087_v63  ;;  %v3098_v7 = vor.u32 %v3097_v39, %v3096_v13 }
 0x2d4   : > { %v2953_v24 = vsel %vm6758_vm0, %v7392_v47, %v2950_v11  ;;  %v3101_v6 = vor.u32 %v3100_v45, %v3099_v12  ;;  %v3103_v2 = vshrl.u32 %v7339_v5, %v3088_v21  ;;  %vm3105_vm8 = vcmp.lt.s32.totalorder %v3086_v9, 1 }
 0x2d5   : > { %4308 = vcosq.f32 %v2953_v24  ;;  %v3973_v4 = vmin.u32 %v3035_v31, %v6831_v34  ;;  %v3980_v8 = vadd.s32 4294967169, %v3181_v44  ;;  %vm3107_vm9 = vcmp.lt.s32.totalorder %v3086_v9, 3 }
 0x2d6   : > { %4310 = vsinq.f32 %v2953_v24  ;;  %v3104_v49 = vor.u32 %v3103_v2, %v3102_v1  ;;  %vm3108_vm10 = vcmp.lt.s32.totalorder %v3086_v9, 4  ;;  %v3055_v42 = vsub.s32 4, %v6817_v33 }
 0x2d7   : > { %v3037_v26 = vclz %v3973_v4  ;;  %vm3106_vm11 = vcmp.lt.s32.totalorder %v3086_v9, 2  ;;  %v3109_v15 = vsel %vm3105_vm8, %v3089_v55, %v3092_v17  ;;  %v3110_v22 = vsel %vm3108_vm10, %v3098_v7, 2102212464 }
 0x2d8   : > { %v3113_v63 = vsel %vm3105_vm8, %v3092_v17, %v3095_v62  ;;  %v3114_v10 = vsel %vm3108_vm10, %v3101_v6, 920167782  ;;  %v3117_v3 = vsel %vm3105_vm8, %v3095_v62, %v3098_v7  ;;  %vm6849_vm12 = vcmp.le.f32.partialorder %v2969_v43, 0.7853982 }
 0x2d9   : > { %v3974_v53 = vadd.s32 4294967294, %v3037_v26  ;;  %v3111_v57 = vsel %vm3107_vm9, %v3095_v62, %v3110_v22  ;;  %v3115_v20 = vsel %vm3107_vm9, %v3098_v7, %v3114_v10  ;;  %v3118_v21 = vsel %vm3108_vm10, %v3104_v49, 1326507024  ;;  %v7404_v7 = vld [vmem:[#allocation17_spill] sm:$0xff] }
 0x2da   : > { %v3112_v29 = vsel %vm3106_vm11, %v3109_v15, %v3111_v57  ;;  %v3116_v14 = vsel %vm3106_vm11, %v3113_v63, %v3115_v20  ;;  %v3119_v32 = vsel %vm3107_vm9, %v3101_v6, %v3118_v21  ;;  %v3187_v36 = vadd.s32 1, %v3980_v8 }
 0x2db   : > { %vm3975_vm13 = vcmp.lt.s32.totalorder %v3974_v53, 0  ;;  %v3120_v50 = vsel %vm3106_vm11, %v3117_v3, %v3119_v32  ;;  %v6860_v43 = vmul.u32.u64.low %v6807_v25, %v3116_v14  ;;  %v6861_v16 = vmul.u32.u64.high %v6807_v25, %v3116_v14, %v6860_v43 }
 0x2dc   : > { %v2959_v18 = vand.u32 3, %v6805_v19  ;;  %v3040_v41 = vsel %vm3975_vm13, 0, %v3974_v53  ;;  %v6866_v28 = vmul.u32.u64.low %v6807_v25, %v3120_v50  ;;  %v6867_v27 = vmul.u32.u64.high %v6807_v25, %v3120_v50, %v6866_v28 }
 0x2dd   : > { %vm2957_vm14 = vweird.f32 %v7392_v47  ;;  %v3041_v0 = vsub.s32 32, %v3040_v41  ;;  %v3042_v52 = vshll.u32 %v6831_v34, %v3040_v41  ;;  %v3045_v13 = vsub.s32 4294967266, %v3040_v41 }
 0x2de   : > { %vm3188_vm15 = vcmp.gt.s32.totalorder %v3187_v36, 0  ;;  %vm2971_vm0 = vcmp.lt.s32.totalorder %v7395_v23, 0  ;;  %v3128_v39 = vmul.u32 %v6807_v25, %v3112_v29  ;;  %v3185_v44 = vor.u32 8388608, %v6812_v56 }
 0x2df   : > { %v3189_v61 = vsel %vm3188_vm15, %v3187_v36, 0  ;;  %v3043_v19 = vshrl.u32 %v6815_v51, %v3041_v0  ;;  %v3046_v58 = vadd.s32 127, %v3045_v13  ;;  %v6878_v9 = vsel %vm2971_vm0, %v3055_v42, %v6817_v33 }
 0x2e0   : > { %v3131_v55 = vadd.s32 1, %v6861_v16  ;;  %vm2960_vm1 = vcmp.lt.s32.totalorder %v2959_v18, 2  ;;  %vm2961_vm2 = vcmp.eq.s32.totalorder %v2959_v18, 0  ;;  %vm3130_vm3 = vc.u32 %v6867_v27, %v6860_v43 }
 0x2e1   : > { %v3191_v34 = vand.u32 31, %v3189_v61  ;;  %vm2964_vm4 = vcmp.eq.s32.totalorder %v2959_v18, 2  ;;  %v3044_v25 = vor.u32 %v3043_v19, %v3042_v52  ;;  %v3047_v56 = vshll.u32 %v3046_v58, 23 }
 0x2e2   : > { %v3132_v17 = vsel %vm3130_vm3, %v3131_v55, %v6861_v16  ;;  %v4309_v51 = vpop.eup %4308  ;;  %v3058_v12 = vsel %vm6849_vm12, 0, %v6878_v9  ;;  %v6887_v11 = vshll.u32 %v3185_v44, 8  ;;  %v3284_v6 = vand.u32 2139095040, %v7404_v7 }
 0x2e3   : > { %v3133_v33 = vadd.s32 %v3132_v17, %v3128_v39  ;;  %v3192_v45 = vsub.s32 32, %v3191_v34  ;;  %v4311_v31 = vpop.eup %4310  ;;  %v2965_v62 = vxor.u32 2147483648, %v4309_v51  ;;  %v3048_v1 = vor.u32 4788187, %v3047_v56 }
 0x2e4   : > { %v3051_v24 = vcvt.s32.f32 %v3044_v25  ;;  %v2962_v2 = vxor.u32 2147483648, %v4311_v31  ;;  %v3190_v8 = vshrl.u32 %v3189_v61, 5  ;;  %v3194_v49 = vshll.u32 %v7343_v60, %v3191_v34 }
 0x2e5   : > { %v3134_v4 = vadd.s32 536870912, %v3133_v33  ;;  %v2966_v26 = vsel %vm2964_vm4, %v2965_v62, %v4311_v31  ;;  %v3049_v42 = vand.u32 2147483647, %v3048_v1  ;;  %v3195_v15 = vshrl.u32 %v7335_v37, %v3192_v45 }
 0x2e6   : > { %v3197_v22 = vshll.u32 %v7335_v37, %v3191_v34  ;;  %v2963_v63 = vsel %vm2961_vm2, %v4309_v51, %v2962_v2  ;;  %v3198_v3 = vshrl.u32 %v7336_v54, %v3192_v45  ;;  %v3203_v53 = vshll.u32 %v7337_v38, %v3191_v34 }
 0x2e7   : > { %v3135_v10 = vshrl.u32 %v3134_v4, 30  ;;  %v2967_v57 = vsel %vm2960_vm1, %v2963_v63, %v2966_v26  ;;  %v3052_v20 = vmul.f32 %v3051_v24, %v3049_v42  ;;  %v3200_v21 = vshll.u32 %v7336_v54, %v3191_v34 }
 0x2e8   : > { %v3201_v29 = vshrl.u32 %v7337_v38, %v3192_v45  ;;  %v2968_v14 = vsel %vm2957_vm14, nan, %v2967_v57  ;;  %v3204_v36 = vshrl.u32 %v7338_v46, %v3192_v45  ;;  %vm3209_vm5 = vcmp.lt.s32.totalorder %v3190_v8, 1 }
 0x2e9   : > { %v3136_v32 = vshll.u32 %v3135_v10, 30  ;;  %v3053_v50 = vxor.u32 2147483648, %v3052_v20  ;;  %v3193_v16 = vshrl.u32 %v7343_v60, %v3192_v45  ;;  %v3206_v41 = vshll.u32 %v7338_v46, %v3191_v34  ;;  %3721 = vst [vmem:[%s5096_s11 + $0xc0] sm:$0xff] %v2968_v14 }
 0x2ea   : > { %v3207_v18 = vshrl.u32 %v7339_v5, %v3192_v45  ;;  %v3196_v0 = vor.u32 %v3195_v15, %v3194_v49  ;;  %v3199_v52 = vor.u32 %v3198_v3, %v3197_v22  ;;  %v3205_v13 = vor.u32 %v3204_v36, %v3203_v53 }
 0x2eb   : > { %v6907_v28 = vsub.s32 %v3133_v33, %v3136_v32  ;;  %v3054_v47 = vsel %vm2971_vm0, %v3053_v50, %v3052_v20  ;;  %v3202_v39 = vor.u32 %v3201_v29, %v3200_v21  ;;  %vm3212_vm6 = vcmp.lt.s32.totalorder %v3190_v8, 4 }
 0x2ec   : > { %v3208_v44 = vor.u32 %v3207_v18, %v3206_v41  ;;  %v3057_v61 = vsel %vm6849_vm12, %v7395_v23, %v3054_v47  ;;  %vm3210_vm7 = vcmp.lt.s32.totalorder %v3190_v8, 2  ;;  %vm3211_vm8 = vcmp.lt.s32.totalorder %v3190_v8, 3 }
 0x2ed   : > { %v3139_v19 = vsub.s32 0, %v6907_v28  ;;  %4312 = vcosq.f32 %v3057_v61  ;;  %v3213_v58 = vsel %vm3209_vm5, %v3193_v16, %v3196_v0  ;;  %v3214_v9 = vsel %vm3212_vm6, %v3202_v39, 2102212464 }
 0x2ee   : > { %v3218_v55 = vsel %vm3212_vm6, %v3205_v13, 920167782  ;;  %4314 = vsinq.f32 %v3057_v61  ;;  %v3215_v25 = vsel %vm3211_vm8, %v3199_v52, %v3214_v9  ;;  %v3217_v56 = vsel %vm3209_vm5, %v3196_v0, %v3199_v52 }
 0x2ef   : > { %v3977_v34 = vmin.u32 %v3139_v19, %v6907_v28  ;;  %v3219_v17 = vsel %vm3211_vm8, %v3202_v39, %v3218_v55  ;;  %v3221_v35 = vsel %vm3209_vm5, %v3199_v52, %v3202_v39  ;;  %v3222_v51 = vsel %vm3212_vm6, %v3208_v44, 1326507024  ;;  %v7407_v55 = vld [vmem:[#allocation18_spill] sm:$0xff] }
 0x2f0   : > { %v3062_v33 = vadd.s32 3, %v3058_v12  ;;  %vm3075_vm9 = vcmp.lt.s32.totalorder %v7398_v30, 0  ;;  %v3159_v31 = vsub.s32 4, %v3135_v10  ;;  %v3216_v62 = vsel %vm3210_vm7, %v3213_v58, %v3215_v25 }
 0x2f1   : > { %v3141_v45 = vclz %v3977_v34  ;;  %v3220_v1 = vsel %vm3210_vm7, %v3217_v56, %v3219_v17  ;;  %v3223_v24 = vsel %vm3211_vm8, %v3205_v13, %v3222_v51  ;;  %v3285_v2 = vshrl.u32 %v3284_v6, 23 }
 0x2f2   : > { %v3224_v49 = vsel %vm3210_vm7, %v3221_v35, %v3223_v24  ;;  %v6927_v26 = vmul.u32.u64.low %v6887_v11, %v3220_v1  ;;  %v6928_v42 = vmul.u32.u64.high %v6887_v11, %v3220_v1, %v6927_v26  ;;  %v3281_v22 = vand.u32 2147483647, %v7404_v7 }
 0x2f3   : > { %v3978_v4 = vadd.s32 4294967294, %v3141_v45  ;;  %v6931_v12 = vmul.u32.u64.low %v6887_v11, %v3224_v49  ;;  %v6932_v15 = vmul.u32.u64.high %v6887_v11, %v3224_v49, %v6931_v12  ;;  %v3984_v63 = vadd.s32 4294967169, %v3285_v2 }
 0x2f4   : > { %vm6937_vm10 = vcmp.le.f32.partialorder %v3073_v59, 0.7853982  ;;  %v3129_v6 = vadd.s32 %v6860_v43, %v6867_v27  ;;  %v3160_v8 = vsel %vm3075_vm9, %v3159_v31, %v3135_v10  ;;  %vm3061_vm12 = vweird.f32 %v7395_v23 }
 0x2f5   : > { %vm3979_vm11 = vcmp.lt.s32.totalorder %v3978_v4, 0  ;;  %v3063_v53 = vand.u32 3, %v3062_v33  ;;  %v3232_v20 = vmul.u32 %v6887_v11, %v3216_v62  ;;  %v3291_v21 = vadd.s32 1, %v3984_v63 }
 0x2f6   : > { %v3144_v57 = vsel %vm3979_vm11, 0, %v3978_v4  ;;  %v3235_v32 = vadd.s32 1, %v6928_v42  ;;  %v3162_v43 = vsel %vm6937_vm10, 0, %v3160_v8  ;;  %vm3234_vm13 = vc.u32 %v6932_v15, %v6927_v26 }
 0x2f7   : > { %v3145_v29 = vsub.s32 32, %v3144_v57  ;;  %v3146_v59 = vshll.u32 %v6907_v28, %v3144_v57  ;;  %v3149_v14 = vsub.s32 4294967266, %v3144_v57  ;;  %v3288_v27 = vand.u32 8388607, %v3281_v22 }
 0x2f8   : > { %vm3292_vm14 = vcmp.gt.s32.totalorder %v3291_v21, 0  ;;  %v3236_v11 = vsel %vm3234_vm13, %v3235_v32, %v6928_v42  ;;  %vm3064_vm15 = vcmp.lt.s32.totalorder %v3063_v53, 2  ;;  %vm3065_vm0 = vcmp.eq.s32.totalorder %v3063_v53, 0 }
 0x2f9   : > { %v3147_v10 = vshrl.u32 %v3129_v6, %v3145_v29  ;;  %v3150_v36 = vadd.s32 127, %v3149_v14  ;;  %v3293_v50 = vsel %vm3292_vm14, %v3291_v21, 0  ;;  %v3237_v16 = vadd.s32 %v3236_v11, %v3232_v20 }
 0x2fa   : > { %v3295_v41 = vand.u32 31, %v3293_v50  ;;  %v4313_v18 = vpop.eup %4312  ;;  %vm3068_vm1 = vcmp.eq.s32.totalorder %v3063_v53, 2  ;;  %v6955_v52 = vadd.s32 3, %v3162_v43  ;;  %v3289_v44 = vor.u32 8388608, %v3288_v27 }
 0x2fb   : > { %v3148_v28 = vor.u32 %v3147_v10, %v3146_v59  ;;  %v3151_v0 = vshll.u32 %v3150_v36, 23  ;;  %v4315_v13 = vpop.eup %4314  ;;  %v3069_v47 = vxor.u32 2147483648, %v4313_v18  ;;  %v3238_v39 = vadd.s32 536870912, %v3237_v16 }
 0x2fc   : > { %v3296_v61 = vsub.s32 32, %v3295_v41  ;;  %v3066_v19 = vxor.u32 2147483648, %v4315_v13  ;;  %v3388_v34 = vand.u32 2139095040, %v7407_v55  ;;  %v6959_v56 = vadd.s32 %v6927_v26, %v6932_v15 }
 0x2fd   : > { %v3152_v58 = vor.u32 4788187, %v3151_v0  ;;  %v3155_v9 = vcvt.s32.f32 %v3148_v28  ;;  %v3070_v25 = vsel %vm3068_vm1, %v3069_v47, %v4315_v13  ;;  %v3239_v17 = vshrl.u32 %v3238_v39, 30 }
 0x2fe   : > { %v3294_v35 = vshrl.u32 %v3293_v50, 5  ;;  %v3067_v51 = vsel %vm3065_vm0, %v4313_v18, %v3066_v19  ;;  %v3298_v45 = vshll.u32 %v7343_v60, %v3295_v41  ;;  %v3301_v31 = vshll.u32 %v7335_v37, %v3295_v41 }
 0x2ff   : > { %v3153_v33 = vand.u32 2147483647, %v3152_v58  ;;  %v3071_v62 = vsel %vm3064_vm15, %v3067_v51, %v3070_v25  ;;  %vm3179_vm2 = vcmp.lt.s32.totalorder %v7401_v40, 0  ;;  %v3240_v1 = vshll.u32 %v3239_v17, 30 }
 0x300   : > { %v3299_v24 = vshrl.u32 %v7335_v37, %v3296_v61  ;;  %v3302_v2 = vshrl.u32 %v7336_v54, %v3296_v61  ;;  %v3072_v4 = vsel %vm3061_vm12, nan, %v3071_v62  ;;  %v3304_v26 = vshll.u32 %v7336_v54, %v3295_v41 }
 0x301   : > { %v3156_v49 = vmul.f32 %v3155_v9, %v3153_v33  ;;  %v3305_v42 = vshrl.u32 %v7337_v38, %v3296_v61  ;;  %v6972_v12 = vsub.s32 %v3237_v16, %v3240_v1  ;;  %v3307_v15 = vshll.u32 %v7337_v38, %v3295_v41  ;;  %3722 = vst [vmem:[%s5096_s11 + $0xc8] sm:$0xff] %v3072_v4 }
 0x302   : > { %v3308_v63 = vshrl.u32 %v7338_v46, %v3296_v61  ;;  %v6976_v6 = vshll.u32 %v3289_v44, 8  ;;  %v3263_v53 = vsub.s32 4, %v3239_v17  ;;  %v3297_v57 = vshrl.u32 %v7343_v60, %v3296_v61 }
 0x303   : > { %v3157_v8 = vxor.u32 2147483648, %v3156_v49  ;;  %v3310_v23 = vshll.u32 %v7338_v46, %v3295_v41  ;;  %v3243_v20 = vsub.s32 0, %v6972_v12  ;;  %v3300_v21 = vor.u32 %v3299_v24, %v3298_v45 }
 0x304   : > { %v3303_v29 = vor.u32 %v3302_v2, %v3301_v31  ;;  %v3311_v59 = vshrl.u32 %v7339_v5, %v3296_v61  ;;  %v3306_v32 = vor.u32 %v3305_v42, %v3304_v26  ;;  %v3309_v43 = vor.u32 %v3308_v63, %v3307_v15 }
 0x305   : > { %v3158_v14 = vsel %vm3075_vm9, %v3157_v8, %v3156_v49  ;;  %vm3313_vm3 = vcmp.lt.s32.totalorder %v3294_v35, 1  ;;  %v3981_v10 = vmin.u32 %v3243_v20, %v6972_v12  ;;  %v3389_v11 = vshrl.u32 %v3388_v34, 23 }
 0x306   : > { %v3161_v27 = vsel %vm6937_vm10, %v7398_v30, %v3158_v14  ;;  %v3312_v36 = vor.u32 %v3311_v59, %v3310_v23  ;;  %vm3314_vm4 = vcmp.lt.s32.totalorder %v3294_v35, 2  ;;  %vm3315_vm5 = vcmp.lt.s32.totalorder %v3294_v35, 3 }
 0x307   : > { %4316 = vcosq.f32 %v3161_v27  ;;  %vm3316_vm6 = vcmp.lt.s32.totalorder %v3294_v35, 4  ;;  %v3245_v50 = vclz %v3981_v10  ;;  %v3317_v16 = vsel %vm3313_vm3, %v3297_v57, %v3300_v21 }
 0x308   : > { %4318 = vsinq.f32 %v3161_v27  ;;  %v3321_v41 = vsel %vm3313_vm3, %v3300_v21, %v3303_v29  ;;  %v3264_v18 = vsel %vm3179_vm2, %v3263_v53, %v3239_v17  ;;  %v3318_v28 = vsel %vm3316_vm6, %v3306_v32, 2102212464 }
 0x309   : > { %v3322_v3 = vsel %vm3316_vm6, %v3309_v43, 920167782  ;;  %v3325_v0 = vsel %vm3313_vm3, %v3303_v29, %v3306_v32  ;;  %v3982_v13 = vadd.s32 4294967294, %v3245_v50  ;;  %v3319_v47 = vsel %vm3315_vm5, %v3303_v29, %v3318_v28 }
 0x30a   : > { %v3323_v39 = vsel %vm3315_vm5, %v3306_v32, %v3322_v3  ;;  %v3326_v44 = vsel %vm3316_vm6, %v3312_v36, 1326507024  ;;  %v3320_v61 = vsel %vm3314_vm4, %v3317_v16, %v3319_v47  ;;  %v3988_v9 = vadd.s32 4294967169, %v3389_v11 }
 0x30b   : > { %v3324_v19 = vsel %vm3314_vm4, %v3321_v41, %v3323_v39  ;;  %v3327_v58 = vsel %vm3315_vm5, %v3309_v43, %v3326_v44  ;;  %vm3983_vm7 = vcmp.lt.s32.totalorder %v3982_v13, 0  ;;  %vm7007_vm8 = vcmp.le.f32.partialorder %v3177_v48, 0.7853982 }
 0x30c   : > { %v3328_v34 = vsel %vm3314_vm4, %v3325_v0, %v3327_v58  ;;  %v7001_v25 = vmul.u32.u64.low %v6976_v6, %v3324_v19  ;;  %v7002_v17 = vmul.u32.u64.high %v6976_v6, %v3324_v19, %v7001_v25  ;;  %v3248_v33 = vsel %vm3983_vm7, 0, %v3982_v13 }
 0x30d   : > { %v7012_v45 = vmul.u32.u64.low %v6976_v6, %v3328_v34  ;;  %v7013_v31 = vmul.u32.u64.high %v6976_v6, %v3328_v34, %v7012_v45  ;;  %v3249_v62 = vsub.s32 32, %v3248_v33  ;;  %v3250_v35 = vshll.u32 %v6972_v12, %v3248_v33 }
 0x30e   : > { %v3253_v1 = vsub.s32 4294967266, %v3248_v33  ;;  %v3266_v24 = vsel %vm7007_vm8, 0, %v3264_v18  ;;  %v3336_v2 = vmul.u32 %v6976_v6, %v3320_v61  ;;  %v3395_v4 = vadd.s32 1, %v3988_v9 }
 0x30f   : > { %v3167_v48 = vand.u32 3, %v6955_v52  ;;  %v3251_v49 = vshrl.u32 %v6959_v56, %v3249_v62  ;;  %v3339_v42 = vadd.s32 1, %v7002_v17  ;;  %v3270_v15 = vadd.s32 3, %v3266_v24 }
 0x310   : > { %v3254_v26 = vadd.s32 127, %v3253_v1  ;;  %vm3338_vm9 = vc.u32 %v7013_v31, %v7001_v25  ;;  %v3385_v12 = vand.u32 2147483647, %v7407_v55  ;;  %vm3396_vm10 = vcmp.gt.s32.totalorder %v3395_v4, 0 }
 0x311   : > { %v3252_v63 = vor.u32 %v3251_v49, %v3250_v35  ;;  %v3340_v53 = vsel %vm3338_vm9, %v3339_v42, %v7002_v17  ;;  %v3397_v6 = vsel %vm3396_vm10, %v3395_v4, 0  ;;  %vm3165_vm11 = vweird.f32 %v7398_v30 }
 0x312   : > { %v3255_v8 = vshll.u32 %v3254_v26, 23  ;;  %v3341_v52 = vadd.s32 %v3340_v53, %v3336_v2  ;;  %v3399_v57 = vand.u32 31, %v3397_v6  ;;  %vm3168_vm12 = vcmp.lt.s32.totalorder %v3167_v48, 2 }
 0x313   : > { %vm3172_vm13 = vcmp.eq.s32.totalorder %v3167_v48, 2  ;;  %v3259_v20 = vcvt.s32.f32 %v3252_v63  ;;  %vm3169_vm14 = vcmp.eq.s32.totalorder %v3167_v48, 0  ;;  %v7027_v27 = vand.u32 3, %v3270_v15  ;;  %v7410_v15 = vld [vmem:[#allocation19_spill] sm:$0xff] }
 0x314   : > { %v4317_v56 = vpop.eup %4316  ;;  %v3256_v23 = vor.u32 4788187, %v3255_v8  ;;  %v3342_v59 = vadd.s32 536870912, %v3341_v52  ;;  %v3400_v14 = vsub.s32 32, %v3399_v57  ;;  %v3392_v10 = vand.u32 8388607, %v3385_v12 }
 0x315   : > { %v4319_v21 = vpop.eup %4318  ;;  %v3173_v29 = vxor.u32 2147483648, %v4317_v56  ;;  %v3402_v50 = vshll.u32 %v7343_v60, %v3399_v57  ;;  %v3405_v16 = vshll.u32 %v7335_v37, %v3399_v57  ;;  %v3408_v3 = vshll.u32 %v7336_v54, %v3399_v57 }
 0x316   : > { %v3170_v32 = vxor.u32 2147483648, %v4319_v21  ;;  %v3257_v43 = vand.u32 2147483647, %v3256_v23  ;;  %v7031_v11 = vshrl.u32 %v3342_v59, 30  ;;  %v3403_v28 = vshrl.u32 %v7335_v37, %v3400_v14 }
 0x317   : > { %v3174_v36 = vsel %vm3172_vm13, %v3173_v29, %v4319_v21  ;;  %v3406_v47 = vshrl.u32 %v7336_v54, %v3400_v14  ;;  %v3409_v39 = vshrl.u32 %v7337_v38, %v3400_v14  ;;  %v3393_v19 = vor.u32 8388608, %v3392_v10 }
 0x318   : > { %v3171_v41 = vsel %vm3169_vm14, %v4317_v56, %v3170_v32  ;;  %v3260_v18 = vmul.f32 %v3259_v20, %v3257_v43  ;;  %v3344_v13 = vshll.u32 %v7031_v11, 30  ;;  %v3398_v58 = vshrl.u32 %v3397_v6, 5 }
 0x319   : > { %v3175_v0 = vsel %vm3168_vm12, %v3171_v41, %v3174_v36  ;;  %v3401_v34 = vshrl.u32 %v7343_v60, %v3400_v14  ;;  %v3411_v17 = vshll.u32 %v7337_v38, %v3399_v57  ;;  %v3412_v33 = vshrl.u32 %v7338_v46, %v3400_v14 }
 0x31a   : > { %v3176_v44 = vsel %vm3165_vm11, nan, %v3175_v0  ;;  %v3261_v61 = vxor.u32 2147483648, %v3260_v18  ;;  %v7043_v9 = vsub.s32 %v3341_v52, %v3344_v13  ;;  %v3404_v62 = vor.u32 %v3403_v28, %v3402_v50 }
 0x31b   : > { %3723 = vst [vmem:[%s5096_s11 + $0xd0] sm:$0xff] %v3176_v44  ;;  %v3414_v35 = vshll.u32 %v7338_v46, %v3399_v57  ;;  %v3415_v30 = vshrl.u32 %v7339_v5, %v3400_v14  ;;  %v3407_v2 = vor.u32 %v3406_v47, %v3405_v16  ;;  %v3410_v4 = vor.u32 %v3409_v39, %v3408_v3 }
 0x31c   : > { %v3262_v45 = vsel %vm3179_vm2, %v3261_v61, %v3260_v18  ;;  %v3347_v24 = vsub.s32 0, %v7043_v9  ;;  %v3413_v48 = vor.u32 %v3412_v33, %v3411_v17  ;;  %vm3417_vm15 = vcmp.lt.s32.totalorder %v3398_v58, 1 }
 0x31d   : > { %v3265_v1 = vsel %vm7007_vm8, %v7401_v40, %v3262_v45  ;;  %v3416_v49 = vor.u32 %v3415_v30, %v3414_v35  ;;  %v3433_v42 = vshll.u32 %v3393_v19, 8  ;;  %v3489_v63 = vand.u32 2147483647, %v7410_v15 }
 0x31e   : > { %4320 = vcosq.f32 %v3265_v1  ;;  %v3985_v26 = vmin.u32 %v3347_v24, %v7043_v9  ;;  %v3337_v8 = vadd.s32 %v7001_v25, %v7013_v31  ;;  %vm3419_vm0 = vcmp.lt.s32.totalorder %v3398_v58, 3 }
 0x31f   : > { %4322 = vsinq.f32 %v3265_v1  ;;  %vm3420_vm1 = vcmp.lt.s32.totalorder %v3398_v58, 4  ;;  %v3492_v51 = vand.u32 2139095040, %v7410_v15  ;;  %vm3418_vm2 = vcmp.lt.s32.totalorder %v3398_v58, 2 }
 0x320   : > { %v3349_v53 = vclz %v3985_v26  ;;  %v3425_v6 = vsel %vm3417_vm15, %v3404_v62, %v3407_v2  ;;  %v3429_v52 = vsel %vm3417_vm15, %v3407_v2, %v3410_v4  ;;  %v3421_v57 = vsel %vm3417_vm15, %v3401_v34, %v3404_v62 }
 0x321   : > { %v3422_v56 = vsel %vm3420_vm1, %v3410_v4, 2102212464  ;;  %v3426_v23 = vsel %vm3420_vm1, %v3413_v48, 920167782  ;;  %v3430_v20 = vsel %vm3420_vm1, %v3416_v49, 1326507024  ;;  %vm3269_vm4 = vweird.f32 %v7401_v40 }
 0x322   : > { %v3986_v21 = vadd.s32 4294967294, %v3349_v53  ;;  %v3423_v29 = vsel %vm3419_vm0, %v3407_v2, %v3422_v56  ;;  %v3427_v59 = vsel %vm3419_vm0, %v3410_v4, %v3426_v23  ;;  %v3431_v14 = vsel %vm3419_vm0, %v3413_v48, %v3430_v20 }
 0x323   : > { %v3367_v32 = vsub.s32 4, %v7031_v11  ;;  %v3428_v25 = vsel %vm3418_vm2, %v3425_v6, %v3427_v59  ;;  %v3432_v31 = vsel %vm3418_vm2, %v3429_v52, %v3431_v14  ;;  %v3493_v43 = vshrl.u32 %v3492_v51, 23 }
 0x324   : > { %vm3987_vm3 = vcmp.lt.s32.totalorder %v3986_v21, 0  ;;  %v3424_v10 = vsel %vm3418_vm2, %v3421_v57, %v3423_v29  ;;  %v7066_v36 = vmul.u32.u64.low %v3433_v42, %v3432_v31  ;;  %v7067_v50 = vmul.u32.u64.high %v3433_v42, %v3432_v31, %v7066_v36 }
 0x325   : > { %v3352_v16 = vsel %vm3987_vm3, 0, %v3986_v21  ;;  %v7070_v41 = vmul.u32.u64.low %v3433_v42, %v3428_v25  ;;  %v7071_v18 = vmul.u32.u64.high %v3433_v42, %v3428_v25, %v7070_v41  ;;  %v3992_v28 = vadd.s32 4294967169, %v3493_v43 }
 0x326   : > { %vm3283_vm5 = vcmp.lt.s32.totalorder %v7404_v7, 0  ;;  %v3353_v3 = vsub.s32 32, %v3352_v16  ;;  %v3354_v0 = vshll.u32 %v7043_v9, %v3352_v16  ;;  %v3357_v13 = vsub.s32 4294967266, %v3352_v16 }
 0x327   : > { %vm3272_vm6 = vcmp.lt.s32.totalorder %v7027_v27, 2  ;;  %vm7079_vm7 = vcmp.le.f32.partialorder %v3281_v22, 0.7853982  ;;  %v7086_v39 = vsel %vm3283_vm5, %v3367_v32, %v7031_v11  ;;  %v3499_v44 = vadd.s32 1, %v3992_v28 }
 0x328   : > { %v3355_v61 = vshrl.u32 %v3337_v8, %v3353_v3  ;;  %v3358_v19 = vadd.s32 127, %v3357_v13  ;;  %v3440_v58 = vmul.u32 %v3433_v42, %v3424_v10  ;;  %vm3442_vm8 = vc.u32 %v7067_v50, %v7070_v41  ;;  %v7413_v8 = vld [vmem:[#allocation20_spill] sm:$0xff] }
 0x329   : > { %vm3273_vm9 = vcmp.eq.s32.totalorder %v7027_v27, 0  ;;  %v3443_v9 = vadd.s32 1, %v7071_v18  ;;  %v3496_v22 = vand.u32 8388607, %v3489_v63  ;;  %vm3500_vm10 = vcmp.gt.s32.totalorder %v3499_v44, 0 }
 0x32a   : > { %vm3276_vm11 = vcmp.eq.s32.totalorder %v7027_v27, 2  ;;  %v3356_v11 = vor.u32 %v3355_v61, %v3354_v0  ;;  %v3359_v17 = vshll.u32 %v3358_v19, 23  ;;  %v3501_v33 = vsel %vm3500_vm10, %v3499_v44, 0 }
 0x32b   : > { %v4321_v34 = vpop.eup %4320  ;;  %v3370_v35 = vsel %vm7079_vm7, 0, %v7086_v39  ;;  %v3444_v30 = vsel %vm3442_vm8, %v3443_v9, %v7071_v18  ;;  %v3503_v1 = vand.u32 31, %v3501_v33  ;;  %v3497_v26 = vor.u32 8388608, %v3496_v22 }
 0x32c   : > { %v4323_v45 = vpop.eup %4322  ;;  %v3277_v62 = vxor.u32 2147483648, %v4321_v34  ;;  %v3360_v2 = vor.u32 4788187, %v3359_v17  ;;  %v3363_v4 = vcvt.s32.f32 %v3356_v11  ;;  %v3445_v48 = vadd.s32 %v3444_v30, %v3440_v58 }
 0x32d   : > { %v3274_v24 = vxor.u32 2147483648, %v4323_v45  ;;  %v3504_v42 = vsub.s32 32, %v3503_v1  ;;  %v3596_v51 = vand.u32 2139095040, %v7413_v8  ;;  %v3502_v57 = vshrl.u32 %v3501_v33, 5 }
 0x32e   : > { %v3278_v49 = vsel %vm3276_vm11, %v3277_v62, %v4323_v45  ;;  %v3361_v6 = vand.u32 2147483647, %v3360_v2  ;;  %v3446_v52 = vadd.s32 536870912, %v3445_v48  ;;  %v3506_v23 = vshll.u32 %v7343_v60, %v3503_v1 }
 0x32f   : > { %v3275_v53 = vsel %vm3273_vm9, %v4321_v34, %v3274_v24  ;;  %v3507_v20 = vshrl.u32 %v7335_v37, %v3504_v42  ;;  %v3509_v21 = vshll.u32 %v7335_v37, %v3503_v1  ;;  %v3510_v32 = vshrl.u32 %v7336_v54, %v3504_v42 }
 0x330   : > { %v3279_v56 = vsel %vm3272_vm6, %v3275_v53, %v3278_v49  ;;  %v3364_v59 = vmul.f32 %v3363_v4, %v3361_v6  ;;  %v7109_v14 = vshrl.u32 %v3446_v52, 30  ;;  %v3512_v25 = vshll.u32 %v7336_v54, %v3503_v1 }
 0x331   : > { %v3280_v29 = vsel %vm3269_vm4, nan, %v3279_v56  ;;  %v3513_v31 = vshrl.u32 %v7337_v38, %v3504_v42  ;;  %v3515_v27 = vshll.u32 %v7337_v38, %v3503_v1  ;;  %v3516_v43 = vshrl.u32 %v7338_v46, %v3504_v42 }
 0x332   : > { %3724 = vst [vmem:[%s5096_s11 + $0xd8] sm:$0xff] %v3280_v29  ;;  %v3365_v10 = vxor.u32 2147483648, %v3364_v59  ;;  %v3448_v36 = vshll.u32 %v7109_v14, 30  ;;  %v7118_v16 = vshll.u32 %v3497_v26, 8  ;;  %v3597_v40 = vshrl.u32 %v3596_v51, 23 }
 0x333   : > { %v3505_v18 = vshrl.u32 %v7343_v60, %v3504_v42  ;;  %v3508_v28 = vor.u32 %v3507_v20, %v3506_v23  ;;  %v3518_v3 = vshll.u32 %v7338_v46, %v3503_v1  ;;  %v3519_v0 = vshrl.u32 %v7339_v5, %v3504_v42 }
 0x334   : > { %v3366_v13 = vsel %vm3283_vm5, %v3365_v10, %v3364_v59  ;;  %v7125_v39 = vsub.s32 %v3445_v48, %v3448_v36  ;;  %v3511_v44 = vor.u32 %v3510_v32, %v3509_v21  ;;  %v3517_v61 = vor.u32 %v3516_v43, %v3515_v27 }
 0x335   : > { %v3369_v19 = vsel %vm7079_vm7, %v7404_v7, %v3366_v13  ;;  %v3514_v58 = vor.u32 %v3513_v31, %v3512_v25  ;;  %v3520_v9 = vor.u32 %v3519_v0, %v3518_v3  ;;  %vm3521_vm12 = vcmp.lt.s32.totalorder %v3502_v57, 1 }
 0x336   : > { %4324 = vcosq.f32 %v3369_v19  ;;  %v3451_v22 = vsub.s32 0, %v7125_v39  ;;  %vm3523_vm13 = vcmp.lt.s32.totalorder %v3502_v57, 3  ;;  %vm3524_vm14 = vcmp.lt.s32.totalorder %v3502_v57, 4 }
 0x337   : > { %4326 = vsinq.f32 %v3369_v19  ;;  %vm3522_vm15 = vcmp.lt.s32.totalorder %v3502_v57, 2  ;;  %v3525_v34 = vsel %vm3521_vm12, %v3505_v18, %v3508_v28  ;;  %v3526_v11 = vsel %vm3524_vm14, %v3514_v58, 2102212464 }
 0x338   : > { %v3989_v17 = vmin.u32 %v3451_v22, %v7125_v39  ;;  %v3527_v33 = vsel %vm3523_vm13, %v3511_v44, %v3526_v11  ;;  %v3529_v45 = vsel %vm3521_vm12, %v3508_v28, %v3511_v44  ;;  %v3530_v62 = vsel %vm3524_vm14, %v3517_v61, 920167782 }
 0x339   : > { %v3531_v47 = vsel %vm3523_vm13, %v3514_v58, %v3530_v62  ;;  %v3533_v30 = vsel %vm3521_vm12, %v3511_v44, %v3514_v58  ;;  %v3534_v1 = vsel %vm3524_vm14, %v3520_v9, 1326507024  ;;  %v3374_v24 = vadd.s32 3, %v3370_v35 }
 0x33a   : > { %v3453_v2 = vclz %v3989_v17  ;;  %v3528_v4 = vsel %vm3522_vm15, %v3525_v34, %v3527_v33  ;;  %v3532_v48 = vsel %vm3522_vm15, %v3529_v45, %v3531_v47  ;;  %v3535_v49 = vsel %vm3523_vm13, %v3517_v61, %v3534_v1 }
 0x33b   : > { %v3996_v26 = vadd.s32 4294967169, %v3597_v40  ;;  %v3536_v51 = vsel %vm3522_vm15, %v3533_v30, %v3535_v49  ;;  %v7139_v53 = vmul.u32.u64.low %v7118_v16, %v3532_v48  ;;  %v7140_v6 = vmul.u32.u64.high %v7118_v16, %v3532_v48, %v7139_v53 }
 0x33c   : > { %v3990_v42 = vadd.s32 4294967294, %v3453_v2  ;;  %v7144_v52 = vmul.u32.u64.low %v7118_v16, %v3536_v51  ;;  %v7145_v56 = vmul.u32.u64.high %v7118_v16, %v3536_v51, %v7144_v52  ;;  %v3441_v23 = vadd.s32 %v7070_v41, %v7067_v50 }
 0x33d   : > { %v3603_v35 = vadd.s32 1, %v3996_v26  ;;  %v3593_v20 = vand.u32 2147483647, %v7413_v8  ;;  %v3375_v21 = vand.u32 3, %v3374_v24  ;;  %v3544_v57 = vmul.u32 %v7118_v16, %v3528_v4 }
 0x33e   : > { %vm3991_vm0 = vcmp.lt.s32.totalorder %v3990_v42, 0  ;;  %v3547_v31 = vadd.s32 1, %v7140_v6  ;;  %vm3373_vm2 = vweird.f32 %v7404_v7  ;;  %vm3387_vm3 = vcmp.lt.s32.totalorder %v7407_v55, 0 }
 0x33f   : > { %v3456_v29 = vsel %vm3991_vm0, 0, %v3990_v42  ;;  %vm3604_vm1 = vcmp.gt.s32.totalorder %v3603_v35, 0  ;;  %vm3546_vm4 = vc.u32 %v7145_v56, %v7139_v53  ;;  %v3600_v10 = vand.u32 8388607, %v3593_v20 }
 0x340   : > { %v3457_v59 = vsub.s32 32, %v3456_v29  ;;  %v3458_v32 = vshll.u32 %v7125_v39, %v3456_v29  ;;  %v3461_v25 = vsub.s32 4294967266, %v3456_v29  ;;  %v3605_v50 = vsel %vm3604_vm1, %v3603_v35, 0 }
 0x341   : > { %v3548_v43 = vsel %vm3546_vm4, %v3547_v31, %v7140_v6  ;;  %vm3376_vm5 = vcmp.lt.s32.totalorder %v3375_v21, 2  ;;  %vm3380_vm6 = vcmp.eq.s32.totalorder %v3375_v21, 2  ;;  %v3607_v40 = vand.u32 31, %v3605_v50 }
 0x342   : > { %v3459_v41 = vshrl.u32 %v3441_v23, %v3457_v59  ;;  %v3462_v27 = vadd.s32 127, %v3461_v25  ;;  %v3549_v16 = vadd.s32 %v3548_v43, %v3544_v57  ;;  %vm3377_vm7 = vcmp.eq.s32.totalorder %v3375_v21, 0 }
 0x343   : > { %v4325_v36 = vpop.eup %4324  ;;  %vm7162_vm8 = vcmp.le.f32.partialorder %v3385_v12, 0.7853982  ;;  %v3471_v44 = vsub.s32 4, %v7109_v14  ;;  %v3608_v19 = vsub.s32 32, %v3607_v40  ;;  %v3601_v34 = vor.u32 8388608, %v3600_v10 }
 0x344   : > { %v4327_v18 = vpop.eup %4326  ;;  %v3381_v28 = vxor.u32 2147483648, %v4325_v36  ;;  %v3460_v0 = vor.u32 %v3459_v41, %v3458_v32  ;;  %v3463_v13 = vshll.u32 %v3462_v27, 23  ;;  %v3550_v61 = vadd.s32 536870912, %v3549_v16 }
 0x345   : > { %v3378_v39 = vxor.u32 2147483648, %v4327_v18  ;;  %v3610_v12 = vshll.u32 %v7343_v60, %v3607_v40  ;;  %v3613_v33 = vshll.u32 %v7335_v37, %v3607_v40  ;;  %v3611_v47 = vshrl.u32 %v7335_v37, %v3608_v19 }
 0x346   : > { %v3382_v58 = vsel %vm3380_vm6, %v3381_v28, %v4327_v18  ;;  %v3464_v9 = vor.u32 4788187, %v3463_v13  ;;  %v3467_v22 = vcvt.s32.f32 %v3460_v0  ;;  %v7167_v17 = vshrl.u32 %v3550_v61, 30 }
 0x347   : > { %v3379_v11 = vsel %vm3377_vm7, %v4325_v36, %v3378_v39  ;;  %v3614_v30 = vshrl.u32 %v7336_v54, %v3608_v19  ;;  %v3472_v24 = vsel %vm3387_vm3, %v3471_v44, %v7109_v14  ;;  %v3606_v4 = vshrl.u32 %v3605_v50, 5 }
 0x348   : > { %v3383_v45 = vsel %vm3376_vm5, %v3379_v11, %v3382_v58  ;;  %v3465_v62 = vand.u32 2147483647, %v3464_v9  ;;  %v3552_v2 = vshll.u32 %v7167_v17, 30  ;;  %v3616_v49 = vshll.u32 %v7336_v54, %v3607_v40 }
 0x349   : > { %v3384_v1 = vsel %vm3373_vm2, nan, %v3383_v45  ;;  %v3617_v26 = vshrl.u32 %v7337_v38, %v3608_v19  ;;  %v3619_v42 = vshll.u32 %v7337_v38, %v3607_v40  ;;  %v3620_v51 = vshrl.u32 %v7338_v46, %v3608_v19 }
 0x34a   : > { %v3468_v48 = vmul.f32 %v3467_v22, %v3465_v62  ;;  %3725 = vst [vmem:[%s5096_s11 + $0xe0] sm:$0xff] %v3384_v1  ;;  %v3553_v37 = vsub.s32 %v3549_v16, %v3552_v2  ;;  %v3622_v7 = vshll.u32 %v7338_v46, %v3607_v40  ;;  %v3641_v6 = vshll.u32 %v3601_v34, 8 }
 0x34b   : > { %v3612_v35 = vor.u32 %v3611_v47, %v3610_v12  ;;  %v3615_v14 = vor.u32 %v3614_v30, %v3613_v33  ;;  %v3623_v23 = vshrl.u32 %v7339_v5, %v3608_v19  ;;  %v3609_v29 = vshrl.u32 %v7343_v60, %v3608_v19 }
 0x34c   : > { %v3469_v52 = vxor.u32 2147483648, %v3468_v48  ;;  %v3555_v21 = vsub.s32 0, %v3553_v37  ;;  %v3621_v54 = vor.u32 %v3620_v51, %v3619_v42  ;;  %vm3625_vm9 = vcmp.lt.s32.totalorder %v3606_v4, 1 }
 0x34d   : > { %v3618_v57 = vor.u32 %v3617_v26, %v3616_v49  ;;  %vm3626_vm10 = vcmp.lt.s32.totalorder %v3606_v4, 2  ;;  %vm3628_vm11 = vcmp.lt.s32.totalorder %v3606_v4, 4  ;;  %v3624_v32 = vor.u32 %v3623_v23, %v3622_v7 }
 0x34e   : > { %v3470_v38 = vsel %vm3387_vm3, %v3469_v52, %v3468_v48  ;;  %v3993_v59 = vmin.u32 %v3555_v21, %v3553_v37  ;;  %vm3627_vm12 = vcmp.lt.s32.totalorder %v3606_v4, 3  ;;  %v3633_v60 = vsel %vm3625_vm9, %v3612_v35, %v3615_v14 }
 0x34f   : > { %v3473_v46 = vsel %vm7162_vm8, %v7407_v55, %v3470_v38  ;;  %v3630_v5 = vsel %vm3628_vm11, %v3618_v57, 2102212464  ;;  %v3634_v25 = vsel %vm3628_vm11, %v3621_v54, 920167782  ;;  %v3474_v31 = vsel %vm7162_vm8, 0, %v3472_v24 }
 0x350   : > { %4328 = vcosq.f32 %v3473_v46  ;;  %v3557_v50 = vclz %v3993_v59  ;;  %v3629_v41 = vsel %vm3625_vm9, %v3609_v29, %v3612_v35  ;;  %v3631_v27 = vsel %vm3627_vm12, %v3615_v14, %v3630_v5 }
 0x351   : > { %4330 = vsinq.f32 %v3473_v46  ;;  %v3635_v43 = vsel %vm3627_vm12, %v3618_v57, %v3634_v25  ;;  %v3637_v10 = vsel %vm3625_vm9, %v3615_v14, %v3618_v57  ;;  %v3638_v40 = vsel %vm3628_vm11, %v3624_v32, 1326507024 }
 0x352   : > { %v3994_v36 = vadd.s32 4294967294, %v3557_v50  ;;  %v3636_v16 = vsel %vm3626_vm10, %v3633_v60, %v3635_v43  ;;  %v3478_v18 = vadd.s32 3, %v3474_v31  ;;  %v3639_v28 = vsel %vm3627_vm12, %v3621_v54, %v3638_v40 }
 0x353   : > { %v7205_v3 = vmul.u32.u64.low %v3641_v6, %v3636_v16  ;;  %v7206_v0 = vmul.u32.u64.high %v3641_v6, %v3636_v16, %v7205_v3  ;;  %v3545_v13 = vadd.s32 %v7139_v53, %v7145_v56  ;;  %v3632_v39 = vsel %vm3626_vm10, %v3629_v41, %v3631_v27 }
 0x354   : > { %vm3995_vm13 = vcmp.lt.s32.totalorder %v3994_v36, 0  ;;  %v3640_v44 = vsel %vm3626_vm10, %v3637_v10, %v3639_v28  ;;  %v3648_v11 = vmul.u32 %v3641_v6, %v3632_v39  ;;  %v3479_v33 = vand.u32 3, %v3478_v18 }
 0x355   : > { %v3560_v61 = vsel %vm3995_vm13, 0, %v3994_v36  ;;  %v7212_v19 = vmul.u32.u64.low %v3641_v6, %v3640_v44  ;;  %v7213_v58 = vmul.u32.u64.high %v3641_v6, %v3640_v44, %v7212_v19  ;;  %v3651_v12 = vadd.s32 1, %v7206_v0 }
 0x356   : > { %v3561_v9 = vsub.s32 32, %v3560_v61  ;;  %v3562_v22 = vshll.u32 %v3553_v37, %v3560_v61  ;;  %v3565_v34 = vsub.s32 4294967266, %v3560_v61  ;;  %vm3484_vm15 = vcmp.eq.s32.totalorder %v3479_v33, 2 }
 0x357   : > { %vm3650_vm14 = vc.u32 %v7213_v58, %v7205_v3  ;;  %vm3481_vm0 = vcmp.eq.s32.totalorder %v3479_v33, 0  ;;  %vm3480_vm1 = vcmp.lt.s32.totalorder %v3479_v33, 2  ;;  %vm3477_vm2 = vweird.f32 %v7407_v55 }
 0x358   : > { %v3563_v45 = vshrl.u32 %v3545_v13, %v3561_v9  ;;  %v3566_v62 = vadd.s32 127, %v3565_v34  ;;  %v3652_v47 = vsel %vm3650_vm14, %v3651_v12, %v7206_v0  ;;  %vm3491_vm3 = vcmp.lt.s32.totalorder %v7410_v15, 0 }
 0x359   : > { %v3653_v30 = vadd.s32 %v3652_v47, %v3648_v11  ;;  %v3575_v35 = vsub.s32 4, %v7167_v17  ;;  %vm3490_vm4 = vcmp.le.f32.partialorder %v3489_v63, 0.7853982  ;;  %v3649_v25 = vadd.s32 %v7205_v3, %v7213_v58 }
 0x35a   : > { %v3564_v53 = vor.u32 %v3563_v45, %v3562_v22  ;;  %v3567_v56 = vshll.u32 %v3566_v62, 23  ;;  %vm3581_vm9 = vweird.f32 %v7410_v15  ;;  %vm3595_vm10 = vcmp.lt.s32.totalorder %v7413_v8, 0 }
 0x35b   : > { %v3654_v49 = vadd.s32 536870912, %v3653_v30  ;;  %v3576_v55 = vsel %vm3491_vm3, %v3575_v35, %v7167_v17  ;;  %vm3594_vm11 = vcmp.le.f32.partialorder %v3593_v20, 0.7853982 }
 0x35c   : > { %v3568_v24 = vor.u32 4788187, %v3567_v56  ;;  %v3571_v2 = vcvt.s32.f32 %v3564_v53  ;;  %v3578_v59 = vsel %vm3490_vm4, 0, %v3576_v55 }
 0x35d   : > { %v4329_v1 = vpop.eup %4328  ;;  %v3655_v51 = vshrl.u32 %v3654_v49, 30  ;;  %v3582_v5 = vadd.s32 3, %v3578_v59 }
 0x35e   : > { %v4331_v4 = vpop.eup %4330  ;;  %v3485_v48 = vxor.u32 2147483648, %v4329_v1  ;;  %v3569_v42 = vand.u32 2147483647, %v3568_v24 }
 0x35f   : > { %v3482_v26 = vxor.u32 2147483648, %v4331_v4  ;;  %v3656_v14 = vshll.u32 %v3655_v51, 30  ;;  %v3583_v31 = vand.u32 3, %v3582_v5  ;;  %v3679_v9 = vsub.s32 4, %v3655_v51 }
 0x360   : > { %v3486_v37 = vsel %vm3484_vm15, %v3485_v48, %v4331_v4  ;;  %v3572_v6 = vmul.f32 %v3571_v2, %v3569_v42  ;;  %vm3685_vm15 = vweird.f32 %v7413_v8 }
 0x361   : > { %v3483_v7 = vsel %vm3481_vm0, %v4329_v1, %v3482_v26  ;;  %v3657_v29 = vsub.s32 %v3653_v30, %v3656_v14  ;;  %vm3588_vm6 = vcmp.eq.s32.totalorder %v3583_v31, 2  ;;  %vm3585_vm7 = vcmp.eq.s32.totalorder %v3583_v31, 0 }
 0x362   : > { %v3487_v52 = vsel %vm3480_vm1, %v3483_v7, %v3486_v37  ;;  %v3573_v21 = vxor.u32 2147483648, %v3572_v6  ;;  %vm3584_vm8 = vcmp.lt.s32.totalorder %v3583_v31, 2  ;;  %v3680_v11 = vsel %vm3595_vm10, %v3679_v9, %v3655_v51 }
 0x363   : > { %v3488_v23 = vsel %vm3477_vm2, nan, %v3487_v52  ;;  %v3659_v57 = vsub.s32 0, %v3657_v29  ;;  %v3682_v12 = vsel %vm3594_vm11, 0, %v3680_v11 }
 0x364   : > { %3726 = vst [vmem:[%s5096_s11 + $0xe8] sm:$0xff] %v3488_v23  ;;  %v3574_v54 = vsel %vm3491_vm3, %v3573_v21, %v3572_v6  ;;  %v3686_v33 = vadd.s32 3, %v3682_v12 }
 0x365   : > { %v3577_v38 = vsel %vm3490_vm4, %v7410_v15, %v3574_v54  ;;  %v3997_v46 = vmin.u32 %v3659_v57, %v3657_v29 }
 0x366   : > { %4332 = vcosq.f32 %v3577_v38  ;;  %v3687_v45 = vand.u32 3, %v3686_v33 }
 0x367   : > { %4334 = vsinq.f32 %v3577_v38  ;;  %v3661_v32 = vclz %v3997_v46 }
 0x368   : > { %vm3692_vm12 = vcmp.eq.s32.totalorder %v3687_v45, 2  ;;  %vm3689_vm13 = vcmp.eq.s32.totalorder %v3687_v45, 0  ;;  %vm3688_vm14 = vcmp.lt.s32.totalorder %v3687_v45, 2 }
 0x369   : > { %v3998_v60 = vadd.s32 4294967294, %v3661_v32 }
 0x36b   : > { %vm3999_vm5 = vcmp.lt.s32.totalorder %v3998_v60, 0 }
 0x36c   : > { %v3664_v63 = vsel %vm3999_vm5, 0, %v3998_v60 }
 0x36d   : > { %v3665_v50 = vsub.s32 32, %v3664_v63  ;;  %v3666_v41 = vshll.u32 %v3657_v29, %v3664_v63  ;;  %v3669_v27 = vsub.s32 4294967266, %v3664_v63 }
 0x36f   : > { %v3667_v43 = vshrl.u32 %v3649_v25, %v3665_v50  ;;  %v3670_v17 = vadd.s32 127, %v3669_v27 }
 0x371   : > { %v3668_v36 = vor.u32 %v3667_v43, %v3666_v41  ;;  %v3671_v16 = vshll.u32 %v3670_v17, 23 }
 0x373   : > { %v4333_v10 = vpop.eup %4332  ;;  %v3672_v0 = vor.u32 4788187, %v3671_v16  ;;  %v3675_v3 = vcvt.s32.f32 %v3668_v36 }
 0x374   : > { %v4335_v40 = vpop.eup %4334  ;;  %v3589_v18 = vxor.u32 2147483648, %v4333_v10 }
 0x375   : > { %v3586_v28 = vxor.u32 2147483648, %v4335_v40  ;;  %v3673_v44 = vand.u32 2147483647, %v3672_v0 }
 0x376   : > { %v3590_v13 = vsel %vm3588_vm6, %v3589_v18, %v4335_v40 }
 0x377   : > { %v3587_v39 = vsel %vm3585_vm7, %v4333_v10, %v3586_v28  ;;  %v3676_v58 = vmul.f32 %v3675_v3, %v3673_v44 }
 0x378   : > { %v3591_v61 = vsel %vm3584_vm8, %v3587_v39, %v3590_v13 }
 0x379   : > { %v3592_v19 = vsel %vm3581_vm9, nan, %v3591_v61  ;;  %v3677_v22 = vxor.u32 2147483648, %v3676_v58 }
 0x37a   : > { %3727 = vst [vmem:[%s5096_s11 + $0xf0] sm:$0xff] %v3592_v19 }
 0x37b   : > { %v3678_v34 = vsel %vm3595_vm10, %v3677_v22, %v3676_v58 }
 0x37c   : > { %v3681_v15 = vsel %vm3594_vm11, %v7413_v8, %v3678_v34 }
 0x37d   : > { %4336 = vcosq.f32 %v3681_v15 }
 0x37e   : > { %4338 = vsinq.f32 %v3681_v15 }
 0x38a   : > { %v4337_v62 = vpop.eup %4336 }
 0x38b   : > { %v4339_v53 = vpop.eup %4338  ;;  %v3693_v56 = vxor.u32 2147483648, %v4337_v62 }
 0x38c   : > { %v3690_v20 = vxor.u32 2147483648, %v4339_v53 }
 0x38d   : > { %v3694_v47 = vsel %vm3692_vm12, %v3693_v56, %v4339_v53 }
 0x38e   : > { %v3691_v30 = vsel %vm3689_vm13, %v4337_v62, %v3690_v20 }
 0x38f   : > { %v3695_v1 = vsel %vm3688_vm14, %v3691_v30, %v3694_v47 }
 0x390   : > { %v3696_v24 = vsel %vm3685_vm15, nan, %v3695_v1 }
 0x391   : > { %3728 = vst [vmem:[%s5096_s11 + $0xf8] sm:$0xff] %v3696_v24 }
 0x392   : > { %4409 = shalt.err (!%p4406_p1)
}
 0x393   : > { %s4410_s9 = scalar_lea.hbm %s7239_s8, 4096  ;;  %s4414_s5 = scalar_lea.hbm %s7293_s3, 8192 }
 0x394   : > { %p4411_p10 = scmp.ne.s32.totalorder %s7239_s8, %s4410_s9  ;;  %p4415_p0 = scmp.lt.s32.totalorder %s7239_s8, %s7293_s3 }
 0x395   : > { %p4416_p8 = scmp.lt.s32.totalorder %s4414_s5, %s4410_s9 }
 0x396   : > { %p4412_p13 = pnand %p4411_p10, %p4566_p9 }
 0x397   : > { %p4417_p2 = por %p4416_p8, %p4415_p0 }
 0x398   : > { %p4413_p3 = pneg %p4412_p13 }
 0x39a   : > { %p4418_p5 = pnand %p4417_p2, %p4413_p3 }
 0x39c   : > { %4421 = shalt.err (!%p4418_p5)
}
 0x39d   : > { %s4493_s11 = smov 128   ;;  %s4494_s18 = smov 8  }
 0x39e   : > { %4139 = dma.vmem_to_hbm [thread:$0]  (%p4566_p9), %s7241_s19, 4096, %s7239_s8, %s3730_s15, %s4493_s11, %s4493_s11, %s4494_s18  }
 0x39f PF: > { %s3760_s21 = sand.u32 1, %s4460_s12   ;;  %p4149_p6 = pnand %p3864_p12, %p4573_p11 }
 0x3a0   : > { %s3761_s6 = scalar_lea.sflag [#allocation4], %s3760_s21 }
 0x3a1   : > { %p4150_p4 = pneg %p4149_p6 }
 0x3a3   : > { %4455 = dma.done.wait (%p4150_p4), %s3761_s6, 4096  }
 0x3a4   : > { %4457 = vsyncadd (%p4150_p4), %s3761_s6, 4294963200  ;;  %s22_s17 = sadd.s32 1, %s4480_s17   ;;  %s7416_s12 = smov %s4464_s13 }
 0x3a5   : > { %p19_p7 = scmp.ge.s32.totalorder %s22_s17, 4   ;;  %s7417_s13 = smov %s4468_s14 }
 0x3a6   : > { %s7418_s14 = smov %s4571_s26  ;;  %s7419_s15 = smov %s4476_s16 }
 0x3a7   : > { %s7420_s16 = smov %s7422_s20  ;;  %21 = sbr.rel (!%p19_p7) target bundleno = 8 (0x8), region = 93 }
 0x3ac   :  { %3766 = vsyncpa [#allocation3], 1 }
 0x3ad   :  { %3768 = vsyncpa [#allocation3 + $0x1], 1 }
 0x3ae   :  { %3769 = vsyncpa [#allocation6], 1 }
 0x3af   :  { %3771 = vsyncpa [#allocation6 + $0x1], 1 }
 0x3b0   :  { %3772 = vsyncpa [#allocation4], 1 }
 0x3b1   :  { %3774 = vsyncpa [#allocation4 + $0x1], 1 }

</bundles_post_ra>
